<compile_context>
chip_gen: v7x
topology: tpu7x:2x2x1
jax: 0.10.0
libtpu: 0.0.40
codegen_flags: <defaults>
</compile_context>

<pallas_src>
import functools

import jax
import jax.numpy as jnp
from jax.experimental import pallas as pl
from jax.experimental.pallas import tpu as pltpu


def _round_up(x, m):
    return (x + m - 1) // m * m


# ----------------------------------------------------------------------------
# Pallas kernel 1: 3-D tiled matmul (conv hot path, via im2col)
# ----------------------------------------------------------------------------
def _matmul_kernel(a_ref, b_ref, o_ref, acc_ref):
    @pl.when(pl.program_id(2) == 0)
    def _init():
        acc_ref[...] = jnp.zeros_like(acc_ref)

    acc_ref[...] += jnp.dot(a_ref[...], b_ref[...],
                            preferred_element_type=jnp.float32)

    @pl.when(pl.program_id(2) == pl.num_programs(2) - 1)
    def _done():
        o_ref[...] = acc_ref[...].astype(o_ref.dtype)


_TM_MAX = 256   # M tile (rows of im2col patches)
_TN_MAX = 256   # N tile (output channels)
_TK_MAX = 512   # K tile (kh*kw*cin)


def pallas_matmul(a, b, out_dtype=jnp.float32):
    """a: (M, K), b: (K, N) -> (M, N) in out_dtype with f32 accumulation."""
    M, K = a.shape
    K2, N = b.shape
    assert K == K2

    # Use the full (possibly unaligned) extent when it is small enough to sit
    # comfortably in VMEM; otherwise tile with MXU-friendly sizes and pad
    # minimally.  Full-extent blocks satisfy the (8,128) rule even when the
    # extent is not a multiple of 8/128.
    if M <= _TM_MAX:
        TM, Mp = M, M
    else:
        TM, Mp = _TM_MAX, _round_up(M, _TM_MAX)
    if N <= 2 * _TN_MAX:
        TN, Np = N, N
    else:
        TN, Np = _TN_MAX, _round_up(N, _TN_MAX)
    if K <= 2 * _TK_MAX:
        TK, Kp = K, K
    else:
        TK, Kp = _TK_MAX, _round_up(K, _TK_MAX)

    if (Mp, Kp) != (M, K):
        a = jnp.pad(a, ((0, Mp - M), (0, Kp - K)))
    if (Kp, Np) != (K, N):
        b = jnp.pad(b, ((0, Kp - K), (0, Np - N)))

    out = pl.pallas_call(
        _matmul_kernel,
        out_shape=jax.ShapeDtypeStruct((Mp, Np), out_dtype),
        grid=(Mp // TM, Np // TN, Kp // TK),
        in_specs=[
            pl.BlockSpec((TM, TK), lambda i, j, k: (i, k)),
            pl.BlockSpec((TK, TN), lambda i, j, k: (k, j)),
        ],
        out_specs=pl.BlockSpec((TM, TN), lambda i, j, k: (i, j)),
        scratch_shapes=[pltpu.VMEM((TM, TN), jnp.float32)],
        compiler_params=pltpu.CompilerParams(
            dimension_semantics=("parallel", "parallel", "arbitrary")),
    )(a, b)
    if (Mp, Np) != (M, N):
        out = out[:M, :N]
    return out


# ----------------------------------------------------------------------------
# Pallas kernel 2: BatchNorm statistics (row-tiled reduction, accumulator out)
# ----------------------------------------------------------------------------
def _bn_stats_kernel(x_ref, o_ref):
    @pl.when(pl.program_id(0) == 0)
    def _init():
        o_ref[...] = jnp.zeros_like(o_ref)

    x = x_ref[...]
    o_ref[0:1, :] += jnp.sum(x, axis=0, keepdims=True)
    o_ref[1:2, :] += jnp.sum(x * x, axis=0, keepdims=True)


_ROW_TILE = 1024   # rows per elementwise / reduction block (<= ~1 MB at C=256)


def pallas_bn_stats(x2d):
    """x2d: (M, C) f32 -> (2, C) f32: per-channel [mean, mean of squares]."""
    M, C = x2d.shape
    if M <= _ROW_TILE:
        TM, Mp = M, M
    else:
        TM, Mp = _ROW_TILE, _round_up(M, _ROW_TILE)
        if Mp != M:
            # zero rows leave sum / sum-of-squares unchanged
            x2d = jnp.pad(x2d, ((0, Mp - M), (0, 0)))
    sums = pl.pallas_call(
        _bn_stats_kernel,
        out_shape=jax.ShapeDtypeStruct((2, C), jnp.float32),
        grid=(Mp // TM,),
        in_specs=[pl.BlockSpec((TM, C), lambda i: (i, 0))],
        out_specs=pl.BlockSpec((2, C), lambda i: (0, 0)),
        compiler_params=pltpu.CompilerParams(
            dimension_semantics=("arbitrary",)),
    )(x2d)
    return sums / jnp.float32(M)


# ----------------------------------------------------------------------------
# Pallas kernel 3: fused scale/shift + ReLU (row-tiled elementwise)
# ----------------------------------------------------------------------------
def _affine_act_kernel(x_ref, s_ref, b_ref, o_ref, *, relu):
    y = x_ref[...] * s_ref[...] + b_ref[...]
    if relu:
        y = jnp.maximum(y, 0.0)
    o_ref[...] = y.astype(o_ref.dtype)


def pallas_affine_act(x2d, scale, shift, relu=True, out_dtype=jnp.float32):
    M, C = x2d.shape
    if M <= _ROW_TILE:
        TM, Mp = M, M
    else:
        TM, Mp = _ROW_TILE, _round_up(M, _ROW_TILE)
        if Mp != M:
            x2d = jnp.pad(x2d, ((0, Mp - M), (0, 0)))
    s2 = scale.reshape(1, C).astype(jnp.float32)
    b2 = shift.reshape(1, C).astype(jnp.float32)
    out = pl.pallas_call(
        functools.partial(_affine_act_kernel, relu=relu),
        out_shape=jax.ShapeDtypeStruct((Mp, C), out_dtype),
        grid=(Mp // TM,),
        in_specs=[
            pl.BlockSpec((TM, C), lambda i: (i, 0)),
            pl.BlockSpec((1, C), lambda i: (0, 0)),
            pl.BlockSpec((1, C), lambda i: (0, 0)),
        ],
        out_specs=pl.BlockSpec((TM, C), lambda i: (i, 0)),
        compiler_params=pltpu.CompilerParams(
            dimension_semantics=("parallel",)),
    )(x2d, s2, b2)
    if Mp != M:
        out = out[:M]
    return out


# ----------------------------------------------------------------------------
# Conv / BatchNorm wrappers (glue = padding + patch extraction)
# ----------------------------------------------------------------------------
def _extract_patches(x, kh, kw, stride):
    """x: (N, Hp, Wp, C) already padded -> ((N*Ho*Wo, kh*kw*C), (N, Ho, Wo))."""
    N, Hp, Wp, C = x.shape
    Ho = (Hp - kh) // stride + 1
    Wo = (Wp - kw) // stride + 1
    cols = []
    for i in range(kh):
        for j in range(kw):
            cols.append(
                x[:, i: i + stride * (Ho - 1) + 1: stride,
                     j: j + stride * (Wo - 1) + 1: stride, :]
            )
    patches = jnp.stack(cols, axis=3)  # (N, Ho, Wo, kh*kw, C)
    return patches.reshape(N * Ho * Wo, kh * kw * C), (N, Ho, Wo)


def conv2d(x, w, stride=1, padding=0, pad_mode="zero"):
    """x: NHWC activations (bf16), w: (kh, kw, cin, cout) f32 -> NHWC f32."""
    kh, kw, cin, cout = w.shape
    if padding > 0:
        mode = "reflect" if pad_mode == "reflect" else "constant"
        x = jnp.pad(x, ((0, 0), (padding, padding), (padding, padding), (0, 0)),
                    mode=mode)
    # TODO(synk): fuse the kh*kw tap extraction into the matmul kernel
    # (shifted pl.ds loads of an NHWC VMEM tile) to avoid materializing the
    # im2col-inflated patch matrix in HBM.
    patches, (n, ho, wo) = _extract_patches(x.astype(jnp.bfloat16), kh, kw, stride)
    w2 = w.reshape(kh * kw * cin, cout).astype(jnp.bfloat16)
    out = pallas_matmul(patches, w2, out_dtype=jnp.float32)
    return out.reshape(n, ho, wo, cout)


def batch_norm_act(x, gamma, beta, relu=True, eps=1e-5, out_dtype=jnp.float32):
    """Training-mode BatchNorm2d (batch statistics) + optional ReLU."""
    N, H, W, C = x.shape
    x2 = x.reshape(-1, C)
    stats = pallas_bn_stats(x2)                      # Pallas tiled reduction
    mean = stats[0]
    var = jnp.maximum(stats[1] - mean * mean, 0.0)   # biased variance (PyTorch norm)
    scale = gamma * jax.lax.rsqrt(var + eps)
    shift = beta - mean * scale
    out = pallas_affine_act(x2, scale, shift, relu=relu, out_dtype=out_dtype)
    return out.reshape(N, H, W, C)


# ----------------------------------------------------------------------------
# Parameter initialization (deterministic, synthetic)
# ----------------------------------------------------------------------------
def init_encoder_params(key, input_nc, ngf):
    ks = jax.random.split(key, 3)

    def w(k, kh, kw, cin, cout):
        return 0.1 * jax.random.normal(k, (kh, kw, cin, cout), jnp.float32)

    return {
        "w0": w(ks[0], 7, 7, input_nc, ngf),
        "g0": jnp.ones((ngf,), jnp.float32), "b0": jnp.zeros((ngf,), jnp.float32),
        "w1": w(ks[1], 3, 3, ngf, ngf * 2),
        "g1": jnp.ones((ngf * 2,), jnp.float32), "b1": jnp.zeros((ngf * 2,), jnp.float32),
        "w2": w(ks[2], 3, 3, ngf * 2, ngf * 4),
        "g2": jnp.ones((ngf * 4,), jnp.float32), "b2": jnp.zeros((ngf * 4,), jnp.float32),
    }


# ----------------------------------------------------------------------------
# FTGAN_Encoder forward
#   ReflectionPad2d(3) -> Conv7x7 (no bias) -> BN -> ReLU
#   -> [Conv3x3 s2 p1 (no bias) -> BN -> ReLU] x 2
# ----------------------------------------------------------------------------
def ftgan_encoder_forward(params, x_nchw):
    # NCHW -> NHWC; bf16 activations feed the MXU path.
    x = jnp.transpose(x_nchw, (0, 2, 3, 1)).astype(jnp.bfloat16)

    y = conv2d(x, params["w0"], stride=1, padding=3, pad_mode="reflect")
    x = batch_norm_act(y, params["g0"], params["b0"], relu=True,
                       out_dtype=jnp.bfloat16)

    y = conv2d(x, params["w1"], stride=2, padding=1)
    x = batch_norm_act(y, params["g1"], params["b1"], relu=True,
                       out_dtype=jnp.bfloat16)

    y = conv2d(x, params["w2"], stride=2, padding=1)
    x = batch_norm_act(y, params["g2"], params["b2"], relu=True,
                       out_dtype=jnp.float32)

    # NHWC -> NCHW
    return jnp.transpose(x, (0, 3, 1, 2))


# ----------------------------------------------------------------------------
if __name__ == "__main__":
    B, input_nc, H, W = 2, 4, 16, 16
    ngf = 8          # small synthetic size (module default 64)

    root = jax.random.PRNGKey(0)
    kp, kx = jax.random.split(root)
    params = init_encoder_params(kp, input_nc, ngf)
    x = jax.random.normal(kx, (B, input_nc, H, W), jnp.float32)

    fwd = jax.jit(ftgan_encoder_forward)
    out = jax.block_until_ready(fwd(params, x))

    assert out.shape == (B, ngf * 4, H // 4, W // 4), out.shape
    assert bool(jnp.all(jnp.isfinite(out)))
    print("KERNEL_OK")
</pallas_src>

<mosaic_0001>
module attributes {stable_mosaic.version = 11 : i64} {
  func.func @_matmul_kernel(%arg0: i32, %arg1: i32, %arg2: i32, %arg3: memref<256x196xbf16, #tpu.memory_space<vmem>>, %arg4: memref<196x8xbf16, #tpu.memory_space<vmem>>, %arg5: memref<256x8xf32, #tpu.memory_space<vmem>>, %arg6: memref<256x8xf32, #tpu.memory_space<vmem>>) attributes {dimension_semantics = [#tpu.dimension_semantics<parallel>, #tpu.dimension_semantics<parallel>, #tpu.dimension_semantics<arbitrary>], iteration_bounds = array<i64: 2, 1, 1>, scalar_prefetch = 0 : i64, scratch_operands = 1 : i64, tpu.core_type = #tpu.core_type<tc>, window_params = [{transform_indices = @transform_0, window_bounds = array<i64: 256, 196>}, {transform_indices = @transform_1, window_bounds = array<i64: 196, 8>}, {transform_indices = @transform_2, window_bounds = array<i64: 256, 8>}]} {
    %c0_i32 = arith.constant 0 : i32
    %0 = arith.cmpi eq, %arg2, %c0_i32 : i32
    %1 = arith.extui %0 : i1 to i32
    %c0_i32_0 = arith.constant 0 : i32
    %2 = arith.cmpi ne, %1, %c0_i32_0 : i32
    scf.if %2 {
      %cst_10 = arith.constant 0.000000e+00 : f32
      %12 = vector.broadcast %cst_10 : f32 to vector<256x8xf32>
      %c0_11 = arith.constant 0 : index
      %c0_12 = arith.constant 0 : index
      %13 = vector.load %arg6[%c0_11, %c0_12] : memref<256x8xf32, #tpu.memory_space<vmem>>, vector<256x8xf32>
      tpu.vector_store %arg6[%c0_11, %c0_12], %12 {strides = array<i32>} : memref<256x8xf32, #tpu.memory_space<vmem>>, vector<256x8xf32>,
    } else {
    }
    %c0 = arith.constant 0 : index
    %c0_1 = arith.constant 0 : index
    %3 = vector.load %arg6[%c0, %c0_1] : memref<256x8xf32, #tpu.memory_space<vmem>>, vector<256x8xf32>
    %c0_2 = arith.constant 0 : index
    %c0_3 = arith.constant 0 : index
    %4 = vector.load %arg3[%c0_2, %c0_3] : memref<256x196xbf16, #tpu.memory_space<vmem>>, vector<256x196xbf16>
    %c0_4 = arith.constant 0 : index
    %c0_5 = arith.constant 0 : index
    %5 = vector.load %arg4[%c0_4, %c0_5] : memref<196x8xbf16, #tpu.memory_space<vmem>>, vector<196x8xbf16>
    %cst = arith.constant dense<0.000000e+00> : vector<256x8xf32>
    %6 = tpu.matmul %4, %5, %cst {dimension_numbers = #tpu.dot_dimension_numbers<[1], [0], [0], [1], [0, 0, 1, 1], [], []>} : vector<256x196xbf16>, vector<196x8xbf16>, vector<256x8xf32> -> vector<256x8xf32>
    %7 = arith.addf %3, %6 : vector<256x8xf32>
    %c0_6 = arith.constant 0 : index
    %c0_7 = arith.constant 0 : index
    %8 = vector.load %arg6[%c0_6, %c0_7] : memref<256x8xf32, #tpu.memory_space<vmem>>, vector<256x8xf32>
    tpu.vector_store %arg6[%c0_6, %c0_7], %7 {strides = array<i32>} : memref<256x8xf32, #tpu.memory_space<vmem>>, vector<256x8xf32>,
    %c0_i32_8 = arith.constant 0 : i32
    %9 = arith.cmpi eq, %arg2, %c0_i32_8 : i32
    %10 = arith.extui %9 : i1 to i32
    %c0_i32_9 = arith.constant 0 : i32
    %11 = arith.cmpi ne, %10, %c0_i32_9 : i32
    scf.if %11 {
      %c0_10 = arith.constant 0 : index
      %c0_11 = arith.constant 0 : index
      %12 = vector.load %arg6[%c0_10, %c0_11] : memref<256x8xf32, #tpu.memory_space<vmem>>, vector<256x8xf32>
      %c0_12 = arith.constant 0 : index
      %c0_13 = arith.constant 0 : index
      %13 = vector.load %arg5[%c0_12, %c0_13] : memref<256x8xf32, #tpu.memory_space<vmem>>, vector<256x8xf32>
      tpu.vector_store %arg5[%c0_12, %c0_13], %12 {strides = array<i32>} : memref<256x8xf32, #tpu.memory_space<vmem>>, vector<256x8xf32>,
    } else {
    }
    return
  }
  func.func @transform_0(%arg0: i32, %arg1: i32, %arg2: i32) -> (i32, i32) {
    %c0_i32 = arith.constant 0 : i32
    return %arg0, %arg2 : i32, i32
  }
  func.func @transform_1(%arg0: i32, %arg1: i32, %arg2: i32) -> (i32, i32) {
    %c0_i32 = arith.constant 0 : i32
    return %arg2, %arg1 : i32, i32
  }
  func.func @transform_2(%arg0: i32, %arg1: i32, %arg2: i32) -> (i32, i32) {
    %c0_i32 = arith.constant 0 : i32
    return %arg0, %arg1 : i32, i32
  }
}

module attributes {stable_mosaic.version = 11 : i64} {
  func.func @_bn_stats_kernel(%arg0: i32, %arg1: memref<512x8xf32, #tpu.memory_space<vmem>>, %arg2: memref<2x8xf32, #tpu.memory_space<vmem>>) attributes {dimension_semantics = [#tpu.dimension_semantics<arbitrary>], iteration_bounds = array<i64: 1>, scalar_prefetch = 0 : i64, scratch_operands = 0 : i64, tpu.core_type = #tpu.core_type<tc>, window_params = [{transform_indices = @transform_0, window_bounds = array<i64: 512, 8>}, {pipeline_mode = #tpu.pipeline_mode<synchronous>, transform_indices = @transform_1, window_bounds = array<i64: 2, 8>}]} {
    %c0_i32 = arith.constant 0 : i32
    %0 = arith.cmpi eq, %arg0, %c0_i32 : i32
    %1 = arith.extui %0 : i1 to i32
    %c0_i32_0 = arith.constant 0 : i32
    %2 = arith.cmpi ne, %1, %c0_i32_0 : i32
    scf.if %2 {
      %cst_10 = arith.constant 0.000000e+00 : f32
      %15 = vector.broadcast %cst_10 : f32 to vector<2x8xf32>
      %c0_11 = arith.constant 0 : index
      %c0_12 = arith.constant 0 : index
      %16 = vector.load %arg2[%c0_11, %c0_12] : memref<2x8xf32, #tpu.memory_space<vmem>>, vector<2x8xf32>
      tpu.vector_store %arg2[%c0_11, %c0_12], %15 {strides = array<i32>} : memref<2x8xf32, #tpu.memory_space<vmem>>, vector<2x8xf32>,
    } else {
    }
    %c0 = arith.constant 0 : index
    %c0_1 = arith.constant 0 : index
    %3 = vector.load %arg1[%c0, %c0_1] : memref<512x8xf32, #tpu.memory_space<vmem>>, vector<512x8xf32>
    %c0_2 = arith.constant 0 : index
    %c0_3 = arith.constant 0 : index
    %4 = vector.load %arg2[%c0_2, %c0_3] : memref<2x8xf32, #tpu.memory_space<vmem>>, vector<1x8xf32>
    %cst = arith.constant dense<0.000000e+00> : vector<8xf32>
    %5 = vector.multi_reduction <add>, %3, %cst [0] : vector<512x8xf32> to vector<8xf32>
    %6 = vector.shape_cast %5 : vector<8xf32> to vector<1x8xf32>
    %7 = arith.addf %4, %6 : vector<1x8xf32>
    %c0_4 = arith.constant 0 : index
    %c0_5 = arith.constant 0 : index
    %8 = vector.load %arg2[%c0_4, %c0_5] : memref<2x8xf32, #tpu.memory_space<vmem>>, vector<1x8xf32>
    tpu.vector_store %arg2[%c0_4, %c0_5], %7 {strides = array<i32>} : memref<2x8xf32, #tpu.memory_space<vmem>>, vector<1x8xf32>,
    %c1 = arith.constant 1 : index
    %c0_6 = arith.constant 0 : index
    %9 = vector.load %arg2[%c1, %c0_6] : memref<2x8xf32, #tpu.memory_space<vmem>>, vector<1x8xf32>
    %10 = arith.mulf %3, %3 : vector<512x8xf32>
    %cst_7 = arith.constant dense<0.000000e+00> : vector<8xf32>
    %11 = vector.multi_reduction <add>, %10, %cst_7 [0] : vector<512x8xf32> to vector<8xf32>
    %12 = vector.shape_cast %11 : vector<8xf32> to vector<1x8xf32>
    %13 = arith.addf %9, %12 : vector<1x8xf32>
    %c1_8 = arith.constant 1 : index
    %c0_9 = arith.constant 0 : index
    %14 = vector.load %arg2[%c1_8, %c0_9] : memref<2x8xf32, #tpu.memory_space<vmem>>, vector<1x8xf32>
    tpu.vector_store %arg2[%c1_8, %c0_9], %13 {strides = array<i32>} : memref<2x8xf32, #tpu.memory_space<vmem>>, vector<1x8xf32>,
    return
  }
  func.func @transform_0(%arg0: i32) -> (i32, i32) {
    %c0_i32 = arith.constant 0 : i32
    %c0_i32_0 = arith.constant 0 : i32
    return %arg0, %c0_i32 : i32, i32
  }
  func.func @transform_1(%arg0: i32) -> (i32, i32) {
    %c0_i32 = arith.constant 0 : i32
    %c0_i32_0 = arith.constant 0 : i32
    %c0_i32_1 = arith.constant 0 : i32
    return %c0_i32, %c0_i32_0 : i32, i32
  }
}

module attributes {stable_mosaic.version = 11 : i64} {
  func.func @_affine_act_kernel(%arg0: i32, %arg1: memref<512x8xf32, #tpu.memory_space<vmem>>, %arg2: memref<1x8xf32, #tpu.memory_space<vmem>>, %arg3: memref<1x8xf32, #tpu.memory_space<vmem>>, %arg4: memref<512x8xbf16, #tpu.memory_space<vmem>>) attributes {dimension_semantics = [#tpu.dimension_semantics<parallel>], iteration_bounds = array<i64: 1>, scalar_prefetch = 0 : i64, scratch_operands = 0 : i64, tpu.core_type = #tpu.core_type<tc>, window_params = [{transform_indices = @transform_0, window_bounds = array<i64: 512, 8>}, {pipeline_mode = #tpu.pipeline_mode<synchronous>, transform_indices = @transform_1, window_bounds = array<i64: 1, 8>}, {pipeline_mode = #tpu.pipeline_mode<synchronous>, transform_indices = @transform_2, window_bounds = array<i64: 1, 8>}, {transform_indices = @transform_3, window_bounds = array<i64: 512, 8>}]} {
    %c0 = arith.constant 0 : index
    %c0_0 = arith.constant 0 : index
    %0 = vector.load %arg1[%c0, %c0_0] : memref<512x8xf32, #tpu.memory_space<vmem>>, vector<512x8xf32>
    %c0_1 = arith.constant 0 : index
    %c0_2 = arith.constant 0 : index
    %1 = vector.load %arg2[%c0_1, %c0_2] : memref<1x8xf32, #tpu.memory_space<vmem>>, vector<1x8xf32>
    %2 = vector.broadcast %1 : vector<1x8xf32> to vector<512x8xf32>
    %3 = arith.mulf %0, %2 : vector<512x8xf32>
    %c0_3 = arith.constant 0 : index
    %c0_4 = arith.constant 0 : index
    %4 = vector.load %arg3[%c0_3, %c0_4] : memref<1x8xf32, #tpu.memory_space<vmem>>, vector<1x8xf32>
    %5 = vector.broadcast %4 : vector<1x8xf32> to vector<512x8xf32>
    %6 = arith.addf %3, %5 : vector<512x8xf32>
    %cst = arith.constant 0.000000e+00 : f32
    %7 = vector.broadcast %cst : f32 to vector<512x8xf32>
    %8 = arith.maximumf %6, %7 : vector<512x8xf32>
    %9 = arith.truncf %8 : vector<512x8xf32> to vector<512x8xbf16>
    %c0_5 = arith.constant 0 : index
    %c0_6 = arith.constant 0 : index
    %10 = vector.load %arg4[%c0_5, %c0_6] : memref<512x8xbf16, #tpu.memory_space<vmem>>, vector<512x8xbf16>
    tpu.vector_store %arg4[%c0_5, %c0_6], %9 {strides = array<i32>} : memref<512x8xbf16, #tpu.memory_space<vmem>>, vector<512x8xbf16>,
    return
  }
  func.func @transform_0(%arg0: i32) -> (i32, i32) {
    %c0_i32 = arith.constant 0 : i32
    %c0_i32_0 = arith.constant 0 : i32
    return %arg0, %c0_i32 : i32, i32
  }
  func.func @transform_1(%arg0: i32) -> (i32, i32) {
    %c0_i32 = arith.constant 0 : i32
    %c0_i32_0 = arith.constant 0 : i32
    %c0_i32_1 = arith.constant 0 : i32
    return %c0_i32, %c0_i32_0 : i32, i32
  }
  func.func @transform_2(%arg0: i32) -> (i32, i32) {
    %c0_i32 = arith.constant 0 : i32
    %c0_i32_0 = arith.constant 0 : i32
    %c0_i32_1 = arith.constant 0 : i32
    return %c0_i32, %c0_i32_0 : i32, i32
  }
  func.func @transform_3(%arg0: i32) -> (i32, i32) {
    %c0_i32 = arith.constant 0 : i32
    %c0_i32_0 = arith.constant 0 : i32
    return %arg0, %c0_i32 : i32, i32
  }
}

module attributes {stable_mosaic.version = 11 : i64} {
  func.func @_matmul_kernel(%arg0: i32, %arg1: i32, %arg2: i32, %arg3: memref<128x72xbf16, #tpu.memory_space<vmem>>, %arg4: memref<72x16xbf16, #tpu.memory_space<vmem>>, %arg5: memref<128x16xf32, #tpu.memory_space<vmem>>, %arg6: memref<128x16xf32, #tpu.memory_space<vmem>>) attributes {dimension_semantics = [#tpu.dimension_semantics<parallel>, #tpu.dimension_semantics<parallel>, #tpu.dimension_semantics<arbitrary>], iteration_bounds = array<i64: 1, 1, 1>, scalar_prefetch = 0 : i64, scratch_operands = 1 : i64, tpu.core_type = #tpu.core_type<tc>, window_params = [{transform_indices = @transform_0, window_bounds = array<i64: 128, 72>}, {transform_indices = @transform_1, window_bounds = array<i64: 72, 16>}, {transform_indices = @transform_2, window_bounds = array<i64: 128, 16>}]} {
    %c0_i32 = arith.constant 0 : i32
    %0 = arith.cmpi eq, %arg2, %c0_i32 : i32
    %1 = arith.extui %0 : i1 to i32
    %c0_i32_0 = arith.constant 0 : i32
    %2 = arith.cmpi ne, %1, %c0_i32_0 : i32
    scf.if %2 {
      %cst_10 = arith.constant 0.000000e+00 : f32
      %12 = vector.broadcast %cst_10 : f32 to vector<128x16xf32>
      %c0_11 = arith.constant 0 : index
      %c0_12 = arith.constant 0 : index
      %13 = vector.load %arg6[%c0_11, %c0_12] : memref<128x16xf32, #tpu.memory_space<vmem>>, vector<128x16xf32>
      tpu.vector_store %arg6[%c0_11, %c0_12], %12 {strides = array<i32>} : memref<128x16xf32, #tpu.memory_space<vmem>>, vector<128x16xf32>,
    } else {
    }
    %c0 = arith.constant 0 : index
    %c0_1 = arith.constant 0 : index
    %3 = vector.load %arg6[%c0, %c0_1] : memref<128x16xf32, #tpu.memory_space<vmem>>, vector<128x16xf32>
    %c0_2 = arith.constant 0 : index
    %c0_3 = arith.constant 0 : index
    %4 = vector.load %arg3[%c0_2, %c0_3] : memref<128x72xbf16, #tpu.memory_space<vmem>>, vector<128x72xbf16>
    %c0_4 = arith.constant 0 : index
    %c0_5 = arith.constant 0 : index
    %5 = vector.load %arg4[%c0_4, %c0_5] : memref<72x16xbf16, #tpu.memory_space<vmem>>, vector<72x16xbf16>
    %cst = arith.constant dense<0.000000e+00> : vector<128x16xf32>
    %6 = tpu.matmul %4, %5, %cst {dimension_numbers = #tpu.dot_dimension_numbers<[1], [0], [0], [1], [0, 0, 1, 1], [], []>} : vector<128x72xbf16>, vector<72x16xbf16>, vector<128x16xf32> -> vector<128x16xf32>
    %7 = arith.addf %3, %6 : vector<128x16xf32>
    %c0_6 = arith.constant 0 : index
    %c0_7 = arith.constant 0 : index
    %8 = vector.load %arg6[%c0_6, %c0_7] : memref<128x16xf32, #tpu.memory_space<vmem>>, vector<128x16xf32>
    tpu.vector_store %arg6[%c0_6, %c0_7], %7 {strides = array<i32>} : memref<128x16xf32, #tpu.memory_space<vmem>>, vector<128x16xf32>,
    %c0_i32_8 = arith.constant 0 : i32
    %9 = arith.cmpi eq, %arg2, %c0_i32_8 : i32
    %10 = arith.extui %9 : i1 to i32
    %c0_i32_9 = arith.constant 0 : i32
    %11 = arith.cmpi ne, %10, %c0_i32_9 : i32
    scf.if %11 {
      %c0_10 = arith.constant 0 : index
      %c0_11 = arith.constant 0 : index
      %12 = vector.load %arg6[%c0_10, %c0_11] : memref<128x16xf32, #tpu.memory_space<vmem>>, vector<128x16xf32>
      %c0_12 = arith.constant 0 : index
      %c0_13 = arith.constant 0 : index
      %13 = vector.load %arg5[%c0_12, %c0_13] : memref<128x16xf32, #tpu.memory_space<vmem>>, vector<128x16xf32>
      tpu.vector_store %arg5[%c0_12, %c0_13], %12 {strides = array<i32>} : memref<128x16xf32, #tpu.memory_space<vmem>>, vector<128x16xf32>,
    } else {
    }
    return
  }
  func.func @transform_0(%arg0: i32, %arg1: i32, %arg2: i32) -> (i32, i32) {
    %c0_i32 = arith.constant 0 : i32
    return %arg0, %arg2 : i32, i32
  }
  func.func @transform_1(%arg0: i32, %arg1: i32, %arg2: i32) -> (i32, i32) {
    %c0_i32 = arith.constant 0 : i32
    return %arg2, %arg1 : i32, i32
  }
  func.func @transform_2(%arg0: i32, %arg1: i32, %arg2: i32) -> (i32, i32) {
    %c0_i32 = arith.constant 0 : i32
    return %arg0, %arg1 : i32, i32
  }
}

module attributes {stable_mosaic.version = 11 : i64} {
  func.func @_bn_stats_kernel(%arg0: i32, %arg1: memref<128x16xf32, #tpu.memory_space<vmem>>, %arg2: memref<2x16xf32, #tpu.memory_space<vmem>>) attributes {dimension_semantics = [#tpu.dimension_semantics<arbitrary>], iteration_bounds = array<i64: 1>, scalar_prefetch = 0 : i64, scratch_operands = 0 : i64, tpu.core_type = #tpu.core_type<tc>, window_params = [{transform_indices = @transform_0, window_bounds = array<i64: 128, 16>}, {pipeline_mode = #tpu.pipeline_mode<synchronous>, transform_indices = @transform_1, window_bounds = array<i64: 2, 16>}]} {
    %c0_i32 = arith.constant 0 : i32
    %0 = arith.cmpi eq, %arg0, %c0_i32 : i32
    %1 = arith.extui %0 : i1 to i32
    %c0_i32_0 = arith.constant 0 : i32
    %2 = arith.cmpi ne, %1, %c0_i32_0 : i32
    scf.if %2 {
      %cst_10 = arith.constant 0.000000e+00 : f32
      %15 = vector.broadcast %cst_10 : f32 to vector<2x16xf32>
      %c0_11 = arith.constant 0 : index
      %c0_12 = arith.constant 0 : index
      %16 = vector.load %arg2[%c0_11, %c0_12] : memref<2x16xf32, #tpu.memory_space<vmem>>, vector<2x16xf32>
      tpu.vector_store %arg2[%c0_11, %c0_12], %15 {strides = array<i32>} : memref<2x16xf32, #tpu.memory_space<vmem>>, vector<2x16xf32>,
    } else {
    }
    %c0 = arith.constant 0 : index
    %c0_1 = arith.constant 0 : index
    %3 = vector.load %arg1[%c0, %c0_1] : memref<128x16xf32, #tpu.memory_space<vmem>>, vector<128x16xf32>
    %c0_2 = arith.constant 0 : index
    %c0_3 = arith.constant 0 : index
    %4 = vector.load %arg2[%c0_2, %c0_3] : memref<2x16xf32, #tpu.memory_space<vmem>>, vector<1x16xf32>
    %cst = arith.constant dense<0.000000e+00> : vector<16xf32>
    %5 = vector.multi_reduction <add>, %3, %cst [0] : vector<128x16xf32> to vector<16xf32>
    %6 = vector.shape_cast %5 : vector<16xf32> to vector<1x16xf32>
    %7 = arith.addf %4, %6 : vector<1x16xf32>
    %c0_4 = arith.constant 0 : index
    %c0_5 = arith.constant 0 : index
    %8 = vector.load %arg2[%c0_4, %c0_5] : memref<2x16xf32, #tpu.memory_space<vmem>>, vector<1x16xf32>
    tpu.vector_store %arg2[%c0_4, %c0_5], %7 {strides = array<i32>} : memref<2x16xf32, #tpu.memory_space<vmem>>, vector<1x16xf32>,
    %c1 = arith.constant 1 : index
    %c0_6 = arith.constant 0 : index
    %9 = vector.load %arg2[%c1, %c0_6] : memref<2x16xf32, #tpu.memory_space<vmem>>, vector<1x16xf32>
    %10 = arith.mulf %3, %3 : vector<128x16xf32>
    %cst_7 = arith.constant dense<0.000000e+00> : vector<16xf32>
    %11 = vector.multi_reduction <add>, %10, %cst_7 [0] : vector<128x16xf32> to vector<16xf32>
    %12 = vector.shape_cast %11 : vector<16xf32> to vector<1x16xf32>
    %13 = arith.addf %9, %12 : vector<1x16xf32>
    %c1_8 = arith.constant 1 : index
    %c0_9 = arith.constant 0 : index
    %14 = vector.load %arg2[%c1_8, %c0_9] : memref<2x16xf32, #tpu.memory_space<vmem>>, vector<1x16xf32>
    tpu.vector_store %arg2[%c1_8, %c0_9], %13 {strides = array<i32>} : memref<2x16xf32, #tpu.memory_space<vmem>>, vector<1x16xf32>,
    return
  }
  func.func @transform_0(%arg0: i32) -> (i32, i32) {
    %c0_i32 = arith.constant 0 : i32
    %c0_i32_0 = arith.constant 0 : i32
    return %arg0, %c0_i32 : i32, i32
  }
  func.func @transform_1(%arg0: i32) -> (i32, i32) {
    %c0_i32 = arith.constant 0 : i32
    %c0_i32_0 = arith.constant 0 : i32
    %c0_i32_1 = arith.constant 0 : i32
    return %c0_i32, %c0_i32_0 : i32, i32
  }
}

module attributes {stable_mosaic.version = 11 : i64} {
  func.func @_affine_act_kernel(%arg0: i32, %arg1: memref<128x16xf32, #tpu.memory_space<vmem>>, %arg2: memref<1x16xf32, #tpu.memory_space<vmem>>, %arg3: memref<1x16xf32, #tpu.memory_space<vmem>>, %arg4: memref<128x16xbf16, #tpu.memory_space<vmem>>) attributes {dimension_semantics = [#tpu.dimension_semantics<parallel>], iteration_bounds = array<i64: 1>, scalar_prefetch = 0 : i64, scratch_operands = 0 : i64, tpu.core_type = #tpu.core_type<tc>, window_params = [{transform_indices = @transform_0, window_bounds = array<i64: 128, 16>}, {pipeline_mode = #tpu.pipeline_mode<synchronous>, transform_indices = @transform_1, window_bounds = array<i64: 1, 16>}, {pipeline_mode = #tpu.pipeline_mode<synchronous>, transform_indices = @transform_2, window_bounds = array<i64: 1, 16>}, {transform_indices = @transform_3, window_bounds = array<i64: 128, 16>}]} {
    %c0 = arith.constant 0 : index
    %c0_0 = arith.constant 0 : index
    %0 = vector.load %arg1[%c0, %c0_0] : memref<128x16xf32, #tpu.memory_space<vmem>>, vector<128x16xf32>
    %c0_1 = arith.constant 0 : index
    %c0_2 = arith.constant 0 : index
    %1 = vector.load %arg2[%c0_1, %c0_2] : memref<1x16xf32, #tpu.memory_space<vmem>>, vector<1x16xf32>
    %2 = vector.broadcast %1 : vector<1x16xf32> to vector<128x16xf32>
    %3 = arith.mulf %0, %2 : vector<128x16xf32>
    %c0_3 = arith.constant 0 : index
    %c0_4 = arith.constant 0 : index
    %4 = vector.load %arg3[%c0_3, %c0_4] : memref<1x16xf32, #tpu.memory_space<vmem>>, vector<1x16xf32>
    %5 = vector.broadcast %4 : vector<1x16xf32> to vector<128x16xf32>
    %6 = arith.addf %3, %5 : vector<128x16xf32>
    %cst = arith.constant 0.000000e+00 : f32
    %7 = vector.broadcast %cst : f32 to vector<128x16xf32>
    %8 = arith.maximumf %6, %7 : vector<128x16xf32>
    %9 = arith.truncf %8 : vector<128x16xf32> to vector<128x16xbf16>
    %c0_5 = arith.constant 0 : index
    %c0_6 = arith.constant 0 : index
    %10 = vector.load %arg4[%c0_5, %c0_6] : memref<128x16xbf16, #tpu.memory_space<vmem>>, vector<128x16xbf16>
    tpu.vector_store %arg4[%c0_5, %c0_6], %9 {strides = array<i32>} : memref<128x16xbf16, #tpu.memory_space<vmem>>, vector<128x16xbf16>,
    return
  }
  func.func @transform_0(%arg0: i32) -> (i32, i32) {
    %c0_i32 = arith.constant 0 : i32
    %c0_i32_0 = arith.constant 0 : i32
    return %arg0, %c0_i32 : i32, i32
  }
  func.func @transform_1(%arg0: i32) -> (i32, i32) {
    %c0_i32 = arith.constant 0 : i32
    %c0_i32_0 = arith.constant 0 : i32
    %c0_i32_1 = arith.constant 0 : i32
    return %c0_i32, %c0_i32_0 : i32, i32
  }
  func.func @transform_2(%arg0: i32) -> (i32, i32) {
    %c0_i32 = arith.constant 0 : i32
    %c0_i32_0 = arith.constant 0 : i32
    %c0_i32_1 = arith.constant 0 : i32
    return %c0_i32, %c0_i32_0 : i32, i32
  }
  func.func @transform_3(%arg0: i32) -> (i32, i32) {
    %c0_i32 = arith.constant 0 : i32
    %c0_i32_0 = arith.constant 0 : i32
    return %arg0, %c0_i32 : i32, i32
  }
}

module attributes {stable_mosaic.version = 11 : i64} {
  func.func @_matmul_kernel(%arg0: i32, %arg1: i32, %arg2: i32, %arg3: memref<32x144xbf16, #tpu.memory_space<vmem>>, %arg4: memref<144x32xbf16, #tpu.memory_space<vmem>>, %arg5: memref<32x32xf32, #tpu.memory_space<vmem>>, %arg6: memref<32x32xf32, #tpu.memory_space<vmem>>) attributes {dimension_semantics = [#tpu.dimension_semantics<parallel>, #tpu.dimension_semantics<parallel>, #tpu.dimension_semantics<arbitrary>], iteration_bounds = array<i64: 1, 1, 1>, scalar_prefetch = 0 : i64, scratch_operands = 1 : i64, tpu.core_type = #tpu.core_type<tc>, window_params = [{transform_indices = @transform_0, window_bounds = array<i64: 32, 144>}, {transform_indices = @transform_1, window_bounds = array<i64: 144, 32>}, {transform_indices = @transform_2, window_bounds = array<i64: 32, 32>}]} {
    %c0_i32 = arith.constant 0 : i32
    %0 = arith.cmpi eq, %arg2, %c0_i32 : i32
    %1 = arith.extui %0 : i1 to i32
    %c0_i32_0 = arith.constant 0 : i32
    %2 = arith.cmpi ne, %1, %c0_i32_0 : i32
    scf.if %2 {
      %cst_10 = arith.constant 0.000000e+00 : f32
      %12 = vector.broadcast %cst_10 : f32 to vector<32x32xf32>
      %c0_11 = arith.constant 0 : index
      %c0_12 = arith.constant 0 : index
      %13 = vector.load %arg6[%c0_11, %c0_12] : memref<32x32xf32, #tpu.memory_space<vmem>>, vector<32x32xf32>
      tpu.vector_store %arg6[%c0_11, %c0_12], %12 {strides = array<i32>} : memref<32x32xf32, #tpu.memory_space<vmem>>, vector<32x32xf32>,
    } else {
    }
    %c0 = arith.constant 0 : index
    %c0_1 = arith.constant 0 : index
    %3 = vector.load %arg6[%c0, %c0_1] : memref<32x32xf32, #tpu.memory_space<vmem>>, vector<32x32xf32>
    %c0_2 = arith.constant 0 : index
    %c0_3 = arith.constant 0 : index
    %4 = vector.load %arg3[%c0_2, %c0_3] : memref<32x144xbf16, #tpu.memory_space<vmem>>, vector<32x144xbf16>
    %c0_4 = arith.constant 0 : index
    %c0_5 = arith.constant 0 : index
    %5 = vector.load %arg4[%c0_4, %c0_5] : memref<144x32xbf16, #tpu.memory_space<vmem>>, vector<144x32xbf16>
    %cst = arith.constant dense<0.000000e+00> : vector<32x32xf32>
    %6 = tpu.matmul %4, %5, %cst {dimension_numbers = #tpu.dot_dimension_numbers<[1], [0], [0], [1], [0, 0, 1, 1], [], []>} : vector<32x144xbf16>, vector<144x32xbf16>, vector<32x32xf32> -> vector<32x32xf32>
    %7 = arith.addf %3, %6 : vector<32x32xf32>
    %c0_6 = arith.constant 0 : index
    %c0_7 = arith.constant 0 : index
    %8 = vector.load %arg6[%c0_6, %c0_7] : memref<32x32xf32, #tpu.memory_space<vmem>>, vector<32x32xf32>
    tpu.vector_store %arg6[%c0_6, %c0_7], %7 {strides = array<i32>} : memref<32x32xf32, #tpu.memory_space<vmem>>, vector<32x32xf32>,
    %c0_i32_8 = arith.constant 0 : i32
    %9 = arith.cmpi eq, %arg2, %c0_i32_8 : i32
    %10 = arith.extui %9 : i1 to i32
    %c0_i32_9 = arith.constant 0 : i32
    %11 = arith.cmpi ne, %10, %c0_i32_9 : i32
    scf.if %11 {
      %c0_10 = arith.constant 0 : index
      %c0_11 = arith.constant 0 : index
      %12 = vector.load %arg6[%c0_10, %c0_11] : memref<32x32xf32, #tpu.memory_space<vmem>>, vector<32x32xf32>
      %c0_12 = arith.constant 0 : index
      %c0_13 = arith.constant 0 : index
      %13 = vector.load %arg5[%c0_12, %c0_13] : memref<32x32xf32, #tpu.memory_space<vmem>>, vector<32x32xf32>
      tpu.vector_store %arg5[%c0_12, %c0_13], %12 {strides = array<i32>} : memref<32x32xf32, #tpu.memory_space<vmem>>, vector<32x32xf32>,
    } else {
    }
    return
  }
  func.func @transform_0(%arg0: i32, %arg1: i32, %arg2: i32) -> (i32, i32) {
    %c0_i32 = arith.constant 0 : i32
    return %arg0, %arg2 : i32, i32
  }
  func.func @transform_1(%arg0: i32, %arg1: i32, %arg2: i32) -> (i32, i32) {
    %c0_i32 = arith.constant 0 : i32
    return %arg2, %arg1 : i32, i32
  }
  func.func @transform_2(%arg0: i32, %arg1: i32, %arg2: i32) -> (i32, i32) {
    %c0_i32 = arith.constant 0 : i32
    return %arg0, %arg1 : i32, i32
  }
}

module attributes {stable_mosaic.version = 11 : i64} {
  func.func @_bn_stats_kernel(%arg0: i32, %arg1: memref<32x32xf32, #tpu.memory_space<vmem>>, %arg2: memref<2x32xf32, #tpu.memory_space<vmem>>) attributes {dimension_semantics = [#tpu.dimension_semantics<arbitrary>], iteration_bounds = array<i64: 1>, scalar_prefetch = 0 : i64, scratch_operands = 0 : i64, tpu.core_type = #tpu.core_type<tc>, window_params = [{transform_indices = @transform_0, window_bounds = array<i64: 32, 32>}, {pipeline_mode = #tpu.pipeline_mode<synchronous>, transform_indices = @transform_1, window_bounds = array<i64: 2, 32>}]} {
    %c0_i32 = arith.constant 0 : i32
    %0 = arith.cmpi eq, %arg0, %c0_i32 : i32
    %1 = arith.extui %0 : i1 to i32
    %c0_i32_0 = arith.constant 0 : i32
    %2 = arith.cmpi ne, %1, %c0_i32_0 : i32
    scf.if %2 {
      %cst_10 = arith.constant 0.000000e+00 : f32
      %15 = vector.broadcast %cst_10 : f32 to vector<2x32xf32>
      %c0_11 = arith.constant 0 : index
      %c0_12 = arith.constant 0 : index
      %16 = vector.load %arg2[%c0_11, %c0_12] : memref<2x32xf32, #tpu.memory_space<vmem>>, vector<2x32xf32>
      tpu.vector_store %arg2[%c0_11, %c0_12], %15 {strides = array<i32>} : memref<2x32xf32, #tpu.memory_space<vmem>>, vector<2x32xf32>,
    } else {
    }
    %c0 = arith.constant 0 : index
    %c0_1 = arith.constant 0 : index
    %3 = vector.load %arg1[%c0, %c0_1] : memref<32x32xf32, #tpu.memory_space<vmem>>, vector<32x32xf32>
    %c0_2 = arith.constant 0 : index
    %c0_3 = arith.constant 0 : index
    %4 = vector.load %arg2[%c0_2, %c0_3] : memref<2x32xf32, #tpu.memory_space<vmem>>, vector<1x32xf32>
    %cst = arith.constant dense<0.000000e+00> : vector<32xf32>
    %5 = vector.multi_reduction <add>, %3, %cst [0] : vector<32x32xf32> to vector<32xf32>
    %6 = vector.shape_cast %5 : vector<32xf32> to vector<1x32xf32>
    %7 = arith.addf %4, %6 : vector<1x32xf32>
    %c0_4 = arith.constant 0 : index
    %c0_5 = arith.constant 0 : index
    %8 = vector.load %arg2[%c0_4, %c0_5] : memref<2x32xf32, #tpu.memory_space<vmem>>, vector<1x32xf32>
    tpu.vector_store %arg2[%c0_4, %c0_5], %7 {strides = array<i32>} : memref<2x32xf32, #tpu.memory_space<vmem>>, vector<1x32xf32>,
    %c1 = arith.constant 1 : index
    %c0_6 = arith.constant 0 : index
    %9 = vector.load %arg2[%c1, %c0_6] : memref<2x32xf32, #tpu.memory_space<vmem>>, vector<1x32xf32>
    %10 = arith.mulf %3, %3 : vector<32x32xf32>
    %cst_7 = arith.constant dense<0.000000e+00> : vector<32xf32>
    %11 = vector.multi_reduction <add>, %10, %cst_7 [0] : vector<32x32xf32> to vector<32xf32>
    %12 = vector.shape_cast %11 : vector<32xf32> to vector<1x32xf32>
    %13 = arith.addf %9, %12 : vector<1x32xf32>
    %c1_8 = arith.constant 1 : index
    %c0_9 = arith.constant 0 : index
    %14 = vector.load %arg2[%c1_8, %c0_9] : memref<2x32xf32, #tpu.memory_space<vmem>>, vector<1x32xf32>
    tpu.vector_store %arg2[%c1_8, %c0_9], %13 {strides = array<i32>} : memref<2x32xf32, #tpu.memory_space<vmem>>, vector<1x32xf32>,
    return
  }
  func.func @transform_0(%arg0: i32) -> (i32, i32) {
    %c0_i32 = arith.constant 0 : i32
    %c0_i32_0 = arith.constant 0 : i32
    return %arg0, %c0_i32 : i32, i32
  }
  func.func @transform_1(%arg0: i32) -> (i32, i32) {
    %c0_i32 = arith.constant 0 : i32
    %c0_i32_0 = arith.constant 0 : i32
    %c0_i32_1 = arith.constant 0 : i32
    return %c0_i32, %c0_i32_0 : i32, i32
  }
}

module attributes {stable_mosaic.version = 11 : i64} {
  func.func @_affine_act_kernel(%arg0: i32, %arg1: memref<32x32xf32, #tpu.memory_space<vmem>>, %arg2: memref<1x32xf32, #tpu.memory_space<vmem>>, %arg3: memref<1x32xf32, #tpu.memory_space<vmem>>, %arg4: memref<32x32xf32, #tpu.memory_space<vmem>>) attributes {dimension_semantics = [#tpu.dimension_semantics<parallel>], iteration_bounds = array<i64: 1>, scalar_prefetch = 0 : i64, scratch_operands = 0 : i64, tpu.core_type = #tpu.core_type<tc>, window_params = [{transform_indices = @transform_0, window_bounds = array<i64: 32, 32>}, {pipeline_mode = #tpu.pipeline_mode<synchronous>, transform_indices = @transform_1, window_bounds = array<i64: 1, 32>}, {pipeline_mode = #tpu.pipeline_mode<synchronous>, transform_indices = @transform_2, window_bounds = array<i64: 1, 32>}, {transform_indices = @transform_3, window_bounds = array<i64: 32, 32>}]} {
    %c0 = arith.constant 0 : index
    %c0_0 = arith.constant 0 : index
    %0 = vector.load %arg1[%c0, %c0_0] : memref<32x32xf32, #tpu.memory_space<vmem>>, vector<32x32xf32>
    %c0_1 = arith.constant 0 : index
    %c0_2 = arith.constant 0 : index
    %1 = vector.load %arg2[%c0_1, %c0_2] : memref<1x32xf32, #tpu.memory_space<vmem>>, vector<1x32xf32>
    %2 = vector.broadcast %1 : vector<1x32xf32> to vector<32x32xf32>
    %3 = arith.mulf %0, %2 : vector<32x32xf32>
    %c0_3 = arith.constant 0 : index
    %c0_4 = arith.constant 0 : index
    %4 = vector.load %arg3[%c0_3, %c0_4] : memref<1x32xf32, #tpu.memory_space<vmem>>, vector<1x32xf32>
    %5 = vector.broadcast %4 : vector<1x32xf32> to vector<32x32xf32>
    %6 = arith.addf %3, %5 : vector<32x32xf32>
    %cst = arith.constant 0.000000e+00 : f32
    %7 = vector.broadcast %cst : f32 to vector<32x32xf32>
    %8 = arith.maximumf %6, %7 : vector<32x32xf32>
    %c0_5 = arith.constant 0 : index
    %c0_6 = arith.constant 0 : index
    %9 = vector.load %arg4[%c0_5, %c0_6] : memref<32x32xf32, #tpu.memory_space<vmem>>, vector<32x32xf32>
    tpu.vector_store %arg4[%c0_5, %c0_6], %8 {strides = array<i32>} : memref<32x32xf32, #tpu.memory_space<vmem>>, vector<32x32xf32>,
    return
  }
  func.func @transform_0(%arg0: i32) -> (i32, i32) {
    %c0_i32 = arith.constant 0 : i32
    %c0_i32_0 = arith.constant 0 : i32
    return %arg0, %c0_i32 : i32, i32
  }
  func.func @transform_1(%arg0: i32) -> (i32, i32) {
    %c0_i32 = arith.constant 0 : i32
    %c0_i32_0 = arith.constant 0 : i32
    %c0_i32_1 = arith.constant 0 : i32
    return %c0_i32, %c0_i32_0 : i32, i32
  }
  func.func @transform_2(%arg0: i32) -> (i32, i32) {
    %c0_i32 = arith.constant 0 : i32
    %c0_i32_0 = arith.constant 0 : i32
    %c0_i32_1 = arith.constant 0 : i32
    return %c0_i32, %c0_i32_0 : i32, i32
  }
  func.func @transform_3(%arg0: i32) -> (i32, i32) {
    %c0_i32 = arith.constant 0 : i32
    %c0_i32_0 = arith.constant 0 : i32
    return %arg0, %c0_i32 : i32, i32
  }
}

</mosaic_0001>

<bundles_post_ra>
// kernel: ftgan_encoder_forward.10
= control target key start
LH: loop header
LB: loop body
LE: loop exit
PB: predicated region body
PF: predicated region fallthrough
CT: control target
= control target key end

     0   :  { %vm12_vm0 = vcmask 58368   ;;  %vm79_vm1 = vcmask 64512   ;;  %v421_v0 = vmov 0.0   ;;  %vm214_vm2 = vcmask 57344   ;;  %s1301_s0 = inlined_call_operand.vmem [shape: f32[512,8], index: 0, kind: input, shape index: {}]   ;;  %s1302_s1 = inlined_call_operand.vmem [shape: f32[2,8], index: 1, kind: output, shape index: {}]  }
   0x1   :  { %13 = vst.msk [vmem:[%s1302_s1] sm:$0x3] %vm12_vm0, %v421_v0  ;;  %v438_v1 = vld [vmem:[%s1301_s0] sm:$0xff]  ;;  %v443_v2 = vld [vmem:[%s1301_s0 + $0x8] sm:$0xff]  ;;  %v448_v3 = vld [vmem:[%s1301_s0 + $0x10] sm:$0xff] }
   0x2   :  { %v80_v4 = vsel %vm79_vm1, %v438_v1, 0.0  ;;  %v81_v5 = vsel %vm79_vm1, %v443_v2, 0.0  ;;  %v83_v6 = vsel %vm79_vm1, %v448_v3, 0.0  ;;  %v459_v7 = vld [vmem:[%s1301_s0 + $0x18] sm:$0xff]  ;;  %v466_v10 = vld [vmem:[%s1301_s0 + $0x20] sm:$0xff]  ;;  %v473_v13 = vld [vmem:[%s1301_s0 + $0x28] sm:$0xff] }
   0x3   :  { %v82_v8 = vadd.f32 %v81_v5, %v80_v4  ;;  %v85_v9 = vsel %vm79_vm1, %v459_v7, 0.0  ;;  %v87_v12 = vsel %vm79_vm1, %v466_v10, 0.0  ;;  %v89_v15 = vsel %vm79_vm1, %v473_v13, 0.0  ;;  %v480_v16 = vld [vmem:[%s1301_s0 + $0x30] sm:$0xff]  ;;  %v485_v18 = vld [vmem:[%s1301_s0 + $0x38] sm:$0xff]  ;;  %v490_v19 = vld [vmem:[%s1301_s0 + $0x40] sm:$0xff] }
   0x4   :  { %v91_v20 = vsel %vm79_vm1, %v480_v16, 0.0  ;;  %v497_v21 = vld [vmem:[%s1301_s0 + $0x48] sm:$0xff]  ;;  %v502_v22 = vld [vmem:[%s1301_s0 + $0x50] sm:$0xff]  ;;  %v507_v23 = vld [vmem:[%s1301_s0 + $0x58] sm:$0xff]  ;;  %v93_v25 = vsel %vm79_vm1, %v485_v18, 0.0  ;;  %v95_v26 = vsel %vm79_vm1, %v490_v19, 0.0 }
   0x5   :  { %v84_v11 = vadd.f32 %v83_v6, %v82_v8  ;;  %v516_v27 = vld [vmem:[%s1301_s0 + $0x108] sm:$0xff]  ;;  %v521_v28 = vld [vmem:[%s1301_s0 + $0x110] sm:$0xff]  ;;  %v526_v29 = vld [vmem:[%s1301_s0 + $0x118] sm:$0xff]  ;;  %v97_v30 = vsel %vm79_vm1, %v497_v21, 0.0  ;;  %v99_v31 = vsel %vm79_vm1, %v502_v22, 0.0  ;;  %v534_v32 = vsel %vm79_vm1, %v507_v23, 0.0 }
   0x6   :  { %v539_v33 = vld [vmem:[%s1301_s0 + $0x120] sm:$0xff]  ;;  %v544_v34 = vld [vmem:[%s1301_s0 + $0x128] sm:$0xff]  ;;  %v549_v35 = vld [vmem:[%s1301_s0 + $0x130] sm:$0xff]  ;;  %v553_v37 = vsel %vm79_vm1, %v516_v27, 0.0  ;;  %v557_v38 = vsel %vm79_vm1, %v521_v28, 0.0  ;;  %v561_v39 = vsel %vm79_vm1, %v526_v29, 0.0 }
   0x7   :  { %v86_v14 = vadd.f32 %v85_v9, %v84_v11  ;;  %1321 = vst [vmem:[#allocation2_spill] sm:$0xff] %v553_v37  ;;  %1322 = vst [vmem:[#allocation3_spill] sm:$0xff] %v557_v38  ;;  %v566_v40 = vld [vmem:[%s1301_s0 + $0x138] sm:$0xff]  ;;  %v571_v41 = vld [vmem:[%s1301_s0 + $0x140] sm:$0xff]  ;;  %v580_v43 = vsel %vm79_vm1, %v539_v33, 0.0  ;;  %v584_v44 = vsel %vm79_vm1, %v544_v34, 0.0 }
   0x8   :  { %1323 = vst [vmem:[#allocation4_spill] sm:$0xff] %v561_v39  ;;  %v576_v42 = vld [vmem:[%s1301_s0 + $0x148] sm:$0xff]  ;;  %1324 = vst [vmem:[#allocation5_spill] sm:$0xff] %v580_v43  ;;  %v588_v45 = vsel %vm79_vm1, %v549_v35, 0.0  ;;  %v593_v46 = vld [vmem:[%s1301_s0 + $0x150] sm:$0xff]  ;;  %v607_v50 = vsel %vm79_vm1, %v566_v40, 0.0 }
   0x9   :  { %v88_v17 = vadd.f32 %v87_v12, %v86_v14  ;;  %1325 = vst [vmem:[#allocation6_spill] sm:$0xff] %v584_v44  ;;  %1326 = vst [vmem:[#allocation7_spill] sm:$0xff] %v588_v45  ;;  %v598_v47 = vld [vmem:[%s1301_s0 + $0x158] sm:$0xff]  ;;  %v603_v48 = vld [vmem:[%s1301_s0 + $0x160] sm:$0xff]  ;;  %v611_v51 = vsel %vm79_vm1, %v571_v41, 0.0  ;;  %v615_v52 = vsel %vm79_vm1, %v576_v42, 0.0  ;;  %v219_v45 = vmul.f32 %v448_v3, %v448_v3 }
   0xa   :  { %1327 = vst [vmem:[#allocation8_spill] sm:$0xff] %v607_v50  ;;  %1328 = vst [vmem:[#allocation9_spill] sm:$0xff] %v611_v51  ;;  %v620_v53 = vld [vmem:[%s1301_s0 + $0x168] sm:$0xff]  ;;  %v625_v54 = vld [vmem:[%s1301_s0 + $0x170] sm:$0xff]  ;;  %v634_v56 = vsel %vm79_vm1, %v593_v46, 0.0  ;;  %v638_v57 = vsel %vm79_vm1, %v598_v47, 0.0 }
   0xb   :  { %v90_v24 = vadd.f32 %v89_v15, %v88_v17  ;;  %1329 = vst [vmem:[#allocation10_spill] sm:$0xff] %v615_v52  ;;  %v630_v55 = vld [vmem:[%s1301_s0 + $0x178] sm:$0xff]  ;;  %1330 = vst [vmem:[#allocation11_spill] sm:$0xff] %v634_v56  ;;  %v642_v58 = vsel %vm79_vm1, %v603_v48, 0.0  ;;  %v647_v59 = vld [vmem:[%s1301_s0 + $0x180] sm:$0xff]  ;;  %v661_v63 = vsel %vm79_vm1, %v620_v53, 0.0 }
   0xc   :  { %1331 = vst [vmem:[#allocation12_spill] sm:$0xff] %v638_v57  ;;  %1332 = vst [vmem:[#allocation13_spill] sm:$0xff] %v642_v58  ;;  %v652_v60 = vld [vmem:[%s1301_s0 + $0x188] sm:$0xff]  ;;  %v657_v61 = vld [vmem:[%s1301_s0 + $0x190] sm:$0xff]  ;;  %v665_v0 = vsel %vm79_vm1, %v625_v54, 0.0  ;;  %v669_v4 = vsel %vm79_vm1, %v630_v55, 0.0 }
   0xd   :  { %v92_v36 = vadd.f32 %v91_v20, %v90_v24  ;;  %1333 = vst [vmem:[#allocation14_spill] sm:$0xff] %v661_v63  ;;  %1334 = vst [vmem:[#allocation15_spill] sm:$0xff] %v665_v0  ;;  %v674_v5 = vld [vmem:[%s1301_s0 + $0x198] sm:$0xff]  ;;  %v679_v6 = vld [vmem:[%s1301_s0 + $0x1a0] sm:$0xff]  ;;  %v688_v9 = vsel %vm79_vm1, %v647_v59, 0.0  ;;  %v692_v11 = vsel %vm79_vm1, %v652_v60, 0.0 }
   0xe   :  { %1335 = vst [vmem:[#allocation16_spill] sm:$0xff] %v669_v4  ;;  %v684_v8 = vld [vmem:[%s1301_s0 + $0x1a8] sm:$0xff]  ;;  %1336 = vst [vmem:[#allocation17_spill] sm:$0xff] %v688_v9  ;;  %v696_v12 = vsel %vm79_vm1, %v657_v61, 0.0  ;;  %v701_v14 = vld [vmem:[%s1301_s0 + $0x60] sm:$0xff] }
   0xf   :  { %v94_v49 = vadd.f32 %v93_v25, %v92_v36  ;;  %1337 = vst [vmem:[#allocation18_spill] sm:$0xff] %v692_v11  ;;  %1338 = vst [vmem:[#allocation19_spill] sm:$0xff] %v696_v12  ;;  %v706_v15 = vld [vmem:[%s1301_s0 + $0x1b0] sm:$0xff]  ;;  %v711_v17 = vld [vmem:[%s1301_s0 + $0x1b8] sm:$0xff]  ;;  %v720_v25 = vsel %vm79_vm1, %v674_v5, 0.0  ;;  %v728_v36 = vsel %vm79_vm1, %v684_v8, 0.0 }
  0x10   :  { %v716_v20 = vld [vmem:[%s1301_s0 + $0x1c0] sm:$0xff]  ;;  %1339 = vst [vmem:[#allocation20_spill] sm:$0xff] %v720_v25  ;;  %1341 = vst [vmem:[#allocation22_spill] sm:$0xff] %v728_v36  ;;  %v751_v36 = vsel %vm79_vm1, %v711_v17, 0.0  ;;  %v765_v11 = vld [vmem:[%s1301_s0 + $0x1e8] sm:$0xff] }
  0x11   :  { %v96_v62 = vadd.f32 %v95_v26, %v94_v49  ;;  %v724_v26 = vsel %vm79_vm1, %v679_v6, 0.0  ;;  %v733_v49 = vld [vmem:[%s1301_s0 + $0x1c8] sm:$0xff]  ;;  %1343 = vst [vmem:[#allocation24_spill] sm:$0xff] %v751_v36  ;;  %v755_v25 = vsel %vm79_vm1, %v716_v20, 0.0  ;;  %v760_v12 = vld [vmem:[%s1301_s0 + $0x1e0] sm:$0xff]  ;;  %v787_v0 = vld [vmem:[%s1301_s0 + $0x1f8] sm:$0xff] }
  0x12   :  { %1340 = vst [vmem:[#allocation21_spill] sm:$0xff] %v724_v26  ;;  %v747_v26 = vsel %vm79_vm1, %v706_v15, 0.0  ;;  %1344 = vst [vmem:[#allocation25_spill] sm:$0xff] %v755_v25  ;;  %v774_v9 = vsel %vm79_vm1, %v733_v49, 0.0  ;;  %v809_v58 = vsel %vm79_vm1, %v787_v0, 0.0  ;;  %v841_v56 = vld [vmem:[%s1301_s0 + $0x98] sm:$0xff] }
  0x13   :  { %v98_v24 = vadd.f32 %v97_v30, %v96_v62  ;;  %v738_v30 = vld [vmem:[%s1301_s0 + $0x1d0] sm:$0xff]  ;;  %v743_v62 = vld [vmem:[%s1301_s0 + $0x1d8] sm:$0xff]  ;;  %1342 = vst [vmem:[#allocation23_spill] sm:$0xff] %v747_v26  ;;  %1346 = vst [vmem:[#allocation27_spill] sm:$0xff] %v774_v9  ;;  %v797_v9 = vsel %vm79_vm1, %v765_v11, 0.0  ;;  %v117_v3 = vsel %vm79_vm1, %v841_v56, 0.0 }
  0x14   :  { %v770_v26 = vld [vmem:[%s1301_s0 + $0x1f0] sm:$0xff]  ;;  %v778_v25 = vsel %vm79_vm1, %v738_v30, 0.0  ;;  %v782_v4 = vsel %vm79_vm1, %v743_v62, 0.0  ;;  %1349 = vst [vmem:[#allocation30_spill] sm:$0xff] %v787_v0  ;;  %1351 = vst [vmem:[#allocation32_spill] sm:$0xff] %v797_v9  ;;  %v846_v52 = vld [vmem:[%s1301_s0 + $0xa0] sm:$0xff] }
  0x15   :  { %1345 = vst [vmem:[#allocation26_spill] sm:$0xff] %v770_v26  ;;  %v100_v36 = vadd.f32 %v99_v31, %v98_v24  ;;  %1347 = vst [vmem:[#allocation28_spill] sm:$0xff] %v778_v25  ;;  %v103_v31 = vsel %vm79_vm1, %v701_v14, 0.0  ;;  %v793_v24 = vsel %vm79_vm1, %v760_v12, 0.0  ;;  %v801_v25 = vsel %vm79_vm1, %v770_v26, 0.0  ;;  %v28_v9 = vld [vmem:[%s1301_s0 + $0x70] sm:$0xff] }
  0x16   :  { %1348 = vst [vmem:[#allocation29_spill] sm:$0xff] %v782_v4  ;;  %1350 = vst [vmem:[#allocation31_spill] sm:$0xff] %v793_v24  ;;  %v27_v4 = vld [vmem:[%s1301_s0 + $0x68] sm:$0xff]  ;;  %v862_v43 = vld [vmem:[%s1301_s0 + $0xb0] sm:$0xff] }
  0x17   :  { %1352 = vst [vmem:[#allocation33_spill] sm:$0xff] %v801_v25  ;;  %v102_v63 = vadd.f32 %v534_v32, %v100_v36  ;;  %1353 = vst [vmem:[#allocation34_spill] sm:$0xff] %v809_v58  ;;  %v105_v24 = vsel %vm79_vm1, %v27_v4, 0.0  ;;  %v818_v25 = vld [vmem:[%s1301_s0 + $0x78] sm:$0xff]  ;;  %v823_v32 = vld [vmem:[%s1301_s0 + $0x80] sm:$0xff]  ;;  %v107_v58 = vsel %vm79_vm1, %v28_v9, 0.0 }
  0x18   :  { %1354 = vst [vmem:[#allocation35_spill] sm:$0xff] %v818_v25  ;;  %1355 = vst [vmem:[#allocation36_spill] sm:$0xff] %v823_v32  ;;  %v828_v36 = vld [vmem:[%s1301_s0 + $0x88] sm:$0xff]  ;;  %v109_v50 = vsel %vm79_vm1, %v818_v25, 0.0  ;;  %v875_v39 = vld [vmem:[%s1301_s0 + $0xb8] sm:$0xff] }
  0x19   :  { %v104_v57 = vadd.f32 %v103_v31, %v102_v63  ;;  %1356 = vst [vmem:[#allocation37_spill] sm:$0xff] %v828_v36  ;;  %v217_v63 = vmul.f32 %v438_v1, %v438_v1  ;;  %v836_v31 = vld [vmem:[%s1301_s0 + $0x90] sm:$0xff]  ;;  %1358 = vst [vmem:[#allocation39_spill] sm:$0xff] %v841_v56  ;;  %v218_v1 = vmul.f32 %v443_v2, %v443_v2  ;;  %v857_v44 = vld [vmem:[%s1301_s0 + $0xa8] sm:$0xff] }
  0x1a   :  { %1357 = vst [vmem:[#allocation38_spill] sm:$0xff] %v836_v31  ;;  %1359 = vst [vmem:[#allocation40_spill] sm:$0xff] %v846_v52  ;;  %v115_v2 = vsel %vm79_vm1, %v836_v31, 0.0  ;;  %v880_v38 = vld [vmem:[%s1301_s0 + $0xc0] sm:$0xff]  ;;  %v885_v37 = vld [vmem:[%s1301_s0 + $0xc8] sm:$0xff]  ;;  %v119_v31 = vsel %vm79_vm1, %v846_v52, 0.0 }
  0x1b   :  { %v106_v51 = vadd.f32 %v105_v24, %v104_v57  ;;  %1360 = vst [vmem:[#allocation41_spill] sm:$0xff] %v857_v44  ;;  %1361 = vst [vmem:[#allocation42_spill] sm:$0xff] %v862_v43  ;;  %v111_v57 = vsel %vm79_vm1, %v823_v32, 0.0  ;;  %v113_v24 = vsel %vm79_vm1, %v828_v36, 0.0  ;;  %v121_v56 = vsel %vm79_vm1, %v857_v44, 0.0  ;;  %v896_v25 = vld [vmem:[%s1301_s0 + $0xd0] sm:$0xff] }
  0x1c   :  { %1362 = vst [vmem:[#allocation43_spill] sm:$0xff] %v875_v39  ;;  %1363 = vst [vmem:[#allocation44_spill] sm:$0xff] %v880_v38  ;;  %v220_v32 = vmul.f32 %v459_v7, %v459_v7  ;;  %v901_v0 = vld [vmem:[%s1301_s0 + $0xd8] sm:$0xff]  ;;  %v913_v7 = vsel %vm79_vm1, %v880_v38, 0.0  ;;  %v917_v44 = vsel %vm79_vm1, %v885_v37, 0.0  ;;  %v922_v52 = vld [vmem:[%s1301_s0 + $0xe0] sm:$0xff] }
  0x1d   :  { %1364 = vst [vmem:[#allocation45_spill] sm:$0xff] %v885_v37  ;;  %v108_v36 = vadd.f32 %v107_v58, %v106_v51  ;;  %1365 = vst [vmem:[#allocation46_spill] sm:$0xff] %v896_v25  ;;  %v905_v51 = vsel %vm79_vm1, %v862_v43, 0.0  ;;  %v909_v58 = vsel %vm79_vm1, %v875_v39, 0.0  ;;  %v927_v43 = vld [vmem:[%s1301_s0 + $0xe8] sm:$0xff]  ;;  %v932_v39 = vld [vmem:[%s1301_s0 + $0xf0] sm:$0xff] }
  0x1e   :  { %1366 = vst [vmem:[#allocation47_spill] sm:$0xff] %v901_v0  ;;  %1367 = vst [vmem:[#allocation48_spill] sm:$0xff] %v909_v58  ;;  %v936_v37 = vsel %vm79_vm1, %v896_v25, 0.0  ;;  %v946_v58 = vsel %vm79_vm1, %v922_v52, 0.0  ;;  %v950_v26 = vsel %vm79_vm1, %v927_v43, 0.0  ;;  %v223_v25 = vmul.f32 %v480_v16, %v480_v16 }
  0x1f   :  { %1368 = vst [vmem:[#allocation49_spill] sm:$0xff] %v913_v7  ;;  %1369 = vst [vmem:[#allocation50_spill] sm:$0xff] %v917_v44  ;;  %v110_v38 = vadd.f32 %v109_v50, %v108_v36  ;;  %v940_v44 = vsel %vm79_vm1, %v901_v0, 0.0  ;;  %v221_v7 = vmul.f32 %v466_v10, %v466_v10  ;;  %v954_v50 = vsel %vm79_vm1, %v932_v39, 0.0 }
  0x20   :  { %1370 = vst [vmem:[#allocation51_spill] sm:$0xff] %v922_v52  ;;  %1371 = vst [vmem:[#allocation52_spill] sm:$0xff] %v927_v43  ;;  %v222_v36 = vmul.f32 %v473_v13, %v473_v13  ;;  %v224_v10 = vmul.f32 %v485_v18, %v485_v18  ;;  %v225_v52 = vmul.f32 %v490_v19, %v490_v19 }
  0x21   :  { %1372 = vst [vmem:[#allocation53_spill] sm:$0xff] %v932_v39  ;;  %1373 = vst [vmem:[#allocation54_spill] sm:$0xff] %v954_v50  ;;  %v112_v0 = vadd.f32 %v111_v57, %v110_v38  ;;  %v226_v43 = vmul.f32 %v497_v21, %v497_v21  ;;  %v227_v39 = vmul.f32 %v502_v22, %v502_v22 }
  0x22   :  { %v228_v50 = vmul.f32 %v507_v23, %v507_v23  ;;  %v229_v13 = vmul.f32 %v701_v14, %v701_v14  ;;  %v972_v16 = vmul.f32 %v27_v4, %v27_v4  ;;  %v974_v57 = vmul.f32 %v28_v9, %v28_v9 }
  0x23   :  { %v114_v38 = vadd.f32 %v113_v24, %v112_v0  ;;  %v250_v18 = vmul.f32 %v516_v27, %v516_v27  ;;  %v251_v19 = vmul.f32 %v521_v28, %v521_v28  ;;  %v252_v21 = vmul.f32 %v526_v29, %v526_v29 }
  0x24   :  { %v253_v22 = vmul.f32 %v539_v33, %v539_v33  ;;  %v254_v23 = vmul.f32 %v544_v34, %v544_v34  ;;  %v255_v4 = vmul.f32 %v549_v35, %v549_v35  ;;  %v256_v9 = vmul.f32 %v566_v40, %v566_v40 }
  0x25   :  { %v116_v0 = vadd.f32 %v115_v2, %v114_v38  ;;  %v257_v27 = vmul.f32 %v571_v41, %v571_v41  ;;  %v258_v28 = vmul.f32 %v576_v42, %v576_v42  ;;  %v259_v29 = vmul.f32 %v593_v46, %v593_v46  ;;  %v1374_v38 = vld [vmem:[#allocation26_spill] sm:$0xff] }
  0x26   :  { %v260_v33 = vmul.f32 %v598_v47, %v598_v47  ;;  %v281_v34 = vsel %vm79_vm1, %v217_v63, 0.0  ;;  %v261_v35 = vmul.f32 %v603_v48, %v603_v48  ;;  %v282_v40 = vsel %vm79_vm1, %v218_v1, 0.0 }
  0x27   :  { %v118_v14 = vadd.f32 %v117_v3, %v116_v0  ;;  %v284_v24 = vsel %vm79_vm1, %v219_v45, 0.0  ;;  %v262_v41 = vmul.f32 %v620_v53, %v620_v53  ;;  %v263_v42 = vmul.f32 %v625_v54, %v625_v54 }
  0x28   :  { %v264_v46 = vmul.f32 %v630_v55, %v630_v55  ;;  %v283_v47 = vadd.f32 %v282_v40, %v281_v34  ;;  %v265_v63 = vmul.f32 %v647_v59, %v647_v59  ;;  %v266_v48 = vmul.f32 %v652_v60, %v652_v60  ;;  %v1375_v34 = vld [vmem:[#allocation48_spill] sm:$0xff] }
  0x29   :  { %v120_v2 = vadd.f32 %v119_v31, %v118_v14  ;;  %v286_v1 = vsel %vm79_vm1, %v220_v32, 0.0  ;;  %v267_v45 = vmul.f32 %v657_v61, %v657_v61  ;;  %v268_v53 = vmul.f32 %v674_v5, %v674_v5  ;;  %v1376_v14 = vld [vmem:[#allocation30_spill] sm:$0xff] }
  0x2a   :  { %v269_v54 = vmul.f32 %v679_v6, %v679_v6  ;;  %v285_v55 = vadd.f32 %v284_v24, %v283_v47  ;;  %v270_v31 = vmul.f32 %v684_v8, %v684_v8  ;;  %v271_v59 = vmul.f32 %v706_v15, %v706_v15  ;;  %v1377_v47 = vld [vmem:[#allocation49_spill] sm:$0xff] }
  0x2b   :  { %v122_v3 = vadd.f32 %v121_v56, %v120_v2  ;;  %v288_v60 = vsel %vm79_vm1, %v221_v7, 0.0  ;;  %v272_v32 = vmul.f32 %v711_v17, %v711_v17  ;;  %v273_v61 = vmul.f32 %v716_v20, %v716_v20 }
  0x2c   :  { %v274_v5 = vmul.f32 %v733_v49, %v733_v49  ;;  %v287_v6 = vadd.f32 %v286_v1, %v285_v55  ;;  %v275_v8 = vmul.f32 %v738_v30, %v738_v30  ;;  %v276_v15 = vmul.f32 %v743_v62, %v743_v62 }
  0x2d   :  { %v124_v56 = vadd.f32 %v905_v51, %v122_v3  ;;  %v290_v7 = vsel %vm79_vm1, %v222_v36, 0.0  ;;  %v277_v17 = vmul.f32 %v760_v12, %v760_v12  ;;  %v278_v20 = vmul.f32 %v765_v11, %v765_v11 }
  0x2e   :  { %v279_v49 = vmul.f32 %v1374_v38, %v1374_v38  ;;  %v289_v0 = vadd.f32 %v288_v60, %v287_v6  ;;  %v280_v30 = vmul.f32 %v1376_v14, %v1376_v14  ;;  %v292_v40 = vsel %vm79_vm1, %v223_v25, 0.0  ;;  %v1380_v14 = vld [vmem:[#allocation35_spill] sm:$0xff] }
  0x2f   :  { %v126_v51 = vadd.f32 %v1375_v34, %v124_v56  ;;  %v294_v62 = vsel %vm79_vm1, %v224_v10, 0.0  ;;  %v296_v24 = vsel %vm79_vm1, %v225_v52, 0.0  ;;  %v298_v12 = vsel %vm79_vm1, %v226_v43, 0.0  ;;  %v1162_v34 = vld [vmem:[%s1301_s0 + $0x100] sm:$0xff] }
  0x30   :  { %v291_v36 = vadd.f32 %v290_v7, %v289_v0  ;;  %v300_v11 = vsel %vm79_vm1, %v227_v39, 0.0  ;;  %v302_v1 = vsel %vm79_vm1, %v228_v50, 0.0  ;;  %v304_v55 = vsel %vm79_vm1, %v229_v13, 0.0  ;;  %v1378_v39 = vld [vmem:[#allocation50_spill] sm:$0xff] }
  0x31   :  { %v128_v2 = vadd.f32 %v1377_v47, %v126_v51  ;;  %v1055_v3 = vsel %vm79_vm1, %v250_v18, 0.0  ;;  %v1058_v25 = vsel %vm79_vm1, %v251_v19, 0.0  ;;  %v1061_v10 = vsel %vm79_vm1, %v252_v21, 0.0  ;;  %v1379_v51 = vld [vmem:[#allocation54_spill] sm:$0xff] }
  0x32   :  { %v293_v60 = vadd.f32 %v292_v40, %v291_v36  ;;  %v1064_v43 = vsel %vm79_vm1, %v253_v22, 0.0  ;;  %v1068_v6 = vsel %vm79_vm1, %v254_v23, 0.0  ;;  %v1071_v50 = vsel %vm79_vm1, %v255_v4, 0.0  ;;  %v1381_v36 = vld [vmem:[#allocation36_spill] sm:$0xff] }
  0x33   :  { %v130_v52 = vadd.f32 %v1378_v39, %v128_v2  ;;  %v1074_v13 = vsel %vm79_vm1, %v256_v9, 0.0  ;;  %v1077_v19 = vsel %vm79_vm1, %v257_v27, 0.0  ;;  %v1080_v21 = vsel %vm79_vm1, %v258_v28, 0.0  ;;  %v1382_v2 = vld [vmem:[#allocation37_spill] sm:$0xff] }
  0x34   :  { %v295_v18 = vadd.f32 %v294_v62, %v293_v60  ;;  %v1083_v22 = vsel %vm79_vm1, %v259_v29, 0.0  ;;  %v1087_v23 = vsel %vm79_vm1, %v260_v33, 0.0  ;;  %v1090_v4 = vsel %vm79_vm1, %v261_v35, 0.0 }
  0x35   :  { %v132_v56 = vadd.f32 %v936_v37, %v130_v52  ;;  %v1093_v9 = vsel %vm79_vm1, %v262_v41, 0.0  ;;  %v1096_v27 = vsel %vm79_vm1, %v263_v42, 0.0  ;;  %v1099_v28 = vsel %vm79_vm1, %v264_v46, 0.0 }
  0x36   :  { %v297_v7 = vadd.f32 %v296_v24, %v295_v18  ;;  %v1102_v29 = vsel %vm79_vm1, %v265_v63, 0.0  ;;  %v1106_v33 = vsel %vm79_vm1, %v266_v48, 0.0  ;;  %v1109_v35 = vsel %vm79_vm1, %v267_v45, 0.0  ;;  %v1384_v18 = vld [vmem:[#allocation38_spill] sm:$0xff] }
  0x37   :  { %v134_v37 = vadd.f32 %v940_v44, %v132_v56  ;;  %v1112_v41 = vsel %vm79_vm1, %v268_v53, 0.0  ;;  %v1115_v42 = vsel %vm79_vm1, %v269_v54, 0.0  ;;  %v1118_v46 = vsel %vm79_vm1, %v270_v31, 0.0 }
  0x38   :  { %v299_v38 = vadd.f32 %v298_v12, %v297_v7  ;;  %v1121_v63 = vsel %vm79_vm1, %v271_v59, 0.0  ;;  %v1125_v48 = vsel %vm79_vm1, %v272_v32, 0.0  ;;  %v1128_v45 = vsel %vm79_vm1, %v273_v61, 0.0 }
  0x39   :  { %v136_v44 = vadd.f32 %v946_v58, %v134_v37  ;;  %v1131_v53 = vsel %vm79_vm1, %v274_v5, 0.0  ;;  %v1134_v54 = vsel %vm79_vm1, %v275_v8, 0.0  ;;  %v1137_v31 = vsel %vm79_vm1, %v276_v15, 0.0  ;;  %v1145_v58 = vld [vmem:[%s1301_s0 + $0xf8] sm:$0xff]  ;;  %v1385_v37 = vld [vmem:[#allocation3_spill] sm:$0xff] }
  0x3a   :  { %v301_v0 = vadd.f32 %v300_v11, %v299_v38  ;;  %v1140_v59 = vsel %vm79_vm1, %v277_v17, 0.0  ;;  %v1149_v61 = vsel %vm79_vm1, %v278_v20, 0.0  ;;  %v1152_v5 = vsel %vm79_vm1, %v279_v49, 0.0 }
  0x3b   :  { %v138_v32 = vadd.f32 %v950_v26, %v136_v44  ;;  %v1155_v8 = vsel %vm79_vm1, %v280_v30, 0.0  ;;  %v141_v15 = vsel %vm79_vm1, %v1145_v58, 0.0  ;;  %v232_v20 = vmul.f32 %v1380_v14, %v1380_v14  ;;  %v1386_v44 = vld [vmem:[#allocation39_spill] sm:$0xff] }
  0x3c   :  { %v303_v17 = vadd.f32 %v302_v1, %v301_v0  ;;  %v306_v49 = vsel %vm79_vm1, %v972_v16, 0.0  ;;  %v143_v30 = vsel %vm79_vm1, %v1162_v34, 0.0  ;;  %v233_v24 = vmul.f32 %v1381_v36, %v1381_v36  ;;  %v1383_v16 = vld [vmem:[#allocation2_spill] sm:$0xff] }
  0x3d   :  { %v140_v26 = vadd.f32 %v1379_v51, %v138_v32  ;;  %v308_v12 = vsel %vm79_vm1, %v974_v57, 0.0  ;;  %v234_v1 = vmul.f32 %v1382_v2, %v1382_v2  ;;  %v310_v60 = vsel %vm79_vm1, %v232_v20, 0.0  ;;  %v1388_v51 = vld [vmem:[#allocation40_spill] sm:$0xff] }
  0x3e   :  { %v305_v40 = vadd.f32 %v304_v55, %v303_v17  ;;  %v235_v55 = vmul.f32 %v1384_v18, %v1384_v18  ;;  %v312_v56 = vsel %vm79_vm1, %v233_v24, 0.0  ;;  %v236_v57 = vmul.f32 %v1386_v44, %v1386_v44 }
  0x3f   :  { %v142_v62 = vadd.f32 %v141_v15, %v140_v26  ;;  %v314_v0 = vsel %vm79_vm1, %v234_v1, 0.0  ;;  %v1387_v15 = vld [vmem:[#allocation4_spill] sm:$0xff]  ;;  %v237_v26 = vmul.f32 %v1388_v51, %v1388_v51 }
  0x40   :  { %v307_v11 = vadd.f32 %v306_v49, %v305_v40  ;;  %v316_v14 = vsel %vm79_vm1, %v235_v55, 0.0  ;;  %v1389_v49 = vld [vmem:[#allocation5_spill] sm:$0xff]  ;;  %v318_v36 = vsel %vm79_vm1, %v236_v57, 0.0 }
  0x41   :  { %v144_v47 = vadd.f32 %v143_v30, %v142_v62  ;;  %v1390_v40 = vld [vmem:[#allocation41_spill] sm:$0xff]  ;;  %v320_v1 = vsel %vm79_vm1, %v237_v26, 0.0 }
  0x42   :  { %v309_v39 = vadd.f32 %v308_v12, %v307_v11  ;;  %v238_v62 = vmul.f32 %v1390_v40, %v1390_v40  ;;  %v1391_v12 = vld [vmem:[#allocation6_spill] sm:$0xff] }
  0x43   :  { %v146_v52 = vadd.f32 %v1383_v16, %v144_v47  ;;  %v1392_v47 = vld [vmem:[#allocation42_spill] sm:$0xff] }
  0x44   :  { %v311_v7 = vadd.f32 %v310_v60, %v309_v39  ;;  %v239_v2 = vmul.f32 %v1392_v47, %v1392_v47  ;;  %v1393_v39 = vld [vmem:[#allocation7_spill] sm:$0xff]  ;;  %v322_v55 = vsel %vm79_vm1, %v238_v62, 0.0 }
  0x45   :  { %v148_v38 = vadd.f32 %v1385_v37, %v146_v52  ;;  %v1394_v52 = vld [vmem:[#allocation43_spill] sm:$0xff] }
  0x46   :  { %v313_v32 = vadd.f32 %v312_v56, %v311_v7  ;;  %v240_v18 = vmul.f32 %v1394_v52, %v1394_v52  ;;  %v1395_v7 = vld [vmem:[#allocation8_spill] sm:$0xff]  ;;  %v324_v57 = vsel %vm79_vm1, %v239_v2, 0.0 }
  0x47   :  { %v150_v17 = vadd.f32 %v1387_v15, %v148_v38  ;;  %v1396_v38 = vld [vmem:[#allocation44_spill] sm:$0xff] }
  0x48   :  { %v315_v20 = vadd.f32 %v314_v0, %v313_v32  ;;  %v241_v44 = vmul.f32 %v1396_v38, %v1396_v38  ;;  %v1397_v32 = vld [vmem:[#allocation9_spill] sm:$0xff]  ;;  %v326_v26 = vsel %vm79_vm1, %v240_v18, 0.0 }
  0x49   :  { %v152_v30 = vadd.f32 %v1389_v49, %v150_v17  ;;  %v1398_v17 = vld [vmem:[#allocation45_spill] sm:$0xff] }
  0x4a   :  { %v317_v24 = vadd.f32 %v316_v14, %v315_v20  ;;  %v242_v51 = vmul.f32 %v1398_v17, %v1398_v17  ;;  %v1399_v20 = vld [vmem:[#allocation10_spill] sm:$0xff]  ;;  %v328_v62 = vsel %vm79_vm1, %v241_v44, 0.0 }
  0x4b   :  { %v154_v11 = vadd.f32 %v1391_v12, %v152_v30  ;;  %v1400_v30 = vld [vmem:[#allocation46_spill] sm:$0xff] }
  0x4c   :  { %v319_v60 = vadd.f32 %v318_v36, %v317_v24  ;;  %v243_v40 = vmul.f32 %v1400_v30, %v1400_v30  ;;  %v1401_v24 = vld [vmem:[#allocation11_spill] sm:$0xff]  ;;  %v330_v2 = vsel %vm79_vm1, %v242_v51, 0.0 }
  0x4d   :  { %v156_v16 = vadd.f32 %v1393_v39, %v154_v11  ;;  %v1402_v11 = vld [vmem:[#allocation47_spill] sm:$0xff] }
  0x4e   :  { %v321_v56 = vadd.f32 %v320_v1, %v319_v60  ;;  %v244_v47 = vmul.f32 %v1402_v11, %v1402_v11  ;;  %v1403_v60 = vld [vmem:[#allocation12_spill] sm:$0xff]  ;;  %v332_v18 = vsel %vm79_vm1, %v243_v40, 0.0 }
  0x4f   :  { %v158_v37 = vadd.f32 %v1395_v7, %v156_v16  ;;  %v1404_v16 = vld [vmem:[#allocation51_spill] sm:$0xff] }
  0x50   :  { %v323_v0 = vadd.f32 %v322_v55, %v321_v56  ;;  %v245_v52 = vmul.f32 %v1404_v16, %v1404_v16  ;;  %v1405_v56 = vld [vmem:[#allocation13_spill] sm:$0xff]  ;;  %v334_v44 = vsel %vm79_vm1, %v244_v47, 0.0 }
  0x51   :  { %v160_v15 = vadd.f32 %v1397_v32, %v158_v37  ;;  %v1406_v37 = vld [vmem:[#allocation52_spill] sm:$0xff]  ;;  %v1411_v47 = vld [vmem:[#allocation17_spill] sm:$0xff] }
  0x52   :  { %v325_v14 = vadd.f32 %v324_v57, %v323_v0  ;;  %v246_v38 = vmul.f32 %v1406_v37, %v1406_v37  ;;  %v1407_v0 = vld [vmem:[#allocation14_spill] sm:$0xff]  ;;  %v336_v51 = vsel %vm79_vm1, %v245_v52, 0.0 }
  0x53   :  { %v162_v49 = vadd.f32 %v1399_v20, %v160_v15  ;;  %v1408_v15 = vld [vmem:[#allocation53_spill] sm:$0xff] }
  0x54   :  { %v327_v36 = vadd.f32 %v326_v26, %v325_v14  ;;  %v247_v17 = vmul.f32 %v1408_v15, %v1408_v15  ;;  %v1409_v14 = vld [vmem:[#allocation15_spill] sm:$0xff]  ;;  %v338_v30 = vsel %vm79_vm1, %v246_v38, 0.0  ;;  %v1415_v38 = vld [vmem:[#allocation21_spill] sm:$0xff] }
  0x55   :  { %v164_v12 = vadd.f32 %v1401_v24, %v162_v49  ;;  %v248_v49 = vmul.f32 %v1145_v58, %v1145_v58  ;;  %v249_v24 = vmul.f32 %v1162_v34, %v1162_v34 }
  0x56   :  { %v329_v1 = vadd.f32 %v328_v62, %v327_v36  ;;  %v1410_v62 = vld [vmem:[#allocation16_spill] sm:$0xff] }
  0x57   :  { %v166_v39 = vadd.f32 %v1403_v60, %v164_v12  ;;  %v340_v12 = vsel %vm79_vm1, %v247_v17, 0.0  ;;  %v344_v58 = vsel %vm79_vm1, %v249_v24, 0.0  ;;  %v1417_v17 = vld [vmem:[#allocation23_spill] sm:$0xff]  ;;  %v1421_v24 = vld [vmem:[#allocation28_spill] sm:$0xff] }
  0x58   :  { %v331_v55 = vadd.f32 %v330_v2, %v329_v1  ;;  %v342_v1 = vsel %vm79_vm1, %v248_v49, 0.0 }
  0x59   :  { %v168_v7 = vadd.f32 %v1405_v56, %v166_v39  ;;  %v1412_v39 = vld [vmem:[#allocation18_spill] sm:$0xff] }
  0x5a   :  { %v333_v57 = vadd.f32 %v332_v18, %v331_v55  ;;  %v1413_v18 = vld [vmem:[#allocation19_spill] sm:$0xff] }
  0x5b   :  { %v170_v32 = vadd.f32 %v1407_v0, %v168_v7  ;;  %v1414_v7 = vld [vmem:[#allocation20_spill] sm:$0xff]  ;;  %v1416_v0 = vld [vmem:[#allocation22_spill] sm:$0xff] }
  0x5c   :  { %v335_v26 = vadd.f32 %v334_v44, %v333_v57 }
  0x5d   :  { %v172_v20 = vadd.f32 %v1409_v14, %v170_v32  ;;  %v1418_v14 = vld [vmem:[#allocation24_spill] sm:$0xff] }
  0x5e   :  { %v337_v40 = vadd.f32 %v336_v51, %v335_v26 }
  0x5f   :  { %v174_v36 = vadd.f32 %v1410_v62, %v172_v20  ;;  %v1420_v62 = vld [vmem:[#allocation27_spill] sm:$0xff] }
  0x60   :  { %v339_v11 = vadd.f32 %v338_v30, %v337_v40  ;;  %v1419_v30 = vld [vmem:[#allocation25_spill] sm:$0xff] }
  0x61   :  { %v176_v2 = vadd.f32 %v1411_v47, %v174_v36 }
  0x62   :  { %v341_v60 = vadd.f32 %v340_v12, %v339_v11  ;;  %v1422_v11 = vld [vmem:[#allocation29_spill] sm:$0xff] }
  0x63   :  { %v178_v16 = vadd.f32 %v1412_v39, %v176_v2  ;;  %v1423_v2 = vld [vmem:[#allocation31_spill] sm:$0xff] }
  0x64   :  { %v343_v52 = vadd.f32 %v342_v1, %v341_v60  ;;  %v1424_v60 = vld [vmem:[#allocation32_spill] sm:$0xff] }
  0x65   :  { %v180_v55 = vadd.f32 %v1413_v18, %v178_v16  ;;  %v1425_v16 = vld [vmem:[#allocation33_spill] sm:$0xff] }
  0x66   :  { %v345_v56 = vadd.f32 %v344_v58, %v343_v52  ;;  %v1426_v52 = vld [vmem:[#allocation34_spill] sm:$0xff] }
  0x67   :  { %v182_v37 = vadd.f32 %v1414_v7, %v180_v55 }
  0x68   :  { %v347_v34 = vadd.f32 %v1055_v3, %v345_v56 }
  0x69   :  { %v184_v44 = vadd.f32 %v1415_v38, %v182_v37 }
  0x6a   :  { %v349_v57 = vadd.f32 %v1058_v25, %v347_v34 }
  0x6b   :  { %v186_v32 = vadd.f32 %v1416_v0, %v184_v44 }
  0x6c   :  { %v351_v15 = vadd.f32 %v1061_v10, %v349_v57 }
  0x6d   :  { %v188_v51 = vadd.f32 %v1417_v17, %v186_v32 }
  0x6e   :  { %v353_v26 = vadd.f32 %v1064_v43, %v351_v15 }
  0x6f   :  { %v190_v20 = vadd.f32 %v1418_v14, %v188_v51 }
  0x70   :  { %v355_v49 = vadd.f32 %v1068_v6, %v353_v26 }
  0x71   :  { %v192_v40 = vadd.f32 %v1419_v30, %v190_v20 }
  0x72   :  { %v357_v3 = vadd.f32 %v1071_v50, %v355_v49 }
  0x73   :  { %v194_v36 = vadd.f32 %v1420_v62, %v192_v40 }
  0x74   :  { %v359_v25 = vadd.f32 %v1074_v13, %v357_v3 }
  0x75   :  { %v196_v12 = vadd.f32 %v1421_v24, %v194_v36 }
  0x76   :  { %v361_v10 = vadd.f32 %v1077_v19, %v359_v25 }
  0x77   :  { %v198_v47 = vadd.f32 %v1422_v11, %v196_v12 }
  0x78   :  { %v363_v43 = vadd.f32 %v1080_v21, %v361_v10 }
  0x79   :  { %v200_v1 = vadd.f32 %v1423_v2, %v198_v47 }
  0x7a   :  { %v365_v6 = vadd.f32 %v1083_v22, %v363_v43 }
  0x7b   :  { %v202_v39 = vadd.f32 %v1424_v60, %v200_v1 }
  0x7c   :  { %v367_v50 = vadd.f32 %v1087_v23, %v365_v6 }
  0x7d   :  { %v204_v58 = vadd.f32 %v1425_v16, %v202_v39 }
  0x7e   :  { %v369_v13 = vadd.f32 %v1090_v4, %v367_v50  ;;  %v78_v4 = vld [vmem:[%s1302_s1] sm:$0x1] }
  0x7f   :  { %v206_v18 = vadd.f32 %v1426_v52, %v204_v58 }
  0x80   :  { %v371_v19 = vadd.f32 %v1093_v9, %v369_v13 }
  0x81   :  { %v207_v55 = vrot.slane %v206_v18, 4 }
  0x82   :  { %v373_v56 = vadd.f32 %v1096_v27, %v371_v19 }
  0x83   :  { %v208_v21 = vadd.f32 %v207_v55, %v206_v18 }
  0x84   :  { %v375_v7 = vadd.f32 %v1099_v28, %v373_v56 }
  0x85   :  { %v209_v37 = vrot.slane %v208_v21, 2 }
  0x86   :  { %v377_v22 = vadd.f32 %v1102_v29, %v375_v7 }
  0x87   :  { %v210_v34 = vadd.f32 %v209_v37, %v208_v21 }
  0x88   :  { %v379_v23 = vadd.f32 %v1106_v33, %v377_v22 }
  0x89   :  { %v211_v38 = vrot.slane %v210_v34, 1 }
  0x8a   :  { %v381_v44 = vadd.f32 %v1109_v35, %v379_v23 }
  0x8b   :  { %v212_v9 = vadd.f32 %v211_v38, %v210_v34 }
  0x8c   :  { %v383_v27 = vadd.f32 %v1112_v41, %v381_v44 }
  0x8d   :  { %v213_v57 = vadd.f32 %v212_v9, %v78_v4 }
  0x8e   :  { %v385_v28 = vadd.f32 %v1115_v42, %v383_v27 }
  0x8f   :  { %215 = vst.msk [vmem:[%s1302_s1] sm:$0x1] %vm214_vm2, %v213_v57 }
  0x90   :  { %v387_v29 = vadd.f32 %v1118_v46, %v385_v28 }
  0x92   :  { %v389_v33 = vadd.f32 %v1121_v63, %v387_v29 }
  0x94   :  { %v391_v0 = vadd.f32 %v1125_v48, %v389_v33 }
  0x96   :  { %v393_v35 = vadd.f32 %v1128_v45, %v391_v0  ;;  %v216_v45 = vld [vmem:[%s1302_s1 + $0x1] sm:$0x1] }
  0x98   :  { %v395_v32 = vadd.f32 %v1131_v53, %v393_v35 }
  0x9a   :  { %v397_v41 = vadd.f32 %v1134_v54, %v395_v32 }
  0x9c   :  { %v399_v15 = vadd.f32 %v1137_v31, %v397_v41 }
  0x9e   :  { %v401_v42 = vadd.f32 %v1140_v59, %v399_v15 }
  0xa0   :  { %v403_v17 = vadd.f32 %v1149_v61, %v401_v42 }
  0xa2   :  { %v405_v51 = vadd.f32 %v1152_v5, %v403_v17 }
  0xa4   :  { %v407_v46 = vadd.f32 %v1155_v8, %v405_v51 }
  0xa6   :  { %v408_v26 = vrot.slane %v407_v46, 4 }
  0xa8   :  { %v409_v63 = vadd.f32 %v408_v26, %v407_v46 }
  0xaa   :  { %v410_v14 = vrot.slane %v409_v63, 2 }
  0xac   :  { %v411_v48 = vadd.f32 %v410_v14, %v409_v63 }
  0xae   :  { %v412_v20 = vrot.slane %v411_v48, 1 }
  0xb0   :  { %v413_v53 = vadd.f32 %v412_v20, %v411_v48 }
  0xb2   :  { %v414_v54 = vadd.f32 %v413_v53, %v216_v45 }
  0xb4   :  { %415 = vst.msk [vmem:[%s1302_s1 + $0x1] sm:$0x1] %vm214_vm2, %v414_v54 }

// kernel: ftgan_encoder_forward.9
= control target key start
LH: loop header
LB: loop body
LE: loop exit
PB: predicated region body
PF: predicated region fallthrough
CT: control target
= control target key end

     0   :  { %s1249_s9 = smov 0   ;;  %s1251_s10 = smov 0   ;;  %s1534_s0 = inlined_call_operand.vmem [shape: bf16[512,196], index: 0, kind: input, shape index: {}]   ;;  %s1535_s1 = inlined_call_operand.vmem [shape: bf16[196,8], index: 1, kind: input, shape index: {}]   ;;  %s1536_s2 = inlined_call_operand.vmem [shape: f32[512,8], index: 2, kind: output, shape index: {}]  }
   0x1   :  { %s1253_s11 = smov 0  }
   0x2 LB: > { %s31_s12 = sadd.s32 1, %s1226_s10  ;;  %p1025_p0 = scmp.ge.s32.totalorder %s1230_s11, 1  ;;  %s1230_s11 = sphi %s1253_s11, %s12_s11   ;;  %s1226_s10 = sphi %s1251_s10, %s1538_s10   ;;  %s1222_s9 = sphi %s1249_s9, %s1537_s9  }
   0x3   : > { %p33_p1 = scmp.ge.s32.totalorder %s31_s12, 2  ;;  %p158_p2 = scmp.lt.s32.totalorder %s1230_s11, 3 }
   0x5   : > { %s1540_s12 = smov (%p33_p1, %s31_s12), 0  ;;  %p159_p3 = pnand %p1025_p0, %p158_p2 }
   0x6   : > { %v1147_v0 = vld [vmem:[%s1535_s1] sm:$0xff] (!%p159_p3)   ;;  %v1232_v1 = vmov (!%p159_p3), 0   ;;  %v1148_v2 = vld [vmem:[%s1535_s1 + $0x8] sm:$0xff] (!%p159_p3)   ;;  %s1026_s17 = sshll.u32 (!%p159_p3), %s1222_s9, 5  ;;  %v1149_v3 = vld [vmem:[%s1535_s1 + $0x10] sm:$0xff] (!%p159_p3)   ;;  %vm231_vm0 = vcmask (!%p159_p3), 64512  }
   0x7   : > { %162 = sbr.rel (%p159_p3) target bundleno = 341 (0x155), region = 28  ;;  %625 = vmatprep.subr.bf16.mxu0 (!%p159_p3), %v1232_v1  ;;  %1095 = vmatprep.subr.bf16.mxu1 (!%p159_p3), %v1232_v1  ;;  %p198_p4 = scmp.lt.s32.totalorder (!%p159_p3), %s1026_s17, 63  ;;  %v1233_v4 = vmov (!%p159_p3), 0.0   ;;  %v1150_v5 = vld [vmem:[%s1535_s1 + $0x18] sm:$0xff] (!%p159_p3)   ;;  %vm572_vm1 = vcmask (!%p159_p3), 556032   ;;  %v1151_v7 = vld [vmem:[%s1535_s1 + $0x20] sm:$0xff] (!%p159_p3)  }
   0x8   : > { %626 = vmatpush1.bf16.msra.mxu0 (!%p159_p3), %v1147_v0  ;;  %1108 = vmatpush1.bf16.msra.mxu1 (!%p159_p3), %v1147_v0  ;;  %232 = vst.msk [vmem:[#allocation2] sm:$0xff] (!%p159_p3), %vm231_vm0, %v1233_v4  ;;  %233 = vst.msk [vmem:[#allocation2 + $0x8] sm:$0xff] (!%p159_p3), %vm231_vm0, %v1233_v4  ;;  %v1152_v9 = vld [vmem:[%s1535_s1 + $0x28] sm:$0xff] (!%p159_p3)   ;;  %v1153_v10 = vld [vmem:[%s1535_s1 + $0x30] sm:$0xff] (!%p159_p3)   ;;  %vm621_vm2 = vcmask (!%p159_p3), 1041408  }
   0x9   : > { %627 = vmatprep.subr.bf16.mxu0 (!%p159_p3), %v1232_v1  ;;  %1096 = vmatprep.subr.bf16.mxu1 (!%p159_p3), %v1232_v1  ;;  %234 = vst.msk [vmem:[#allocation2 + $0x10] sm:$0xff] (!%p159_p3), %vm231_vm0, %v1233_v4  ;;  %235 = vst.msk [vmem:[#allocation2 + $0x18] sm:$0xff] (!%p159_p3), %vm231_vm0, %v1233_v4  ;;  %v1154_v11 = vld [vmem:[%s1535_s1 + $0x38] sm:$0xff] (!%p159_p3)   ;;  %v1155_v12 = vld [vmem:[%s1535_s1 + $0x40] sm:$0xff] (!%p159_p3)  }
   0xa   : > { %236 = vst.msk [vmem:[#allocation2 + $0x20] sm:$0xff] (!%p159_p3), %vm231_vm0, %v1233_v4  ;;  %237 = vst.msk [vmem:[#allocation2 + $0x28] sm:$0xff] (!%p159_p3), %vm231_vm0, %v1233_v4  ;;  %v1156_v13 = vld [vmem:[%s1535_s1 + $0x48] sm:$0xff] (!%p159_p3)   ;;  %v1157_v14 = vld [vmem:[%s1535_s1 + $0x50] sm:$0xff] (!%p159_p3)  }
   0xb   : > { %238 = vst.msk [vmem:[#allocation2 + $0x30] sm:$0xff] (!%p159_p3), %vm231_vm0, %v1233_v4  ;;  %239 = vst.msk [vmem:[#allocation2 + $0x38] sm:$0xff] (!%p159_p3), %vm231_vm0, %v1233_v4  ;;  %v1158_v15 = vld [vmem:[%s1535_s1 + $0x58] sm:$0xff] (!%p159_p3)   ;;  %v1159_v16 = vld [vmem:[%s1535_s1 + $0x60] ss:$0 sps:$4 sm:$0x33] (!%p159_p3)  }
   0xc   : > { %628 = vmatpush1.bf16.msra.mxu0 (!%p159_p3), %v1148_v2  ;;  %1109 = vmatpush1.bf16.msra.mxu1 (!%p159_p3), %v1148_v2  ;;  %240 = vst.msk [vmem:[#allocation2 + $0x40] sm:$0xff] (!%p159_p3), %vm231_vm0, %v1233_v4  ;;  %241 = vst.msk [vmem:[#allocation2 + $0x48] sm:$0xff] (!%p159_p3), %vm231_vm0, %v1233_v4  ;;  %v623_v17 = vsel (!%p159_p3), %vm621_vm2, %v1159_v16, 0 }
   0xd   : > { %629 = vmatprep.subr.bf16.mxu0 (!%p159_p3), %v1232_v1  ;;  %1097 = vmatprep.subr.bf16.mxu1 (!%p159_p3), %v1232_v1  ;;  %242 = vst.msk [vmem:[#allocation2 + $0x50] sm:$0xff] (!%p159_p3), %vm231_vm0, %v1233_v4  ;;  %243 = vst.msk [vmem:[#allocation2 + $0x58] sm:$0xff] (!%p159_p3), %vm231_vm0, %v1233_v4 }
   0xe   : > { %s1542_s17 = smov (!%p198_p4, %s1026_s17), 63  ;;  %244 = vst.msk [vmem:[#allocation2 + $0x60] sm:$0xff] %vm231_vm0, %v1233_v4  ;;  %245 = vst.msk [vmem:[#allocation2 + $0x68] sm:$0xff] %vm231_vm0, %v1233_v4 }
   0xf   : > { %s1094_s20 = sshll.u32 %s1542_s17, 3  ;;  %246 = vst.msk [vmem:[#allocation2 + $0x70] sm:$0xff] %vm231_vm0, %v1233_v4  ;;  %247 = vst.msk [vmem:[#allocation2 + $0x78] sm:$0xff] %vm231_vm0, %v1233_v4  ;;  %v264_v48 = vld [vmem:[#allocation2] sm:$0xff]  ;;  %v265_v52 = vld [vmem:[#allocation2 + $0x8] sm:$0xff] }
  0x10   : > { %248 = vst.msk [vmem:[#allocation2 + $0x80] sm:$0xff] %vm231_vm0, %v1233_v4  ;;  %249 = vst.msk [vmem:[#allocation2 + $0x88] sm:$0xff] %vm231_vm0, %v1233_v4  ;;  %630 = vmatpush1.bf16.msra.mxu0 %v1149_v3  ;;  %1110 = vmatpush1.bf16.msra.mxu1 %v1149_v3  ;;  %s1325_s25 = scalar_lea.vmem %s1534_s0, %s1094_s20  ;;  %v266_v0 = vld [vmem:[#allocation2 + $0x10] sm:$0xff]  ;;  %s1431_s23 = scalar_lea.vmem %s1536_s2, %s1094_s20 }
  0x11   : > { %250 = vst.msk [vmem:[#allocation2 + $0x90] sm:$0xff] %vm231_vm0, %v1233_v4  ;;  %251 = vst.msk [vmem:[#allocation2 + $0x98] sm:$0xff] %vm231_vm0, %v1233_v4  ;;  %631 = vmatprep.subr.bf16.mxu0 %v1232_v1  ;;  %1098 = vmatprep.subr.bf16.mxu1 %v1232_v1  ;;  %v1162_v6 = vld [vmem:[%s1325_s25 + $0x4] ss:$8 sps:$4 sm:$0xff]   ;;  %v1160_v18 = vld [vmem:[%s1325_s25] ss:$8 sps:$4 sm:$0xff]  }
  0x12   : > { %252 = vst.msk [vmem:[#allocation2 + $0xa0] sm:$0xff] %vm231_vm0, %v1233_v4  ;;  %253 = vst.msk [vmem:[#allocation2 + $0xa8] sm:$0xff] %vm231_vm0, %v1233_v4  ;;  %v1165_v8 = vld [vmem:[%s1325_s25 + $0x84] ss:$8 sps:$4 sm:$0xff]   ;;  %1076 = vmatprep.mubr.msk.bf16.mxu0 %vm572_vm1, %v1162_v6  ;;  %v1163_v19 = vld [vmem:[%s1325_s25 + $0x80] ss:$8 sps:$4 sm:$0xff]  }
  0x13   : > { %254 = vst.msk [vmem:[#allocation2 + $0xb0] sm:$0xff] %vm231_vm0, %v1233_v4  ;;  %255 = vst.msk [vmem:[#allocation2 + $0xb8] sm:$0xff] %vm231_vm0, %v1233_v4  ;;  %1084 = vmatprep.mubr.msk.bf16.mxu1 %vm572_vm1, %v1165_v8  ;;  %v1166_v20 = vld [vmem:[%s1325_s25 + $0x14] ss:$8 sps:$4 sm:$0xff]   ;;  %v1170_v22 = vld [vmem:[%s1325_s25 + $0x10] ss:$8 sps:$4 sm:$0xff]  }
  0x14   : > { %256 = vst.msk [vmem:[#allocation2 + $0xc0] sm:$0xff] %vm231_vm0, %v1233_v4  ;;  %257 = vst.msk [vmem:[#allocation2 + $0xc8] sm:$0xff] %vm231_vm0, %v1233_v4  ;;  %632 = vmatpush1.bf16.msra.mxu0 %v1150_v5  ;;  %1111 = vmatpush1.bf16.msra.mxu1 %v1150_v5  ;;  %v1168_v21 = vld [vmem:[%s1325_s25 + $0x94] ss:$8 sps:$4 sm:$0xff]   ;;  %v1171_v23 = vld [vmem:[%s1325_s25 + $0x90] ss:$8 sps:$4 sm:$0xff]  }
  0x15   : > { %258 = vst.msk [vmem:[#allocation2 + $0xd0] sm:$0xff] %vm231_vm0, %v1233_v4  ;;  %259 = vst.msk [vmem:[#allocation2 + $0xd8] sm:$0xff] %vm231_vm0, %v1233_v4  ;;  %633 = vmatprep.subr.bf16.mxu0 %v1232_v1  ;;  %1099 = vmatprep.subr.bf16.mxu1 %v1232_v1  ;;  %v1172_v24 = vld [vmem:[%s1325_s25 + $0x24] ss:$8 sps:$4 sm:$0xff]   ;;  %v1176_v26 = vld [vmem:[%s1325_s25 + $0x20] ss:$8 sps:$4 sm:$0xff]  }
  0x16   : > { %260 = vst.msk [vmem:[#allocation2 + $0xe0] sm:$0xff] %vm231_vm0, %v1233_v4  ;;  %261 = vst.msk [vmem:[#allocation2 + $0xe8] sm:$0xff] %vm231_vm0, %v1233_v4  ;;  %v1174_v25 = vld [vmem:[%s1325_s25 + $0xa4] ss:$8 sps:$4 sm:$0xff]   ;;  %v1177_v27 = vld [vmem:[%s1325_s25 + $0xa0] ss:$8 sps:$4 sm:$0xff]  }
  0x17   : > { %262 = vst.msk [vmem:[#allocation2 + $0xf0] sm:$0xff] %vm231_vm0, %v1233_v4  ;;  %263 = vst.msk [vmem:[#allocation2 + $0xf8] sm:$0xff] %vm231_vm0, %v1233_v4  ;;  %v1178_v28 = vld [vmem:[%s1325_s25 + $0x34] ss:$8 sps:$4 sm:$0xff]   ;;  %v1182_v30 = vld [vmem:[%s1325_s25 + $0x30] ss:$8 sps:$4 sm:$0xff]  }
  0x18   : > { %634 = vmatpush1.bf16.msra.mxu0 %v1151_v7  ;;  %1112 = vmatpush1.bf16.msra.mxu1 %v1151_v7  ;;  %v1180_v29 = vld [vmem:[%s1325_s25 + $0xb4] ss:$8 sps:$4 sm:$0xff]   ;;  %v1183_v31 = vld [vmem:[%s1325_s25 + $0xb0] ss:$8 sps:$4 sm:$0xff]   ;;  %v1184_v32 = vld [vmem:[%s1325_s25 + $0x44] ss:$8 sps:$4 sm:$0xff]  }
  0x19   : > { %635 = vmatprep.subr.bf16.mxu0 %v1232_v1  ;;  %1100 = vmatprep.subr.bf16.mxu1 %v1232_v1  ;;  %v1186_v33 = vld [vmem:[%s1325_s25 + $0xc4] ss:$8 sps:$4 sm:$0xff]   ;;  %v1188_v34 = vld [vmem:[%s1325_s25 + $0x40] ss:$8 sps:$4 sm:$0xff]   ;;  %v1190_v36 = vld [vmem:[%s1325_s25 + $0x54] ss:$8 sps:$4 sm:$0xff]  }
  0x1a   : > { %v1189_v35 = vld [vmem:[%s1325_s25 + $0xc0] ss:$8 sps:$4 sm:$0xff]   ;;  %v1192_v37 = vld [vmem:[%s1325_s25 + $0xd4] ss:$8 sps:$4 sm:$0xff]   ;;  %v1194_v38 = vld [vmem:[%s1325_s25 + $0x50] ss:$8 sps:$4 sm:$0xff]  }
  0x1b   : > { %v1195_v39 = vld [vmem:[%s1325_s25 + $0xd0] ss:$8 sps:$4 sm:$0xff]   ;;  %v1196_v40 = vld [vmem:[%s1325_s25 + $0x64] ss:$8 sps:$4 sm:$0xff]   ;;  %v1200_v42 = vld [vmem:[%s1325_s25 + $0x60] ss:$8 sps:$4 sm:$0xff]  }
  0x1c   : > { %636 = vmatpush1.bf16.msra.mxu0 %v1152_v9  ;;  %1113 = vmatpush1.bf16.msra.mxu1 %v1152_v9  ;;  %v1198_v41 = vld [vmem:[%s1325_s25 + $0xe4] ss:$8 sps:$4 sm:$0xff]   ;;  %v1201_v43 = vld [vmem:[%s1325_s25 + $0xe0] ss:$8 sps:$4 sm:$0xff]   ;;  %v1202_v44 = vld [vmem:[%s1325_s25 + $0x74] ss:$8 sps:$4 sm:$0xff]  }
  0x1d   : > { %637 = vmatprep.subr.bf16.mxu0 %v1232_v1  ;;  %1101 = vmatprep.subr.bf16.mxu1 %v1232_v1  ;;  %v1204_v45 = vld [vmem:[%s1325_s25 + $0xf4] ss:$8 sps:$4 sm:$0xff]   ;;  %v1206_v46 = vld [vmem:[%s1325_s25 + $0x70] ss:$8 sps:$4 sm:$0xff]   ;;  %v280_v49 = vld [vmem:[#allocation2 + $0x80] sm:$0xff] }
  0x1e   : > { %v1207_v47 = vld [vmem:[%s1325_s25 + $0xf0] ss:$8 sps:$4 sm:$0xff]   ;;  %v281_v53 = vld [vmem:[#allocation2 + $0x88] sm:$0xff] }
  0x1f   : > { %v267_v4 = vld [vmem:[#allocation2 + $0x18] sm:$0xff] }
  0x20   : > { %638 = vmatpush1.bf16.msra.mxu0 %v1153_v10  ;;  %1114 = vmatpush1.bf16.msra.mxu1 %v1153_v10  ;;  %v283_v5 = vld [vmem:[#allocation2 + $0x98] sm:$0xff] }
  0x21   : > { %639 = vmatprep.subr.bf16.mxu0 %v1232_v1  ;;  %1102 = vmatprep.subr.bf16.mxu1 %v1232_v1 }
  0x24   : > { %640 = vmatpush1.bf16.msra.mxu0 %v1154_v11  ;;  %1115 = vmatpush1.bf16.msra.mxu1 %v1154_v11 }
  0x25   : > { %641 = vmatprep.subr.bf16.mxu0 %v1232_v1  ;;  %1103 = vmatprep.subr.bf16.mxu1 %v1232_v1 }
  0x28   : > { %642 = vmatpush1.bf16.msra.mxu0 %v1155_v12  ;;  %1116 = vmatpush1.bf16.msra.mxu1 %v1155_v12 }
  0x29   : > { %643 = vmatprep.subr.bf16.mxu0 %v1232_v1  ;;  %1104 = vmatprep.subr.bf16.mxu1 %v1232_v1 }
  0x2c   : > { %644 = vmatpush1.bf16.msra.mxu0 %v1156_v13  ;;  %1117 = vmatpush1.bf16.msra.mxu1 %v1156_v13 }
  0x2d   : > { %645 = vmatprep.subr.bf16.mxu0 %v1232_v1  ;;  %1105 = vmatprep.subr.bf16.mxu1 %v1232_v1 }
  0x30   : > { %646 = vmatpush1.bf16.msra.mxu0 %v1157_v14  ;;  %1118 = vmatpush1.bf16.msra.mxu1 %v1157_v14 }
  0x31   : > { %647 = vmatprep.subr.bf16.mxu0 %v1232_v1  ;;  %1106 = vmatprep.subr.bf16.mxu1 %v1232_v1 }
  0x34   : > { %648 = vmatpush1.bf16.msra.mxu0 %v1158_v15  ;;  %1119 = vmatpush1.bf16.msra.mxu1 %v1158_v15 }
  0x35   : > { %649 = vmatprep.subr.bf16.mxu0 %v1232_v1  ;;  %1107 = vmatprep.subr.bf16.mxu1 %v1232_v1  ;;  %v282_v1 = vld [vmem:[#allocation2 + $0x90] sm:$0xff] }
  0x38   : > { %650 = vmatpush1.bf16.msra.mxu0 %v623_v17  ;;  %1120 = vmatpush1.bf16.msra.mxu1 %v623_v17 }
  0x3b   : > { %658 = vmatmul.mubr.bf16.vlgmr.msra.gmra.mrb[0].mxu0 %v1160_v18  ;;  %722 = vmatmul.mubr.bf16.vlgmr.msra.gmra.mrb[0].mxu1 %v1163_v19 }
  0x3c   : > { %1077 = vmatprep.mubr.msk.bf16.mxu0 %vm572_vm1, %v1166_v20  ;;  %1085 = vmatprep.mubr.msk.bf16.mxu1 %vm572_vm1, %v1168_v21  ;;  %v268_v20 = vld [vmem:[#allocation2 + $0x20] sm:$0xff] }
  0x3d   : > { %v284_v21 = vld [vmem:[#allocation2 + $0xa0] sm:$0xff] }
  0x43   : > { %666 = vmatmul.mubr.bf16.gmra.mrb[4].mxu0 %v1170_v22  ;;  %730 = vmatmul.mubr.bf16.gmra.mrb[4].mxu1 %v1171_v23 }
  0x44   : > { %1078 = vmatprep.mubr.msk.bf16.mxu0 %vm572_vm1, %v1172_v24  ;;  %1086 = vmatprep.mubr.msk.bf16.mxu1 %vm572_vm1, %v1174_v25  ;;  %v269_v24 = vld [vmem:[#allocation2 + $0x28] sm:$0xff] }
  0x45   : > { %v285_v25 = vld [vmem:[#allocation2 + $0xa8] sm:$0xff] }
  0x4b   : > { %674 = vmatmul.mubr.bf16.gmra.mrb[8].mxu0 %v1176_v26  ;;  %738 = vmatmul.mubr.bf16.gmra.mrb[8].mxu1 %v1177_v27 }
  0x4c   : > { %1079 = vmatprep.mubr.msk.bf16.mxu0 %vm572_vm1, %v1178_v28  ;;  %1087 = vmatprep.mubr.msk.bf16.mxu1 %vm572_vm1, %v1180_v29 }
  0x53   : > { %682 = vmatmul.mubr.bf16.gmra.mrb[12].mxu0 %v1182_v30  ;;  %746 = vmatmul.mubr.bf16.gmra.mrb[12].mxu1 %v1183_v31 }
  0x54   : > { %1080 = vmatprep.mubr.msk.bf16.mxu0 %vm572_vm1, %v1184_v32  ;;  %1088 = vmatprep.mubr.msk.bf16.mxu1 %vm572_vm1, %v1186_v33 }
  0x5b   : > { %690 = vmatmul.mubr.bf16.gmra.mrb[16].mxu0 %v1188_v34  ;;  %754 = vmatmul.mubr.bf16.gmra.mrb[16].mxu1 %v1189_v35 }
  0x5c   : > { %1081 = vmatprep.mubr.msk.bf16.mxu0 %vm572_vm1, %v1190_v36  ;;  %1089 = vmatprep.mubr.msk.bf16.mxu1 %vm572_vm1, %v1192_v37 }
  0x63   : > { %698 = vmatmul.mubr.bf16.gmra.mrb[20].mxu0 %v1194_v38  ;;  %762 = vmatmul.mubr.bf16.gmra.mrb[20].mxu1 %v1195_v39 }
  0x64   : > { %1082 = vmatprep.mubr.msk.bf16.mxu0 %vm572_vm1, %v1196_v40  ;;  %1090 = vmatprep.mubr.msk.bf16.mxu1 %vm572_vm1, %v1198_v41  ;;  %v270_v40 = vld [vmem:[#allocation2 + $0x30] sm:$0xff] }
  0x65   : > { %v286_v41 = vld [vmem:[#allocation2 + $0xb0] sm:$0xff] }
  0x6b   : > { %706 = vmatmul.mubr.bf16.gmra.mrb[24].mxu0 %v1200_v42  ;;  %770 = vmatmul.mubr.bf16.gmra.mrb[24].mxu1 %v1201_v43 }
  0x6c   : > { %1083 = vmatprep.mubr.msk.bf16.mxu0 %vm572_vm1, %v1202_v44  ;;  %1091 = vmatprep.mubr.msk.bf16.mxu1 %vm572_vm1, %v1204_v45  ;;  %v271_v44 = vld [vmem:[#allocation2 + $0x38] sm:$0xff] }
  0x6d   : > { %v287_v45 = vld [vmem:[#allocation2 + $0xb8] sm:$0xff] }
  0x73   : > { %714 = vmatmul.mubr.bf16.gmra.mrb[28].mxu0 %v1206_v46  ;;  %778 = vmatmul.mubr.bf16.gmra.mrb[28].mxu1 %v1207_v47 }
 0x10e   : > { %v659_v50 = vpop.f32.mrb[0].mxu0  ;;  %v723_v51 = vpop.f32.mrb[0].mxu1 }
 0x10f   : > { %v786_v54 = vadd.f32 %v659_v50, %v264_v48  ;;  %v802_v55 = vadd.f32 %v723_v51, %v280_v49  ;;  %v661_v56 = vpop.f32.mrb[1].mxu0  ;;  %v725_v57 = vpop.f32.mrb[1].mxu1 }
 0x110   : > { %v662_v58 = vpop.f32.mrb[2].mxu0  ;;  %v726_v59 = vpop.f32.mrb[2].mxu1 }
 0x111   : > { %819 = vst.msk [vmem:[#allocation2] sm:$0xff] %vm231_vm0, %v786_v54  ;;  %835 = vst.msk [vmem:[#allocation2 + $0x80] sm:$0xff] %vm231_vm0, %v802_v55  ;;  %v787_v60 = vadd.f32 %v662_v58, %v265_v52  ;;  %v803_v61 = vadd.f32 %v726_v59, %v281_v53  ;;  %v664_v62 = vpop.f32.mrb[3].mxu0  ;;  %v728_v63 = vpop.f32.mrb[3].mxu1 }
 0x113   : > { %820 = vst.msk [vmem:[#allocation2 + $0x8] sm:$0xff] %vm231_vm0, %v787_v60  ;;  %836 = vst.msk [vmem:[#allocation2 + $0x88] sm:$0xff] %vm231_vm0, %v803_v61  ;;  %v272_v60 = vld [vmem:[#allocation2 + $0x40] sm:$0xff] }
 0x114   : > { %v288_v61 = vld [vmem:[#allocation2 + $0xc0] sm:$0xff] }
 0x116   : > { %v667_v2 = vpop.f32.mrb[4].mxu0  ;;  %v731_v3 = vpop.f32.mrb[4].mxu1 }
 0x117   : > { %v788_v6 = vadd.f32 %v667_v2, %v266_v0  ;;  %v804_v7 = vadd.f32 %v731_v3, %v282_v1  ;;  %v669_v8 = vpop.f32.mrb[5].mxu0  ;;  %v733_v9 = vpop.f32.mrb[5].mxu1  ;;  %v273_v0 = vld [vmem:[#allocation2 + $0x48] sm:$0xff] }
 0x118   : > { %v854_v10 = vld [vmem:[#allocation2] sm:$0xff]  ;;  %v670_v12 = vpop.f32.mrb[6].mxu0  ;;  %v734_v13 = vpop.f32.mrb[6].mxu1  ;;  %v289_v1 = vld [vmem:[#allocation2 + $0xc8] sm:$0xff] }
 0x119   : > { %v870_v11 = vld [vmem:[#allocation2 + $0x80] sm:$0xff]  ;;  %886 = vst.msk [vmem:[%s1431_s23] sm:$0xff] %vm231_vm0, %v854_v10  ;;  %821 = vst.msk [vmem:[#allocation2 + $0x10] sm:$0xff] %vm231_vm0, %v788_v6  ;;  %v789_v14 = vadd.f32 %v670_v12, %v267_v4  ;;  %v805_v15 = vadd.f32 %v734_v13, %v283_v5  ;;  %v672_v16 = vpop.f32.mrb[7].mxu0  ;;  %v736_v17 = vpop.f32.mrb[7].mxu1 }
 0x11a   : > { %902 = vst.msk [vmem:[%s1431_s23 + $0x80] sm:$0xff] %vm231_vm0, %v870_v11  ;;  %837 = vst.msk [vmem:[#allocation2 + $0x90] sm:$0xff] %vm231_vm0, %v804_v7  ;;  %v855_v18 = vld [vmem:[#allocation2 + $0x8] sm:$0xff]  ;;  %v274_v16 = vld [vmem:[#allocation2 + $0x50] sm:$0xff] }
 0x11b   : > { %v871_v19 = vld [vmem:[#allocation2 + $0x88] sm:$0xff]  ;;  %887 = vst.msk [vmem:[%s1431_s23 + $0x8] sm:$0xff] %vm231_vm0, %v855_v18  ;;  %822 = vst.msk [vmem:[#allocation2 + $0x18] sm:$0xff] %vm231_vm0, %v789_v14  ;;  %v290_v17 = vld [vmem:[#allocation2 + $0xd0] sm:$0xff] }
 0x11c   : > { %903 = vst.msk [vmem:[%s1431_s23 + $0x88] sm:$0xff] %vm231_vm0, %v871_v19  ;;  %838 = vst.msk [vmem:[#allocation2 + $0x98] sm:$0xff] %vm231_vm0, %v805_v15 }
 0x11e   : > { %v675_v22 = vpop.f32.mrb[8].mxu0  ;;  %v739_v23 = vpop.f32.mrb[8].mxu1 }
 0x11f   : > { %v790_v26 = vadd.f32 %v675_v22, %v268_v20  ;;  %v806_v27 = vadd.f32 %v739_v23, %v284_v21  ;;  %v677_v28 = vpop.f32.mrb[9].mxu0  ;;  %v741_v29 = vpop.f32.mrb[9].mxu1  ;;  %v275_v20 = vld [vmem:[#allocation2 + $0x58] sm:$0xff] }
 0x120   : > { %v856_v30 = vld [vmem:[#allocation2 + $0x10] sm:$0xff]  ;;  %v678_v32 = vpop.f32.mrb[10].mxu0  ;;  %v742_v33 = vpop.f32.mrb[10].mxu1  ;;  %v291_v21 = vld [vmem:[#allocation2 + $0xd8] sm:$0xff] }
 0x121   : > { %v872_v31 = vld [vmem:[#allocation2 + $0x90] sm:$0xff]  ;;  %888 = vst.msk [vmem:[%s1431_s23 + $0x10] sm:$0xff] %vm231_vm0, %v856_v30  ;;  %823 = vst.msk [vmem:[#allocation2 + $0x20] sm:$0xff] %vm231_vm0, %v790_v26  ;;  %v791_v34 = vadd.f32 %v678_v32, %v269_v24  ;;  %v807_v35 = vadd.f32 %v742_v33, %v285_v25  ;;  %v680_v36 = vpop.f32.mrb[11].mxu0  ;;  %v744_v37 = vpop.f32.mrb[11].mxu1 }
 0x122   : > { %904 = vst.msk [vmem:[%s1431_s23 + $0x90] sm:$0xff] %vm231_vm0, %v872_v31  ;;  %839 = vst.msk [vmem:[#allocation2 + $0xa0] sm:$0xff] %vm231_vm0, %v806_v27  ;;  %v857_v38 = vld [vmem:[#allocation2 + $0x18] sm:$0xff]  ;;  %v276_v36 = vld [vmem:[#allocation2 + $0x60] sm:$0xff] }
 0x123   : > { %v873_v39 = vld [vmem:[#allocation2 + $0x98] sm:$0xff]  ;;  %889 = vst.msk [vmem:[%s1431_s23 + $0x18] sm:$0xff] %vm231_vm0, %v857_v38  ;;  %824 = vst.msk [vmem:[#allocation2 + $0x28] sm:$0xff] %vm231_vm0, %v791_v34  ;;  %v292_v37 = vld [vmem:[#allocation2 + $0xe0] sm:$0xff] }
 0x124   : > { %905 = vst.msk [vmem:[%s1431_s23 + $0x98] sm:$0xff] %vm231_vm0, %v873_v39  ;;  %840 = vst.msk [vmem:[#allocation2 + $0xa8] sm:$0xff] %vm231_vm0, %v807_v35 }
 0x126   : > { %v683_v42 = vpop.f32.mrb[12].mxu0  ;;  %v747_v43 = vpop.f32.mrb[12].mxu1 }
 0x127   : > { %v792_v46 = vadd.f32 %v683_v42, %v270_v40  ;;  %v808_v47 = vadd.f32 %v747_v43, %v286_v41  ;;  %v685_v48 = vpop.f32.mrb[13].mxu0  ;;  %v749_v49 = vpop.f32.mrb[13].mxu1  ;;  %v277_v40 = vld [vmem:[#allocation2 + $0x68] sm:$0xff] }
 0x128   : > { %v858_v50 = vld [vmem:[#allocation2 + $0x20] sm:$0xff]  ;;  %v686_v52 = vpop.f32.mrb[14].mxu0  ;;  %v750_v53 = vpop.f32.mrb[14].mxu1  ;;  %v293_v41 = vld [vmem:[#allocation2 + $0xe8] sm:$0xff] }
 0x129   : > { %v874_v51 = vld [vmem:[#allocation2 + $0xa0] sm:$0xff]  ;;  %890 = vst.msk [vmem:[%s1431_s23 + $0x20] sm:$0xff] %vm231_vm0, %v858_v50  ;;  %825 = vst.msk [vmem:[#allocation2 + $0x30] sm:$0xff] %vm231_vm0, %v792_v46  ;;  %v793_v54 = vadd.f32 %v686_v52, %v271_v44  ;;  %v809_v55 = vadd.f32 %v750_v53, %v287_v45  ;;  %v688_v56 = vpop.f32.mrb[15].mxu0  ;;  %v752_v57 = vpop.f32.mrb[15].mxu1 }
 0x12a   : > { %906 = vst.msk [vmem:[%s1431_s23 + $0xa0] sm:$0xff] %vm231_vm0, %v874_v51  ;;  %841 = vst.msk [vmem:[#allocation2 + $0xb0] sm:$0xff] %vm231_vm0, %v808_v47  ;;  %v859_v58 = vld [vmem:[#allocation2 + $0x28] sm:$0xff]  ;;  %v278_v56 = vld [vmem:[#allocation2 + $0x70] sm:$0xff] }
 0x12b   : > { %v875_v59 = vld [vmem:[#allocation2 + $0xa8] sm:$0xff]  ;;  %891 = vst.msk [vmem:[%s1431_s23 + $0x28] sm:$0xff] %vm231_vm0, %v859_v58  ;;  %826 = vst.msk [vmem:[#allocation2 + $0x38] sm:$0xff] %vm231_vm0, %v793_v54  ;;  %v294_v57 = vld [vmem:[#allocation2 + $0xf0] sm:$0xff] }
 0x12c   : > { %907 = vst.msk [vmem:[%s1431_s23 + $0xa8] sm:$0xff] %vm231_vm0, %v875_v59  ;;  %842 = vst.msk [vmem:[#allocation2 + $0xb8] sm:$0xff] %vm231_vm0, %v809_v55 }
 0x12e   : > { %v691_v62 = vpop.f32.mrb[16].mxu0  ;;  %v755_v63 = vpop.f32.mrb[16].mxu1 }
 0x12f   : > { %v794_v2 = vadd.f32 %v691_v62, %v272_v60  ;;  %v810_v3 = vadd.f32 %v755_v63, %v288_v61  ;;  %v693_v4 = vpop.f32.mrb[17].mxu0  ;;  %v757_v5 = vpop.f32.mrb[17].mxu1  ;;  %v279_v60 = vld [vmem:[#allocation2 + $0x78] sm:$0xff] }
 0x130   : > { %v860_v6 = vld [vmem:[#allocation2 + $0x30] sm:$0xff]  ;;  %v694_v8 = vpop.f32.mrb[18].mxu0  ;;  %v758_v9 = vpop.f32.mrb[18].mxu1  ;;  %v295_v61 = vld [vmem:[#allocation2 + $0xf8] sm:$0xff] }
 0x131   : > { %v876_v7 = vld [vmem:[#allocation2 + $0xb0] sm:$0xff]  ;;  %892 = vst.msk [vmem:[%s1431_s23 + $0x30] sm:$0xff] %vm231_vm0, %v860_v6  ;;  %827 = vst.msk [vmem:[#allocation2 + $0x40] sm:$0xff] %vm231_vm0, %v794_v2  ;;  %v795_v10 = vadd.f32 %v694_v8, %v273_v0  ;;  %v811_v11 = vadd.f32 %v758_v9, %v289_v1  ;;  %v696_v12 = vpop.f32.mrb[19].mxu0  ;;  %v760_v13 = vpop.f32.mrb[19].mxu1 }
 0x132   : > { %908 = vst.msk [vmem:[%s1431_s23 + $0xb0] sm:$0xff] %vm231_vm0, %v876_v7  ;;  %843 = vst.msk [vmem:[#allocation2 + $0xc0] sm:$0xff] %vm231_vm0, %v810_v3  ;;  %v861_v14 = vld [vmem:[#allocation2 + $0x38] sm:$0xff] }
 0x133   : > { %v877_v15 = vld [vmem:[#allocation2 + $0xb8] sm:$0xff]  ;;  %893 = vst.msk [vmem:[%s1431_s23 + $0x38] sm:$0xff] %vm231_vm0, %v861_v14  ;;  %828 = vst.msk [vmem:[#allocation2 + $0x48] sm:$0xff] %vm231_vm0, %v795_v10 }
 0x134   : > { %909 = vst.msk [vmem:[%s1431_s23 + $0xb8] sm:$0xff] %vm231_vm0, %v877_v15  ;;  %844 = vst.msk [vmem:[#allocation2 + $0xc8] sm:$0xff] %vm231_vm0, %v811_v11 }
 0x136   : > { %v699_v18 = vpop.f32.mrb[20].mxu0  ;;  %v763_v19 = vpop.f32.mrb[20].mxu1 }
 0x137   : > { %v796_v22 = vadd.f32 %v699_v18, %v274_v16  ;;  %v812_v23 = vadd.f32 %v763_v19, %v290_v17  ;;  %v701_v24 = vpop.f32.mrb[21].mxu0  ;;  %v765_v25 = vpop.f32.mrb[21].mxu1 }
 0x138   : > { %v862_v26 = vld [vmem:[#allocation2 + $0x40] sm:$0xff]  ;;  %v702_v28 = vpop.f32.mrb[22].mxu0  ;;  %v766_v29 = vpop.f32.mrb[22].mxu1 }
 0x139   : > { %v878_v27 = vld [vmem:[#allocation2 + $0xc0] sm:$0xff]  ;;  %894 = vst.msk [vmem:[%s1431_s23 + $0x40] sm:$0xff] %vm231_vm0, %v862_v26  ;;  %829 = vst.msk [vmem:[#allocation2 + $0x50] sm:$0xff] %vm231_vm0, %v796_v22  ;;  %v797_v30 = vadd.f32 %v702_v28, %v275_v20  ;;  %v813_v31 = vadd.f32 %v766_v29, %v291_v21  ;;  %v704_v32 = vpop.f32.mrb[23].mxu0  ;;  %v768_v33 = vpop.f32.mrb[23].mxu1 }
 0x13a   : > { %910 = vst.msk [vmem:[%s1431_s23 + $0xc0] sm:$0xff] %vm231_vm0, %v878_v27  ;;  %845 = vst.msk [vmem:[#allocation2 + $0xd0] sm:$0xff] %vm231_vm0, %v812_v23  ;;  %v863_v34 = vld [vmem:[#allocation2 + $0x48] sm:$0xff] }
 0x13b   : > { %v879_v35 = vld [vmem:[#allocation2 + $0xc8] sm:$0xff]  ;;  %895 = vst.msk [vmem:[%s1431_s23 + $0x48] sm:$0xff] %vm231_vm0, %v863_v34  ;;  %830 = vst.msk [vmem:[#allocation2 + $0x58] sm:$0xff] %vm231_vm0, %v797_v30 }
 0x13c   : > { %911 = vst.msk [vmem:[%s1431_s23 + $0xc8] sm:$0xff] %vm231_vm0, %v879_v35  ;;  %846 = vst.msk [vmem:[#allocation2 + $0xd8] sm:$0xff] %vm231_vm0, %v813_v31 }
 0x13e   : > { %v707_v38 = vpop.f32.mrb[24].mxu0  ;;  %v771_v39 = vpop.f32.mrb[24].mxu1 }
 0x13f   : > { %v798_v42 = vadd.f32 %v707_v38, %v276_v36  ;;  %v814_v43 = vadd.f32 %v771_v39, %v292_v37  ;;  %v709_v44 = vpop.f32.mrb[25].mxu0  ;;  %v773_v45 = vpop.f32.mrb[25].mxu1 }
 0x140   : > { %v864_v46 = vld [vmem:[#allocation2 + $0x50] sm:$0xff]  ;;  %v710_v48 = vpop.f32.mrb[26].mxu0  ;;  %v774_v49 = vpop.f32.mrb[26].mxu1 }
 0x141   : > { %v880_v47 = vld [vmem:[#allocation2 + $0xd0] sm:$0xff]  ;;  %896 = vst.msk [vmem:[%s1431_s23 + $0x50] sm:$0xff] %vm231_vm0, %v864_v46  ;;  %831 = vst.msk [vmem:[#allocation2 + $0x60] sm:$0xff] %vm231_vm0, %v798_v42  ;;  %v799_v50 = vadd.f32 %v710_v48, %v277_v40  ;;  %v815_v51 = vadd.f32 %v774_v49, %v293_v41  ;;  %v712_v52 = vpop.f32.mrb[27].mxu0  ;;  %v776_v53 = vpop.f32.mrb[27].mxu1 }
 0x142   : > { %912 = vst.msk [vmem:[%s1431_s23 + $0xd0] sm:$0xff] %vm231_vm0, %v880_v47  ;;  %847 = vst.msk [vmem:[#allocation2 + $0xe0] sm:$0xff] %vm231_vm0, %v814_v43  ;;  %v865_v54 = vld [vmem:[#allocation2 + $0x58] sm:$0xff] }
 0x143   : > { %v881_v55 = vld [vmem:[#allocation2 + $0xd8] sm:$0xff]  ;;  %897 = vst.msk [vmem:[%s1431_s23 + $0x58] sm:$0xff] %vm231_vm0, %v865_v54  ;;  %832 = vst.msk [vmem:[#allocation2 + $0x68] sm:$0xff] %vm231_vm0, %v799_v50 }
 0x144   : > { %913 = vst.msk [vmem:[%s1431_s23 + $0xd8] sm:$0xff] %vm231_vm0, %v881_v55  ;;  %848 = vst.msk [vmem:[#allocation2 + $0xe8] sm:$0xff] %vm231_vm0, %v815_v51 }
 0x146   : > { %v715_v58 = vpop.f32.mrb[28].mxu0  ;;  %v779_v59 = vpop.f32.mrb[28].mxu1 }
 0x147   : > { %v800_v62 = vadd.f32 %v715_v58, %v278_v56  ;;  %v816_v63 = vadd.f32 %v779_v59, %v294_v57  ;;  %v717_v0 = vpop.f32.mrb[29].mxu0  ;;  %v781_v1 = vpop.f32.mrb[29].mxu1 }
 0x148   : > { %v866_v2 = vld [vmem:[#allocation2 + $0x60] sm:$0xff]  ;;  %v718_v4 = vpop.f32.mrb[30].mxu0  ;;  %v782_v5 = vpop.f32.mrb[30].mxu1 }
 0x149   : > { %v882_v3 = vld [vmem:[#allocation2 + $0xe0] sm:$0xff]  ;;  %898 = vst.msk [vmem:[%s1431_s23 + $0x60] sm:$0xff] %vm231_vm0, %v866_v2  ;;  %833 = vst.msk [vmem:[#allocation2 + $0x70] sm:$0xff] %vm231_vm0, %v800_v62  ;;  %v801_v6 = vadd.f32 %v718_v4, %v279_v60  ;;  %v817_v7 = vadd.f32 %v782_v5, %v295_v61  ;;  %v720_v8 = vpop.f32.mrb[31].mxu0  ;;  %v784_v9 = vpop.f32.mrb[31].mxu1 }
 0x14a   : > { %914 = vst.msk [vmem:[%s1431_s23 + $0xe0] sm:$0xff] %vm231_vm0, %v882_v3  ;;  %849 = vst.msk [vmem:[#allocation2 + $0xf0] sm:$0xff] %vm231_vm0, %v816_v63  ;;  %v867_v10 = vld [vmem:[#allocation2 + $0x68] sm:$0xff] }
 0x14b   : > { %v883_v11 = vld [vmem:[#allocation2 + $0xe8] sm:$0xff]  ;;  %899 = vst.msk [vmem:[%s1431_s23 + $0x68] sm:$0xff] %vm231_vm0, %v867_v10  ;;  %834 = vst.msk [vmem:[#allocation2 + $0x78] sm:$0xff] %vm231_vm0, %v801_v6 }
 0x14c   : > { %915 = vst.msk [vmem:[%s1431_s23 + $0xe8] sm:$0xff] %vm231_vm0, %v883_v11  ;;  %850 = vst.msk [vmem:[#allocation2 + $0xf8] sm:$0xff] %vm231_vm0, %v817_v7 }
 0x150   : > { %v868_v12 = vld [vmem:[#allocation2 + $0x70] sm:$0xff] }
 0x151   : > { %v884_v13 = vld [vmem:[#allocation2 + $0xf0] sm:$0xff]  ;;  %900 = vst.msk [vmem:[%s1431_s23 + $0x70] sm:$0xff] %vm231_vm0, %v868_v12 }
 0x152   : > { %916 = vst.msk [vmem:[%s1431_s23 + $0xf0] sm:$0xff] %vm231_vm0, %v884_v13  ;;  %v869_v14 = vld [vmem:[#allocation2 + $0x78] sm:$0xff] }
 0x153   : > { %v885_v15 = vld [vmem:[#allocation2 + $0xf8] sm:$0xff]  ;;  %901 = vst.msk [vmem:[%s1431_s23 + $0x78] sm:$0xff] %vm231_vm0, %v869_v14 }
 0x154   : > { %917 = vst.msk [vmem:[%s1431_s23 + $0xf8] sm:$0xff] %vm231_vm0, %v885_v15 }
 0x155 PF: > { %s12_s11 = sadd.s32 1, %s1230_s11   ;;  %s1537_s9 = smov %s1226_s10 }
 0x156   : > { %p9_p5 = scmp.ge.s32.totalorder %s12_s11, 4   ;;  %s1538_s10 = smov %s1540_s12 }
 0x158   :  { %11 = sbr.rel (!%p9_p5) target bundleno = 2 (0x2), region = 69 }

// kernel: ftgan_encoder_forward.11
= control target key start
LH: loop header
LB: loop body
LE: loop exit
PB: predicated region body
PF: predicated region fallthrough
CT: control target
= control target key end

     0   :  { %vm540_vm0 = vcmask 60416   ;;  %s1345_s0 = inlined_call_operand.vmem [shape: f32[512,8], index: 0, kind: input, shape index: {}]   ;;  %s1346_s1 = inlined_call_operand.vmem [shape: f32[1,8], index: 1, kind: input, shape index: {}]   ;;  %s1347_s2 = inlined_call_operand.vmem [shape: f32[1,8], index: 2, kind: input, shape index: {}]   ;;  %s1348_s3 = inlined_call_operand.vmem [shape: bf16[512,8], index: 3, kind: output, shape index: {}]  }
   0x1   :  { %v14_v0 = vld [vmem:[%s1345_s0] sm:$0xff]  ;;  %v15_v4 = vld [vmem:[%s1345_s0 + $0x8] sm:$0xff]  ;;  %v16_v5 = vld [vmem:[%s1345_s0 + $0x10] sm:$0xff] }
   0x2   :  { %v765_v1 = vld [vmem:[%s1346_s1] ss:$0 sm:$0xff]  ;;  %v17_v6 = vld [vmem:[%s1345_s0 + $0x18] sm:$0xff]  ;;  %v19_v11 = vld [vmem:[%s1345_s0 + $0x28] sm:$0xff] }
   0x3   :  { %v770_v2 = vld [vmem:[%s1347_s2] ss:$0 sm:$0xff]  ;;  %v85_v3 = vmul.f32 %v765_v1, %v14_v0  ;;  %v86_v7 = vmul.f32 %v765_v1, %v15_v4  ;;  %v87_v8 = vmul.f32 %v765_v1, %v16_v5  ;;  %v88_v9 = vmul.f32 %v765_v1, %v17_v6  ;;  %v20_v12 = vld [vmem:[%s1345_s0 + $0x30] sm:$0xff]  ;;  %v21_v17 = vld [vmem:[%s1345_s0 + $0x38] sm:$0xff] }
   0x4   :  { %v18_v10 = vld [vmem:[%s1345_s0 + $0x20] sm:$0xff]  ;;  %v90_v15 = vmul.f32 %v765_v1, %v19_v11  ;;  %v91_v16 = vmul.f32 %v765_v1, %v20_v12  ;;  %v92_v21 = vmul.f32 %v765_v1, %v21_v17  ;;  %v23_v35 = vld [vmem:[%s1345_s0 + $0x48] sm:$0xff]  ;;  %v24_v36 = vld [vmem:[%s1345_s0 + $0x50] sm:$0xff] }
   0x5   :  { %v156_v13 = vadd.f32 %v770_v2, %v85_v3  ;;  %v89_v14 = vmul.f32 %v765_v1, %v18_v10  ;;  %v157_v18 = vadd.f32 %v770_v2, %v86_v7  ;;  %v158_v19 = vadd.f32 %v770_v2, %v87_v8  ;;  %v22_v30 = vld [vmem:[%s1345_s0 + $0x40] sm:$0xff]  ;;  %v25_v37 = vld [vmem:[%s1345_s0 + $0x58] sm:$0xff]  ;;  %v27_v43 = vld [vmem:[%s1345_s0 + $0x68] sm:$0xff] }
   0x6   :  { %v159_v20 = vadd.f32 %v770_v2, %v88_v9  ;;  %v161_v24 = vadd.f32 %v770_v2, %v90_v15  ;;  %v162_v25 = vadd.f32 %v770_v2, %v91_v16  ;;  %v163_v29 = vadd.f32 %v770_v2, %v92_v21  ;;  %v26_v42 = vld [vmem:[%s1345_s0 + $0x60] sm:$0xff]  ;;  %v28_v44 = vld [vmem:[%s1345_s0 + $0x70] sm:$0xff]  ;;  %v29_v49 = vld [vmem:[%s1345_s0 + $0x78] sm:$0xff] }
   0x7   :  { %v220_v22 = vmax.f32 %v156_v13, 0.0  ;;  %v160_v23 = vadd.f32 %v770_v2, %v89_v14  ;;  %v221_v26 = vmax.f32 %v157_v18, 0.0  ;;  %v222_v27 = vmax.f32 %v158_v19, 0.0  ;;  %v30_v8 = vld [vmem:[%s1345_s0 + $0x80] sm:$0xff]  ;;  %v31_v13 = vld [vmem:[%s1345_s0 + $0x88] sm:$0xff]  ;;  %v32_v14 = vld [vmem:[%s1345_s0 + $0x90] sm:$0xff] }
   0x8   :  { %v223_v28 = vmax.f32 %v159_v20, 0.0  ;;  %v225_v33 = vmax.f32 %v161_v24, 0.0  ;;  %v226_v34 = vmax.f32 %v162_v25, 0.0  ;;  %v227_v41 = vmax.f32 %v163_v29, 0.0  ;;  %v33_v15 = vld [vmem:[%s1345_s0 + $0x98] sm:$0xff]  ;;  %v34_v20 = vld [vmem:[%s1345_s0 + $0xa0] sm:$0xff] }
   0x9   :  { %v675_v31 = vpack.c.bf16 %v220_v22, %v220_v22  ;;  %v224_v32 = vmax.f32 %v160_v23, 0.0  ;;  %v676_v38 = vpack.c.bf16 %v221_v26, %v221_v26  ;;  %v677_v39 = vpack.c.bf16 %v222_v27, %v222_v27  ;;  %v35_v21 = vld [vmem:[%s1345_s0 + $0xa8] sm:$0xff]  ;;  %v36_v22 = vld [vmem:[%s1345_s0 + $0xb0] sm:$0xff]  ;;  %v37_v27 = vld [vmem:[%s1345_s0 + $0xb8] sm:$0xff] }
   0xa   :  { %v678_v40 = vpack.c.bf16 %v223_v28, %v223_v28  ;;  %v680_v46 = vpack.c.bf16 %v225_v33, %v225_v33  ;;  %v681_v47 = vpack.c.bf16 %v226_v34, %v226_v34  ;;  %v93_v48 = vmul.f32 %v765_v1, %v22_v30 }
   0xb   :  { %541 = vst.msk [vmem:[%s1348_s3] sm:$0xf] %vm540_vm0, %v675_v31  ;;  %v679_v45 = vpack.c.bf16 %v224_v32, %v224_v32  ;;  %542 = vst.msk [vmem:[%s1348_s3 + $0x4] sm:$0xf] %vm540_vm0, %v676_v38  ;;  %v682_v50 = vpack.c.bf16 %v227_v41, %v227_v41  ;;  %v94_v51 = vmul.f32 %v765_v1, %v23_v35 }
   0xc   :  { %543 = vst.msk [vmem:[%s1348_s3 + $0x8] sm:$0xf] %vm540_vm0, %v677_v39  ;;  %544 = vst.msk [vmem:[%s1348_s3 + $0xc] sm:$0xf] %vm540_vm0, %v678_v40  ;;  %v95_v52 = vmul.f32 %v765_v1, %v24_v36  ;;  %v96_v53 = vmul.f32 %v765_v1, %v25_v37  ;;  %v164_v54 = vadd.f32 %v770_v2, %v93_v48  ;;  %v38_v48 = vld [vmem:[%s1345_s0 + $0xc0] sm:$0xff] }
   0xd   :  { %545 = vst.msk [vmem:[%s1348_s3 + $0x10] sm:$0xf] %vm540_vm0, %v679_v45  ;;  %546 = vst.msk [vmem:[%s1348_s3 + $0x14] sm:$0xf] %vm540_vm0, %v680_v46  ;;  %v97_v55 = vmul.f32 %v765_v1, %v26_v42  ;;  %v98_v56 = vmul.f32 %v765_v1, %v27_v43  ;;  %v99_v57 = vmul.f32 %v765_v1, %v28_v44 }
   0xe   :  { %547 = vst.msk [vmem:[%s1348_s3 + $0x18] sm:$0xf] %vm540_vm0, %v681_v47  ;;  %548 = vst.msk [vmem:[%s1348_s3 + $0x1c] sm:$0xf] %vm540_vm0, %v682_v50  ;;  %v165_v58 = vadd.f32 %v770_v2, %v94_v51  ;;  %v166_v59 = vadd.f32 %v770_v2, %v95_v52  ;;  %v167_v60 = vadd.f32 %v770_v2, %v96_v53  ;;  %v228_v62 = vmax.f32 %v164_v54, 0.0  ;;  %v39_v53 = vld [vmem:[%s1345_s0 + $0xc8] sm:$0xff] }
   0xf   :  { %v100_v61 = vmul.f32 %v765_v1, %v29_v49  ;;  %v168_v63 = vadd.f32 %v770_v2, %v97_v55  ;;  %v169_v0 = vadd.f32 %v770_v2, %v98_v56  ;;  %v170_v3 = vadd.f32 %v770_v2, %v99_v57  ;;  %v40_v54 = vld [vmem:[%s1345_s0 + $0xd0] sm:$0xff]  ;;  %v41_v55 = vld [vmem:[%s1345_s0 + $0xd8] sm:$0xff] }
  0x10   :  { %v229_v4 = vmax.f32 %v165_v58, 0.0  ;;  %v230_v5 = vmax.f32 %v166_v59, 0.0  ;;  %v231_v6 = vmax.f32 %v167_v60, 0.0  ;;  %v683_v9 = vpack.c.bf16 %v228_v62, %v228_v62  ;;  %v42_v60 = vld [vmem:[%s1345_s0 + $0xe0] sm:$0xff]  ;;  %v44_v62 = vld [vmem:[%s1345_s0 + $0xf0] sm:$0xff] }
  0x11   :  { %v171_v7 = vadd.f32 %v770_v2, %v100_v61  ;;  %v232_v10 = vmax.f32 %v168_v63, 0.0  ;;  %v233_v11 = vmax.f32 %v169_v0, 0.0  ;;  %v234_v12 = vmax.f32 %v170_v3, 0.0  ;;  %v43_v61 = vld [vmem:[%s1345_s0 + $0xe8] sm:$0xff] }
  0x12   :  { %v684_v16 = vpack.c.bf16 %v229_v4, %v229_v4  ;;  %v685_v17 = vpack.c.bf16 %v230_v5, %v230_v5  ;;  %v686_v18 = vpack.c.bf16 %v231_v6, %v231_v6  ;;  %549 = vst.msk [vmem:[%s1348_s3 + $0x20] sm:$0xf] %vm540_vm0, %v683_v9  ;;  %v101_v26 = vmul.f32 %v765_v1, %v30_v8  ;;  %v45_v5 = vld [vmem:[%s1345_s0 + $0xf8] sm:$0xff] }
  0x13   :  { %v235_v19 = vmax.f32 %v171_v7, 0.0  ;;  %v687_v23 = vpack.c.bf16 %v232_v10, %v232_v10  ;;  %v688_v24 = vpack.c.bf16 %v233_v11, %v233_v11  ;;  %v689_v25 = vpack.c.bf16 %v234_v12, %v234_v12 }
  0x14   :  { %550 = vst.msk [vmem:[%s1348_s3 + $0x24] sm:$0xf] %vm540_vm0, %v684_v16  ;;  %551 = vst.msk [vmem:[%s1348_s3 + $0x28] sm:$0xf] %vm540_vm0, %v685_v17  ;;  %v102_v29 = vmul.f32 %v765_v1, %v31_v13  ;;  %v103_v30 = vmul.f32 %v765_v1, %v32_v14  ;;  %v104_v31 = vmul.f32 %v765_v1, %v33_v15 }
  0x15   :  { %552 = vst.msk [vmem:[%s1348_s3 + $0x2c] sm:$0xf] %vm540_vm0, %v686_v18  ;;  %v690_v28 = vpack.c.bf16 %v235_v19, %v235_v19  ;;  %553 = vst.msk [vmem:[%s1348_s3 + $0x30] sm:$0xf] %vm540_vm0, %v687_v23  ;;  %v172_v32 = vadd.f32 %v770_v2, %v101_v26  ;;  %v105_v33 = vmul.f32 %v765_v1, %v34_v20  ;;  %v46_v26 = vld [vmem:[%s1345_s0 + $0x100] sm:$0xff] }
  0x16   :  { %554 = vst.msk [vmem:[%s1348_s3 + $0x34] sm:$0xf] %vm540_vm0, %v688_v24  ;;  %555 = vst.msk [vmem:[%s1348_s3 + $0x38] sm:$0xf] %vm540_vm0, %v689_v25  ;;  %v106_v34 = vmul.f32 %v765_v1, %v35_v21  ;;  %v107_v35 = vmul.f32 %v765_v1, %v36_v22  ;;  %v173_v36 = vadd.f32 %v770_v2, %v102_v29 }
  0x17   :  { %556 = vst.msk [vmem:[%s1348_s3 + $0x3c] sm:$0xf] %vm540_vm0, %v690_v28  ;;  %v174_v37 = vadd.f32 %v770_v2, %v103_v30  ;;  %v175_v38 = vadd.f32 %v770_v2, %v104_v31  ;;  %v108_v39 = vmul.f32 %v765_v1, %v37_v27  ;;  %v236_v40 = vmax.f32 %v172_v32, 0.0  ;;  %v47_v31 = vld [vmem:[%s1345_s0 + $0x108] sm:$0xff]  ;;  %v48_v32 = vld [vmem:[%s1345_s0 + $0x110] sm:$0xff] }
  0x18   :  { %v176_v41 = vadd.f32 %v770_v2, %v105_v33  ;;  %v177_v42 = vadd.f32 %v770_v2, %v106_v34  ;;  %v178_v43 = vadd.f32 %v770_v2, %v107_v35  ;;  %v237_v44 = vmax.f32 %v173_v36, 0.0  ;;  %v49_v33 = vld [vmem:[%s1345_s0 + $0x118] sm:$0xff] }
  0x19   :  { %v238_v45 = vmax.f32 %v174_v37, 0.0  ;;  %v239_v46 = vmax.f32 %v175_v38, 0.0  ;;  %v179_v47 = vadd.f32 %v770_v2, %v108_v39  ;;  %v691_v49 = vpack.c.bf16 %v236_v40, %v236_v40  ;;  %v50_v38 = vld [vmem:[%s1345_s0 + $0x120] sm:$0xff]  ;;  %v51_v39 = vld [vmem:[%s1345_s0 + $0x128] sm:$0xff]  ;;  %v52_v40 = vld [vmem:[%s1345_s0 + $0x130] sm:$0xff] }
  0x1a   :  { %v240_v50 = vmax.f32 %v176_v41, 0.0  ;;  %v241_v51 = vmax.f32 %v177_v42, 0.0  ;;  %v242_v52 = vmax.f32 %v178_v43, 0.0  ;;  %v692_v56 = vpack.c.bf16 %v237_v44, %v237_v44 }
  0x1b   :  { %v693_v57 = vpack.c.bf16 %v238_v45, %v238_v45  ;;  %v694_v58 = vpack.c.bf16 %v239_v46, %v239_v46  ;;  %v243_v59 = vmax.f32 %v179_v47, 0.0  ;;  %557 = vst.msk [vmem:[%s1348_s3 + $0x40] sm:$0xf] %vm540_vm0, %v691_v49  ;;  %v109_v4 = vmul.f32 %v765_v1, %v38_v48  ;;  %v53_v45 = vld [vmem:[%s1345_s0 + $0x138] sm:$0xff] }
  0x1c   :  { %v695_v63 = vpack.c.bf16 %v240_v50, %v240_v50  ;;  %v696_v0 = vpack.c.bf16 %v241_v51, %v241_v51  ;;  %v697_v3 = vpack.c.bf16 %v242_v52, %v242_v52  ;;  %558 = vst.msk [vmem:[%s1348_s3 + $0x44] sm:$0xf] %vm540_vm0, %v692_v56  ;;  %v110_v7 = vmul.f32 %v765_v1, %v39_v53 }
  0x1d   :  { %559 = vst.msk [vmem:[%s1348_s3 + $0x48] sm:$0xf] %vm540_vm0, %v693_v57  ;;  %560 = vst.msk [vmem:[%s1348_s3 + $0x4c] sm:$0xf] %vm540_vm0, %v694_v58  ;;  %v698_v6 = vpack.c.bf16 %v243_v59, %v243_v59  ;;  %v111_v8 = vmul.f32 %v765_v1, %v40_v54  ;;  %v112_v9 = vmul.f32 %v765_v1, %v41_v55 }
  0x1e   :  { %561 = vst.msk [vmem:[%s1348_s3 + $0x50] sm:$0xf] %vm540_vm0, %v695_v63  ;;  %562 = vst.msk [vmem:[%s1348_s3 + $0x54] sm:$0xf] %vm540_vm0, %v696_v0  ;;  %v180_v10 = vadd.f32 %v770_v2, %v109_v4  ;;  %v113_v11 = vmul.f32 %v765_v1, %v42_v60  ;;  %v114_v12 = vmul.f32 %v765_v1, %v43_v61  ;;  %v54_v4 = vld [vmem:[%s1345_s0 + $0x140] sm:$0xff] }
  0x1f   :  { %563 = vst.msk [vmem:[%s1348_s3 + $0x58] sm:$0xf] %vm540_vm0, %v697_v3  ;;  %v115_v13 = vmul.f32 %v765_v1, %v44_v62  ;;  %564 = vst.msk [vmem:[%s1348_s3 + $0x5c] sm:$0xf] %vm540_vm0, %v698_v6  ;;  %v181_v14 = vadd.f32 %v770_v2, %v110_v7  ;;  %v182_v15 = vadd.f32 %v770_v2, %v111_v8 }
  0x20   :  { %v183_v16 = vadd.f32 %v770_v2, %v112_v9  ;;  %v116_v17 = vmul.f32 %v765_v1, %v45_v5  ;;  %v244_v18 = vmax.f32 %v180_v10, 0.0  ;;  %v184_v19 = vadd.f32 %v770_v2, %v113_v11  ;;  %v55_v9 = vld [vmem:[%s1345_s0 + $0x148] sm:$0xff]  ;;  %v56_v10 = vld [vmem:[%s1345_s0 + $0x150] sm:$0xff]  ;;  %v57_v11 = vld [vmem:[%s1345_s0 + $0x158] sm:$0xff] }
  0x21   :  { %v185_v20 = vadd.f32 %v770_v2, %v114_v12  ;;  %v186_v21 = vadd.f32 %v770_v2, %v115_v13  ;;  %v245_v22 = vmax.f32 %v181_v14, 0.0  ;;  %v246_v23 = vmax.f32 %v182_v15, 0.0 }
  0x22   :  { %v247_v24 = vmax.f32 %v183_v16, 0.0  ;;  %v187_v25 = vadd.f32 %v770_v2, %v116_v17  ;;  %v699_v27 = vpack.c.bf16 %v244_v18, %v244_v18  ;;  %v248_v28 = vmax.f32 %v184_v19, 0.0  ;;  %v58_v16 = vld [vmem:[%s1345_s0 + $0x160] sm:$0xff]  ;;  %v59_v17 = vld [vmem:[%s1345_s0 + $0x168] sm:$0xff]  ;;  %v60_v18 = vld [vmem:[%s1345_s0 + $0x170] sm:$0xff] }
  0x23   :  { %v249_v29 = vmax.f32 %v185_v20, 0.0  ;;  %v250_v30 = vmax.f32 %v186_v21, 0.0  ;;  %v700_v34 = vpack.c.bf16 %v245_v22, %v245_v22  ;;  %v701_v35 = vpack.c.bf16 %v246_v23, %v246_v23  ;;  %v61_v23 = vld [vmem:[%s1345_s0 + $0x178] sm:$0xff] }
  0x24   :  { %v702_v36 = vpack.c.bf16 %v247_v24, %v247_v24  ;;  %v251_v37 = vmax.f32 %v187_v25, 0.0  ;;  %565 = vst.msk [vmem:[%s1348_s3 + $0x60] sm:$0xf] %vm540_vm0, %v699_v27  ;;  %v703_v41 = vpack.c.bf16 %v248_v28, %v248_v28  ;;  %v117_v44 = vmul.f32 %v765_v1, %v46_v26 }
  0x25   :  { %v704_v42 = vpack.c.bf16 %v249_v29, %v249_v29  ;;  %v705_v43 = vpack.c.bf16 %v250_v30, %v250_v30  ;;  %566 = vst.msk [vmem:[%s1348_s3 + $0x64] sm:$0xf] %vm540_vm0, %v700_v34  ;;  %567 = vst.msk [vmem:[%s1348_s3 + $0x68] sm:$0xf] %vm540_vm0, %v701_v35  ;;  %v118_v47 = vmul.f32 %v765_v1, %v47_v31 }
  0x26   :  { %568 = vst.msk [vmem:[%s1348_s3 + $0x6c] sm:$0xf] %vm540_vm0, %v702_v36  ;;  %v706_v46 = vpack.c.bf16 %v251_v37, %v251_v37  ;;  %v119_v48 = vmul.f32 %v765_v1, %v48_v32  ;;  %v120_v49 = vmul.f32 %v765_v1, %v49_v33  ;;  %569 = vst.msk [vmem:[%s1348_s3 + $0x70] sm:$0xf] %vm540_vm0, %v703_v41 }
  0x27   :  { %570 = vst.msk [vmem:[%s1348_s3 + $0x74] sm:$0xf] %vm540_vm0, %v704_v42  ;;  %571 = vst.msk [vmem:[%s1348_s3 + $0x78] sm:$0xf] %vm540_vm0, %v705_v43  ;;  %v188_v50 = vadd.f32 %v770_v2, %v117_v44  ;;  %v121_v51 = vmul.f32 %v765_v1, %v50_v38  ;;  %v122_v52 = vmul.f32 %v765_v1, %v51_v39  ;;  %v62_v44 = vld [vmem:[%s1345_s0 + $0x180] sm:$0xff] }
  0x28   :  { %v123_v53 = vmul.f32 %v765_v1, %v52_v40  ;;  %572 = vst.msk [vmem:[%s1348_s3 + $0x7c] sm:$0xf] %vm540_vm0, %v706_v46  ;;  %v189_v54 = vadd.f32 %v770_v2, %v118_v47  ;;  %v190_v55 = vadd.f32 %v770_v2, %v119_v48  ;;  %v191_v56 = vadd.f32 %v770_v2, %v120_v49  ;;  %v63_v49 = vld [vmem:[%s1345_s0 + $0x188] sm:$0xff] }
  0x29   :  { %v124_v57 = vmul.f32 %v765_v1, %v53_v45  ;;  %v252_v58 = vmax.f32 %v188_v50, 0.0  ;;  %v192_v59 = vadd.f32 %v770_v2, %v121_v51  ;;  %v193_v60 = vadd.f32 %v770_v2, %v122_v52  ;;  %v64_v50 = vld [vmem:[%s1345_s0 + $0x190] sm:$0xff]  ;;  %v65_v51 = vld [vmem:[%s1345_s0 + $0x198] sm:$0xff] }
  0x2a   :  { %v194_v61 = vadd.f32 %v770_v2, %v123_v53  ;;  %v253_v62 = vmax.f32 %v189_v54, 0.0  ;;  %v254_v63 = vmax.f32 %v190_v55, 0.0  ;;  %v255_v0 = vmax.f32 %v191_v56, 0.0  ;;  %v66_v56 = vld [vmem:[%s1345_s0 + $0x1a0] sm:$0xff] }
  0x2b   :  { %v195_v3 = vadd.f32 %v770_v2, %v124_v57  ;;  %v707_v5 = vpack.c.bf16 %v252_v58, %v252_v58  ;;  %v256_v6 = vmax.f32 %v192_v59, 0.0  ;;  %v257_v7 = vmax.f32 %v193_v60, 0.0  ;;  %v67_v57 = vld [vmem:[%s1345_s0 + $0x1a8] sm:$0xff]  ;;  %v68_v58 = vld [vmem:[%s1345_s0 + $0x1b0] sm:$0xff] }
  0x2c   :  { %v258_v8 = vmax.f32 %v194_v61, 0.0  ;;  %v708_v12 = vpack.c.bf16 %v253_v62, %v253_v62  ;;  %v709_v13 = vpack.c.bf16 %v254_v63, %v254_v63  ;;  %v710_v14 = vpack.c.bf16 %v255_v0, %v255_v0  ;;  %v69_v63 = vld [vmem:[%s1345_s0 + $0x1b8] sm:$0xff] }
  0x2d   :  { %v259_v15 = vmax.f32 %v195_v3, 0.0  ;;  %573 = vst.msk [vmem:[%s1348_s3 + $0x80] sm:$0xf] %vm540_vm0, %v707_v5  ;;  %v711_v19 = vpack.c.bf16 %v256_v6, %v256_v6  ;;  %v712_v20 = vpack.c.bf16 %v257_v7, %v257_v7  ;;  %v125_v22 = vmul.f32 %v765_v1, %v54_v4 }
  0x2e   :  { %v713_v21 = vpack.c.bf16 %v258_v8, %v258_v8  ;;  %574 = vst.msk [vmem:[%s1348_s3 + $0x84] sm:$0xf] %vm540_vm0, %v708_v12  ;;  %575 = vst.msk [vmem:[%s1348_s3 + $0x88] sm:$0xf] %vm540_vm0, %v709_v13  ;;  %v126_v25 = vmul.f32 %v765_v1, %v55_v9  ;;  %v127_v26 = vmul.f32 %v765_v1, %v56_v10 }
  0x2f   :  { %576 = vst.msk [vmem:[%s1348_s3 + $0x8c] sm:$0xf] %vm540_vm0, %v710_v14  ;;  %v714_v24 = vpack.c.bf16 %v259_v15, %v259_v15  ;;  %v128_v27 = vmul.f32 %v765_v1, %v57_v11  ;;  %577 = vst.msk [vmem:[%s1348_s3 + $0x90] sm:$0xf] %vm540_vm0, %v711_v19  ;;  %v196_v28 = vadd.f32 %v770_v2, %v125_v22  ;;  %v70_v22 = vld [vmem:[%s1345_s0 + $0x1c0] sm:$0xff] }
  0x30   :  { %578 = vst.msk [vmem:[%s1348_s3 + $0x94] sm:$0xf] %vm540_vm0, %v712_v20  ;;  %579 = vst.msk [vmem:[%s1348_s3 + $0x98] sm:$0xf] %vm540_vm0, %v713_v21  ;;  %v129_v29 = vmul.f32 %v765_v1, %v58_v16  ;;  %v130_v30 = vmul.f32 %v765_v1, %v59_v17  ;;  %v131_v31 = vmul.f32 %v765_v1, %v60_v18 }
  0x31   :  { %580 = vst.msk [vmem:[%s1348_s3 + $0x9c] sm:$0xf] %vm540_vm0, %v714_v24  ;;  %v197_v32 = vadd.f32 %v770_v2, %v126_v25  ;;  %v198_v33 = vadd.f32 %v770_v2, %v127_v26  ;;  %v199_v34 = vadd.f32 %v770_v2, %v128_v27  ;;  %v132_v35 = vmul.f32 %v765_v1, %v61_v23  ;;  %v71_v27 = vld [vmem:[%s1345_s0 + $0x1c8] sm:$0xff] }
  0x32   :  { %v260_v36 = vmax.f32 %v196_v28, 0.0  ;;  %v200_v37 = vadd.f32 %v770_v2, %v129_v29  ;;  %v201_v38 = vadd.f32 %v770_v2, %v130_v30  ;;  %v202_v39 = vadd.f32 %v770_v2, %v131_v31  ;;  %v72_v28 = vld [vmem:[%s1345_s0 + $0x1d0] sm:$0xff]  ;;  %v73_v29 = vld [vmem:[%s1345_s0 + $0x1d8] sm:$0xff] }
  0x33   :  { %v261_v40 = vmax.f32 %v197_v32, 0.0  ;;  %v262_v41 = vmax.f32 %v198_v33, 0.0  ;;  %v263_v42 = vmax.f32 %v199_v34, 0.0  ;;  %v203_v43 = vadd.f32 %v770_v2, %v132_v35  ;;  %v74_v34 = vld [vmem:[%s1345_s0 + $0x1e0] sm:$0xff]  ;;  %v75_v35 = vld [vmem:[%s1345_s0 + $0x1e8] sm:$0xff] }
  0x34   :  { %v715_v45 = vpack.c.bf16 %v260_v36, %v260_v36  ;;  %v264_v46 = vmax.f32 %v200_v37, 0.0  ;;  %v265_v47 = vmax.f32 %v201_v38, 0.0  ;;  %v266_v48 = vmax.f32 %v202_v39, 0.0  ;;  %v76_v36 = vld [vmem:[%s1345_s0 + $0x1f0] sm:$0xff] }
  0x35   :  { %v716_v52 = vpack.c.bf16 %v261_v40, %v261_v40  ;;  %v717_v53 = vpack.c.bf16 %v262_v41, %v262_v41  ;;  %v718_v54 = vpack.c.bf16 %v263_v42, %v263_v42  ;;  %v267_v55 = vmax.f32 %v203_v43, 0.0  ;;  %v77_v41 = vld [vmem:[%s1345_s0 + $0x1f8] sm:$0xff] }
  0x36   :  { %581 = vst.msk [vmem:[%s1348_s3 + $0xa0] sm:$0xf] %vm540_vm0, %v715_v45  ;;  %v719_v59 = vpack.c.bf16 %v264_v46, %v264_v46  ;;  %v720_v60 = vpack.c.bf16 %v265_v47, %v265_v47  ;;  %v721_v61 = vpack.c.bf16 %v266_v48, %v266_v48  ;;  %v133_v62 = vmul.f32 %v765_v1, %v62_v44 }
  0x37   :  { %582 = vst.msk [vmem:[%s1348_s3 + $0xa4] sm:$0xf] %vm540_vm0, %v716_v52  ;;  %583 = vst.msk [vmem:[%s1348_s3 + $0xa8] sm:$0xf] %vm540_vm0, %v717_v53  ;;  %v722_v0 = vpack.c.bf16 %v267_v55, %v267_v55  ;;  %v134_v3 = vmul.f32 %v765_v1, %v63_v49  ;;  %v135_v4 = vmul.f32 %v765_v1, %v64_v50 }
  0x38   :  { %584 = vst.msk [vmem:[%s1348_s3 + $0xac] sm:$0xf] %vm540_vm0, %v718_v54  ;;  %v136_v5 = vmul.f32 %v765_v1, %v65_v51  ;;  %585 = vst.msk [vmem:[%s1348_s3 + $0xb0] sm:$0xf] %vm540_vm0, %v719_v59  ;;  %v204_v6 = vadd.f32 %v770_v2, %v133_v62  ;;  %v137_v7 = vmul.f32 %v765_v1, %v66_v56 }
  0x39   :  { %586 = vst.msk [vmem:[%s1348_s3 + $0xb4] sm:$0xf] %vm540_vm0, %v720_v60  ;;  %587 = vst.msk [vmem:[%s1348_s3 + $0xb8] sm:$0xf] %vm540_vm0, %v721_v61  ;;  %v138_v8 = vmul.f32 %v765_v1, %v67_v57  ;;  %v139_v9 = vmul.f32 %v765_v1, %v68_v58  ;;  %v205_v10 = vadd.f32 %v770_v2, %v134_v3 }
  0x3a   :  { %588 = vst.msk [vmem:[%s1348_s3 + $0xbc] sm:$0xf] %vm540_vm0, %v722_v0  ;;  %v206_v11 = vadd.f32 %v770_v2, %v135_v4  ;;  %v207_v12 = vadd.f32 %v770_v2, %v136_v5  ;;  %v140_v13 = vmul.f32 %v765_v1, %v69_v63  ;;  %v268_v14 = vmax.f32 %v204_v6, 0.0 }
  0x3b   :  { %v208_v15 = vadd.f32 %v770_v2, %v137_v7  ;;  %v209_v16 = vadd.f32 %v770_v2, %v138_v8  ;;  %v210_v17 = vadd.f32 %v770_v2, %v139_v9  ;;  %v269_v18 = vmax.f32 %v205_v10, 0.0 }
  0x3c   :  { %v270_v19 = vmax.f32 %v206_v11, 0.0  ;;  %v271_v20 = vmax.f32 %v207_v12, 0.0  ;;  %v211_v21 = vadd.f32 %v770_v2, %v140_v13  ;;  %v723_v23 = vpack.c.bf16 %v268_v14, %v268_v14 }
  0x3d   :  { %v272_v24 = vmax.f32 %v208_v15, 0.0  ;;  %v273_v25 = vmax.f32 %v209_v16, 0.0  ;;  %v274_v26 = vmax.f32 %v210_v17, 0.0  ;;  %v724_v30 = vpack.c.bf16 %v269_v18, %v269_v18 }
  0x3e   :  { %v725_v31 = vpack.c.bf16 %v270_v19, %v270_v19  ;;  %v726_v32 = vpack.c.bf16 %v271_v20, %v271_v20  ;;  %v275_v33 = vmax.f32 %v211_v21, 0.0  ;;  %589 = vst.msk [vmem:[%s1348_s3 + $0xc0] sm:$0xf] %vm540_vm0, %v723_v23  ;;  %v141_v40 = vmul.f32 %v765_v1, %v70_v22 }
  0x3f   :  { %v727_v37 = vpack.c.bf16 %v272_v24, %v272_v24  ;;  %v728_v38 = vpack.c.bf16 %v273_v25, %v273_v25  ;;  %v729_v39 = vpack.c.bf16 %v274_v26, %v274_v26  ;;  %590 = vst.msk [vmem:[%s1348_s3 + $0xc4] sm:$0xf] %vm540_vm0, %v724_v30  ;;  %v142_v43 = vmul.f32 %v765_v1, %v71_v27 }
  0x40   :  { %591 = vst.msk [vmem:[%s1348_s3 + $0xc8] sm:$0xf] %vm540_vm0, %v725_v31  ;;  %592 = vst.msk [vmem:[%s1348_s3 + $0xcc] sm:$0xf] %vm540_vm0, %v726_v32  ;;  %v730_v42 = vpack.c.bf16 %v275_v33, %v275_v33  ;;  %v143_v44 = vmul.f32 %v765_v1, %v72_v28  ;;  %v144_v45 = vmul.f32 %v765_v1, %v73_v29 }
  0x41   :  { %593 = vst.msk [vmem:[%s1348_s3 + $0xd0] sm:$0xf] %vm540_vm0, %v727_v37  ;;  %594 = vst.msk [vmem:[%s1348_s3 + $0xd4] sm:$0xf] %vm540_vm0, %v728_v38  ;;  %v212_v46 = vadd.f32 %v770_v2, %v141_v40  ;;  %v145_v47 = vmul.f32 %v765_v1, %v74_v34  ;;  %v146_v48 = vmul.f32 %v765_v1, %v75_v35 }
  0x42   :  { %595 = vst.msk [vmem:[%s1348_s3 + $0xd8] sm:$0xf] %vm540_vm0, %v729_v39  ;;  %v147_v49 = vmul.f32 %v765_v1, %v76_v36  ;;  %596 = vst.msk [vmem:[%s1348_s3 + $0xdc] sm:$0xf] %vm540_vm0, %v730_v42  ;;  %v213_v50 = vadd.f32 %v770_v2, %v142_v43  ;;  %v214_v51 = vadd.f32 %v770_v2, %v143_v44 }
  0x43   :  { %v215_v52 = vadd.f32 %v770_v2, %v144_v45  ;;  %v148_v53 = vmul.f32 %v765_v1, %v77_v41  ;;  %v276_v54 = vmax.f32 %v212_v46, 0.0  ;;  %v216_v55 = vadd.f32 %v770_v2, %v145_v47 }
  0x44   :  { %v217_v56 = vadd.f32 %v770_v2, %v146_v48  ;;  %v218_v57 = vadd.f32 %v770_v2, %v147_v49  ;;  %v277_v58 = vmax.f32 %v213_v50, 0.0  ;;  %v278_v59 = vmax.f32 %v214_v51, 0.0 }
  0x45   :  { %v279_v60 = vmax.f32 %v215_v52, 0.0  ;;  %v219_v61 = vadd.f32 %v770_v2, %v148_v53  ;;  %v731_v62 = vpack.c.bf16 %v276_v54, %v276_v54  ;;  %v280_v63 = vmax.f32 %v216_v55, 0.0 }
  0x46   :  { %v281_v0 = vmax.f32 %v217_v56, 0.0  ;;  %v282_v3 = vmax.f32 %v218_v57, 0.0  ;;  %v732_v4 = vpack.c.bf16 %v277_v58, %v277_v58  ;;  %v733_v5 = vpack.c.bf16 %v278_v59, %v278_v59 }
  0x47   :  { %v734_v6 = vpack.c.bf16 %v279_v60, %v279_v60  ;;  %v283_v1 = vmax.f32 %v219_v61, 0.0  ;;  %597 = vst.msk [vmem:[%s1348_s3 + $0xe0] sm:$0xf] %vm540_vm0, %v731_v62  ;;  %v735_v7 = vpack.c.bf16 %v280_v63, %v280_v63 }
  0x48   :  { %v736_v8 = vpack.c.bf16 %v281_v0, %v281_v0  ;;  %v737_v9 = vpack.c.bf16 %v282_v3, %v282_v3  ;;  %598 = vst.msk [vmem:[%s1348_s3 + $0xe4] sm:$0xf] %vm540_vm0, %v732_v4  ;;  %599 = vst.msk [vmem:[%s1348_s3 + $0xe8] sm:$0xf] %vm540_vm0, %v733_v5 }
  0x49   :  { %600 = vst.msk [vmem:[%s1348_s3 + $0xec] sm:$0xf] %vm540_vm0, %v734_v6  ;;  %v738_v2 = vpack.c.bf16 %v283_v1, %v283_v1  ;;  %601 = vst.msk [vmem:[%s1348_s3 + $0xf0] sm:$0xf] %vm540_vm0, %v735_v7 }
  0x4a   :  { %602 = vst.msk [vmem:[%s1348_s3 + $0xf4] sm:$0xf] %vm540_vm0, %v736_v8  ;;  %603 = vst.msk [vmem:[%s1348_s3 + $0xf8] sm:$0xf] %vm540_vm0, %v737_v9 }
  0x4b   :  { %604 = vst.msk [vmem:[%s1348_s3 + $0xfc] sm:$0xf] %vm540_vm0, %v738_v2 }

// kernel: ftgan_encoder_forward.12
= control target key start
LH: loop header
LB: loop body
LE: loop exit
PB: predicated region body
PF: predicated region fallthrough
CT: control target
= control target key end

     0   :  { %vm16_vm0 = vcmask 130048   ;;  %v425_v1 = vmov 0.0   ;;  %vm141_vm1 = vcmask 588800   ;;  %vm166_vm2 = vcmask 1043456   ;;  %s584_s1 = inlined_call_operand.vmem [shape: bf16[72,16], index: 1, kind: input, shape index: {}]   ;;  %s585_s0 = inlined_call_operand.vmem [shape: bf16[128,72], index: 0, kind: input, shape index: {}]   ;;  %s586_s2 = inlined_call_operand.vmem [shape: f32[128,16], index: 2, kind: output, shape index: {}]  }
   0x1   :  { %v412_v0 = vld [vmem:[%s584_s1] sm:$0xff]   ;;  %19 = vst.msk [vmem:[#allocation2 + $0x10] sm:$0xff] %vm16_vm0, %v425_v1  ;;  %17 = vst.msk [vmem:[#allocation2] sm:$0xff] %vm16_vm0, %v425_v1  ;;  %v413_v2 = vld [vmem:[%s584_s1 + $0x8] sm:$0xff]  }
   0x2   :  { %18 = vst.msk [vmem:[#allocation2 + $0x8] sm:$0xff] %vm16_vm0, %v425_v1  ;;  %20 = vst.msk [vmem:[#allocation2 + $0x18] sm:$0xff] %vm16_vm0, %v425_v1  ;;  %373 = vmatprep.subr.bf16.mxu0 %v412_v0  ;;  %399 = vmatprep.subr.bf16.mxu1 %v412_v0  ;;  %v414_v3 = vld [vmem:[%s584_s1 + $0x10] sm:$0xff]   ;;  %v417_v4 = vld [vmem:[%s585_s0] sm:$0xff]  }
   0x3   :  { %21 = vst.msk [vmem:[#allocation2 + $0x20] sm:$0xff] %vm16_vm0, %v425_v1  ;;  %22 = vst.msk [vmem:[#allocation2 + $0x28] sm:$0xff] %vm16_vm0, %v425_v1  ;;  %374 = vmatpush3.bf16.msra.mxu0 %v412_v0  ;;  %404 = vmatpush3.bf16.msra.mxu1 %v412_v0  ;;  %v418_v5 = vld [vmem:[%s585_s0 + $0x20] sm:$0xff]   ;;  %v415_v6 = vld [vmem:[%s584_s1 + $0x18] sm:$0xff]  }
   0x4   :  { %23 = vst.msk [vmem:[#allocation2 + $0x30] sm:$0xff] %vm16_vm0, %v425_v1  ;;  %24 = vst.msk [vmem:[#allocation2 + $0x38] sm:$0xff] %vm16_vm0, %v425_v1  ;;  %375 = vmatprep.subr.bf16.mxu0 %v413_v2  ;;  %400 = vmatprep.subr.bf16.mxu1 %v413_v2  ;;  %v416_v7 = vld [vmem:[%s584_s1 + $0x20] ss:$0 sps:$4 sm:$0xff]   ;;  %v419_v9 = vld [vmem:[%s585_s0 + $0x8] sm:$0xff]  }
   0x5   :  { %25 = vst.msk [vmem:[#allocation2 + $0x40] sm:$0xff] %vm16_vm0, %v425_v1  ;;  %26 = vst.msk [vmem:[#allocation2 + $0x48] sm:$0xff] %vm16_vm0, %v425_v1  ;;  %383 = vmatprep.mubr.msk.bf16.mxu0 %vm141_vm1, %v417_v4  ;;  %391 = vmatprep.mubr.msk.bf16.mxu1 %vm141_vm1, %v418_v5  ;;  %v168_v8 = vsel %vm166_vm2, %v416_v7, 0  ;;  %v420_v10 = vld [vmem:[%s585_s0 + $0x28] sm:$0xff]   ;;  %v421_v11 = vld [vmem:[%s585_s0 + $0x10] sm:$0xff]  }
   0x6   :  { %27 = vst.msk [vmem:[#allocation2 + $0x50] sm:$0xff] %vm16_vm0, %v425_v1  ;;  %28 = vst.msk [vmem:[#allocation2 + $0x58] sm:$0xff] %vm16_vm0, %v425_v1  ;;  %v422_v12 = vld [vmem:[%s585_s0 + $0x30] sm:$0xff]   ;;  %v423_v13 = vld [vmem:[%s585_s0 + $0x18] sm:$0xff]  }
   0x7   :  { %29 = vst.msk [vmem:[#allocation2 + $0x60] sm:$0xff] %vm16_vm0, %v425_v1  ;;  %30 = vst.msk [vmem:[#allocation2 + $0x68] sm:$0xff] %vm16_vm0, %v425_v1  ;;  %376 = vmatpush3.bf16.msra.mxu0 %v413_v2  ;;  %405 = vmatpush3.bf16.msra.mxu1 %v413_v2  ;;  %v424_v14 = vld [vmem:[%s585_s0 + $0x38] sm:$0xff]  }
   0x8   :  { %31 = vst.msk [vmem:[#allocation2 + $0x70] sm:$0xff] %vm16_vm0, %v425_v1  ;;  %32 = vst.msk [vmem:[#allocation2 + $0x78] sm:$0xff] %vm16_vm0, %v425_v1  ;;  %377 = vmatprep.subr.bf16.mxu0 %v414_v3  ;;  %401 = vmatprep.subr.bf16.mxu1 %v414_v3  ;;  %v35_v15 = vld [vmem:[#allocation2 + $0x10] sm:$0xff]  ;;  %v33_v17 = vld [vmem:[#allocation2] sm:$0xff] }
   0x9   :  { %v36_v21 = vld [vmem:[#allocation2 + $0x18] sm:$0xff]  ;;  %v34_v27 = vld [vmem:[#allocation2 + $0x8] sm:$0xff] }
   0xa   :  { %v37_v41 = vld [vmem:[#allocation2 + $0x20] sm:$0xff]  ;;  %v38_v51 = vld [vmem:[#allocation2 + $0x28] sm:$0xff] }
   0xb   :  { %378 = vmatpush3.bf16.msra.mxu0 %v414_v3  ;;  %406 = vmatpush3.bf16.msra.mxu1 %v414_v3  ;;  %v39_v39 = vld [vmem:[#allocation2 + $0x30] sm:$0xff]  ;;  %v40_v45 = vld [vmem:[#allocation2 + $0x38] sm:$0xff] }
   0xc   :  { %379 = vmatprep.subr.bf16.mxu0 %v415_v6  ;;  %402 = vmatprep.subr.bf16.mxu1 %v415_v6  ;;  %v41_v18 = vld [vmem:[#allocation2 + $0x40] sm:$0xff]  ;;  %v42_v28 = vld [vmem:[#allocation2 + $0x48] sm:$0xff] }
   0xd   :  { %v43_v16 = vld [vmem:[#allocation2 + $0x50] sm:$0xff]  ;;  %v44_v22 = vld [vmem:[#allocation2 + $0x58] sm:$0xff] }
   0xe   :  { %v45_v42 = vld [vmem:[#allocation2 + $0x60] sm:$0xff]  ;;  %v46_v52 = vld [vmem:[#allocation2 + $0x68] sm:$0xff] }
   0xf   :  { %380 = vmatpush3.bf16.msra.mxu0 %v415_v6  ;;  %407 = vmatpush3.bf16.msra.mxu1 %v415_v6  ;;  %v47_v40 = vld [vmem:[#allocation2 + $0x70] sm:$0xff]  ;;  %v48_v46 = vld [vmem:[#allocation2 + $0x78] sm:$0xff] }
  0x10   :  { %409 = vmatprep.subr.msk.bf16.mxu0 %vm166_vm2, %v416_v7  ;;  %410 = vmatprep.subr.msk.bf16.mxu1 %vm166_vm2, %v416_v7 }
  0x13   :  { %382 = vmatpush3.bf16.msra.mxu0 %v168_v8  ;;  %408 = vmatpush3.bf16.msra.mxu1 %v168_v8 }
  0x16   :  { %384 = vmatmul.mubr.msk.bf16.vlgmr.msra.gmra.mrb[0].mxu0 %vm141_vm1, %v419_v9  ;;  %392 = vmatmul.mubr.msk.bf16.vlgmr.msra.gmra.mrb[0].mxu1 %vm141_vm1, %v420_v10 }
  0x17   :  { %387 = vmatprep.mubr.msk.bf16.mxu0 %vm141_vm1, %v421_v11  ;;  %395 = vmatprep.mubr.msk.bf16.mxu1 %vm141_vm1, %v422_v12 }
  0x1e   :  { %388 = vmatmul.mubr.msk.bf16.gmra.mrb[4].mxu0 %vm141_vm1, %v423_v13  ;;  %396 = vmatmul.mubr.msk.bf16.gmra.mrb[4].mxu1 %vm141_vm1, %v424_v14 }
  0xe9   :  { %v385_v19 = vpop.f32.mrb[0].mxu0  ;;  %v393_v20 = vpop.f32.mrb[0].mxu1 }
  0xea   :  { %v269_v23 = vadd.f32 %v385_v19, %v35_v15  ;;  %v277_v24 = vadd.f32 %v393_v20, %v43_v16  ;;  %v204_v25 = vpop.f32.mrb[1].mxu0  ;;  %v236_v26 = vpop.f32.mrb[1].mxu1 }
  0xeb   :  { %v267_v29 = vadd.f32 %v204_v25, %v33_v17  ;;  %v275_v30 = vadd.f32 %v236_v26, %v41_v18  ;;  %v386_v31 = vpop.f32.mrb[2].mxu0  ;;  %v394_v32 = vpop.f32.mrb[2].mxu1 }
  0xec   :  { %286 = vst.msk [vmem:[#allocation2 + $0x10] sm:$0xff] %vm16_vm0, %v269_v23  ;;  %294 = vst.msk [vmem:[#allocation2 + $0x50] sm:$0xff] %vm16_vm0, %v277_v24  ;;  %v270_v33 = vadd.f32 %v386_v31, %v36_v21  ;;  %v278_v34 = vadd.f32 %v394_v32, %v44_v22  ;;  %v207_v35 = vpop.f32.mrb[3].mxu0  ;;  %v239_v36 = vpop.f32.mrb[3].mxu1 }
  0xed   :  { %284 = vst.msk [vmem:[#allocation2] sm:$0xff] %vm16_vm0, %v267_v29  ;;  %292 = vst.msk [vmem:[#allocation2 + $0x40] sm:$0xff] %vm16_vm0, %v275_v30  ;;  %v268_v37 = vadd.f32 %v207_v35, %v34_v27  ;;  %v276_v38 = vadd.f32 %v239_v36, %v42_v28 }
  0xee   :  { %287 = vst.msk [vmem:[#allocation2 + $0x18] sm:$0xff] %vm16_vm0, %v270_v33  ;;  %295 = vst.msk [vmem:[#allocation2 + $0x58] sm:$0xff] %vm16_vm0, %v278_v34 }
  0xef   :  { %285 = vst.msk [vmem:[#allocation2 + $0x8] sm:$0xff] %vm16_vm0, %v268_v37  ;;  %293 = vst.msk [vmem:[#allocation2 + $0x48] sm:$0xff] %vm16_vm0, %v276_v38 }
  0xf1   :  { %v389_v43 = vpop.f32.mrb[4].mxu0  ;;  %v397_v44 = vpop.f32.mrb[4].mxu1 }
  0xf2   :  { %v273_v47 = vadd.f32 %v389_v43, %v39_v39  ;;  %v281_v48 = vadd.f32 %v397_v44, %v47_v40  ;;  %v220_v49 = vpop.f32.mrb[5].mxu0  ;;  %v252_v50 = vpop.f32.mrb[5].mxu1 }
  0xf3   :  { %v305_v53 = vld [vmem:[#allocation2 + $0x10] sm:$0xff]  ;;  %v271_v55 = vadd.f32 %v220_v49, %v37_v41  ;;  %v279_v56 = vadd.f32 %v252_v50, %v45_v42  ;;  %v390_v57 = vpop.f32.mrb[6].mxu0  ;;  %v398_v58 = vpop.f32.mrb[6].mxu1 }
  0xf4   :  { %v313_v54 = vld [vmem:[#allocation2 + $0x50] sm:$0xff]  ;;  %321 = vst.msk [vmem:[%s586_s2 + $0x10] sm:$0xff] %vm16_vm0, %v305_v53  ;;  %v303_v59 = vld [vmem:[#allocation2] sm:$0xff]  ;;  %290 = vst.msk [vmem:[#allocation2 + $0x30] sm:$0xff] %vm16_vm0, %v273_v47  ;;  %v274_v61 = vadd.f32 %v390_v57, %v40_v45  ;;  %v282_v62 = vadd.f32 %v398_v58, %v48_v46  ;;  %v223_v63 = vpop.f32.mrb[7].mxu0  ;;  %v255_v0 = vpop.f32.mrb[7].mxu1 }
  0xf5   :  { %329 = vst.msk [vmem:[%s586_s2 + $0x50] sm:$0xff] %vm16_vm0, %v313_v54  ;;  %v311_v60 = vld [vmem:[#allocation2 + $0x40] sm:$0xff]  ;;  %298 = vst.msk [vmem:[#allocation2 + $0x70] sm:$0xff] %vm16_vm0, %v281_v48  ;;  %v306_v1 = vld [vmem:[#allocation2 + $0x18] sm:$0xff]  ;;  %v272_v3 = vadd.f32 %v223_v63, %v38_v51  ;;  %v280_v4 = vadd.f32 %v255_v0, %v46_v52 }
  0xf6   :  { %319 = vst.msk [vmem:[%s586_s2] sm:$0xff] %vm16_vm0, %v303_v59  ;;  %327 = vst.msk [vmem:[%s586_s2 + $0x40] sm:$0xff] %vm16_vm0, %v311_v60  ;;  %v314_v2 = vld [vmem:[#allocation2 + $0x58] sm:$0xff]  ;;  %v304_v5 = vld [vmem:[#allocation2 + $0x8] sm:$0xff] }
  0xf7   :  { %288 = vst.msk [vmem:[#allocation2 + $0x20] sm:$0xff] %vm16_vm0, %v271_v55  ;;  %296 = vst.msk [vmem:[#allocation2 + $0x60] sm:$0xff] %vm16_vm0, %v279_v56  ;;  %v312_v6 = vld [vmem:[#allocation2 + $0x48] sm:$0xff] }
  0xf8   :  { %322 = vst.msk [vmem:[%s586_s2 + $0x18] sm:$0xff] %vm16_vm0, %v306_v1  ;;  %330 = vst.msk [vmem:[%s586_s2 + $0x58] sm:$0xff] %vm16_vm0, %v314_v2 }
  0xf9   :  { %291 = vst.msk [vmem:[#allocation2 + $0x38] sm:$0xff] %vm16_vm0, %v274_v61  ;;  %299 = vst.msk [vmem:[#allocation2 + $0x78] sm:$0xff] %vm16_vm0, %v282_v62 }
  0xfa   :  { %320 = vst.msk [vmem:[%s586_s2 + $0x8] sm:$0xff] %vm16_vm0, %v304_v5  ;;  %328 = vst.msk [vmem:[%s586_s2 + $0x48] sm:$0xff] %vm16_vm0, %v312_v6 }
  0xfb   :  { %289 = vst.msk [vmem:[#allocation2 + $0x28] sm:$0xff] %vm16_vm0, %v272_v3  ;;  %297 = vst.msk [vmem:[#allocation2 + $0x68] sm:$0xff] %vm16_vm0, %v280_v4  ;;  %v309_v7 = vld [vmem:[#allocation2 + $0x30] sm:$0xff] }
  0xfc   :  { %v317_v8 = vld [vmem:[#allocation2 + $0x70] sm:$0xff]  ;;  %325 = vst.msk [vmem:[%s586_s2 + $0x30] sm:$0xff] %vm16_vm0, %v309_v7 }
  0xfd   :  { %333 = vst.msk [vmem:[%s586_s2 + $0x70] sm:$0xff] %vm16_vm0, %v317_v8 }
  0xfe   :  { %v307_v9 = vld [vmem:[#allocation2 + $0x20] sm:$0xff] }
  0xff   :  { %v315_v10 = vld [vmem:[#allocation2 + $0x60] sm:$0xff]  ;;  %323 = vst.msk [vmem:[%s586_s2 + $0x20] sm:$0xff] %vm16_vm0, %v307_v9 }
 0x100   :  { %331 = vst.msk [vmem:[%s586_s2 + $0x60] sm:$0xff] %vm16_vm0, %v315_v10  ;;  %v310_v11 = vld [vmem:[#allocation2 + $0x38] sm:$0xff] }
 0x101   :  { %v318_v12 = vld [vmem:[#allocation2 + $0x78] sm:$0xff]  ;;  %326 = vst.msk [vmem:[%s586_s2 + $0x38] sm:$0xff] %vm16_vm0, %v310_v11 }
 0x102   :  { %334 = vst.msk [vmem:[%s586_s2 + $0x78] sm:$0xff] %vm16_vm0, %v318_v12  ;;  %v308_v13 = vld [vmem:[#allocation2 + $0x28] sm:$0xff] }
 0x103   :  { %v316_v14 = vld [vmem:[#allocation2 + $0x68] sm:$0xff]  ;;  %324 = vst.msk [vmem:[%s586_s2 + $0x28] sm:$0xff] %vm16_vm0, %v308_v13 }
 0x104   :  { %332 = vst.msk [vmem:[%s586_s2 + $0x68] sm:$0xff] %vm16_vm0, %v316_v14 }

// kernel: ftgan_encoder_forward.13
= control target key start
LH: loop header
LB: loop body
LE: loop exit
PB: predicated region body
PF: predicated region fallthrough
CT: control target
= control target key end

     0   :  { %vm12_vm0 = vcmask 123904   ;;  %vm31_vm1 = vcmask 130048   ;;  %v133_v0 = vmov 0.0   ;;  %vm70_vm2 = vcmask 122880   ;;  %s239_s1 = inlined_call_operand.vmem [shape: f32[2,16], index: 1, kind: output, shape index: {}]   ;;  %s240_s0 = inlined_call_operand.vmem [shape: f32[128,16], index: 0, kind: input, shape index: {}]  }
   0x1   :  { %13 = vst.msk [vmem:[%s239_s1] sm:$0x3] %vm12_vm0, %v133_v0  ;;  %v14_v1 = vld [vmem:[%s240_s0] sm:$0xff]  ;;  %v15_v2 = vld [vmem:[%s240_s0 + $0x8] sm:$0xff]  ;;  %v16_v3 = vld [vmem:[%s240_s0 + $0x10] sm:$0xff] }
   0x2   :  { %v32_v4 = vsel %vm31_vm1, %v14_v1, 0.0  ;;  %v33_v5 = vsel %vm31_vm1, %v15_v2, 0.0  ;;  %v35_v6 = vsel %vm31_vm1, %v16_v3, 0.0  ;;  %v17_v7 = vld [vmem:[%s240_s0 + $0x18] sm:$0xff]  ;;  %v18_v10 = vld [vmem:[%s240_s0 + $0x20] sm:$0xff]  ;;  %v19_v13 = vld [vmem:[%s240_s0 + $0x28] sm:$0xff]  ;;  %v73_v15 = vmul.f32 %v14_v1, %v14_v1 }
   0x3   :  { %v34_v8 = vadd.f32 %v33_v5, %v32_v4  ;;  %v37_v9 = vsel %vm31_vm1, %v17_v7, 0.0  ;;  %v39_v12 = vsel %vm31_vm1, %v18_v10, 0.0  ;;  %v74_v16 = vmul.f32 %v15_v2, %v15_v2  ;;  %v20_v19 = vld [vmem:[%s240_s0 + $0x30] sm:$0xff]  ;;  %v21_v24 = vld [vmem:[%s240_s0 + $0x38] sm:$0xff]  ;;  %v22_v31 = vld [vmem:[%s240_s0 + $0x40] sm:$0xff] }
   0x4   :  { %v75_v17 = vmul.f32 %v16_v3, %v16_v3  ;;  %v41_v18 = vsel %vm31_vm1, %v19_v13, 0.0  ;;  %v76_v21 = vmul.f32 %v17_v7, %v17_v7  ;;  %v43_v22 = vsel %vm31_vm1, %v20_v19, 0.0  ;;  %v23_v37 = vld [vmem:[%s240_s0 + $0x48] sm:$0xff]  ;;  %v24_v43 = vld [vmem:[%s240_s0 + $0x50] sm:$0xff]  ;;  %v25_v49 = vld [vmem:[%s240_s0 + $0x58] sm:$0xff] }
   0x5   :  { %v36_v11 = vadd.f32 %v35_v6, %v34_v8  ;;  %v77_v23 = vmul.f32 %v18_v10, %v18_v10  ;;  %v89_v26 = vsel %vm31_vm1, %v73_v15, 0.0  ;;  %v90_v27 = vsel %vm31_vm1, %v74_v16, 0.0  ;;  %v26_v55 = vld [vmem:[%s240_s0 + $0x60] sm:$0xff]  ;;  %v27_v61 = vld [vmem:[%s240_s0 + $0x68] sm:$0xff]  ;;  %v28_v3 = vld [vmem:[%s240_s0 + $0x70] sm:$0xff] }
   0x6   :  { %v92_v28 = vsel %vm31_vm1, %v75_v17, 0.0  ;;  %v45_v29 = vsel %vm31_vm1, %v21_v24, 0.0  ;;  %v91_v30 = vadd.f32 %v90_v27, %v89_v26  ;;  %v78_v33 = vmul.f32 %v19_v13, %v19_v13 }
   0x7   :  { %v38_v14 = vadd.f32 %v37_v9, %v36_v11  ;;  %v94_v34 = vsel %vm31_vm1, %v76_v21, 0.0  ;;  %v47_v35 = vsel %vm31_vm1, %v22_v31, 0.0  ;;  %v79_v39 = vmul.f32 %v20_v19, %v20_v19  ;;  %v29_v9 = vld [vmem:[%s240_s0 + $0x78] sm:$0xff] }
   0x8   :  { %v93_v36 = vadd.f32 %v92_v28, %v91_v30  ;;  %v96_v40 = vsel %vm31_vm1, %v77_v23, 0.0  ;;  %v49_v41 = vsel %vm31_vm1, %v23_v37, 0.0  ;;  %v80_v45 = vmul.f32 %v21_v24, %v21_v24 }
   0x9   :  { %v40_v20 = vadd.f32 %v39_v12, %v38_v14  ;;  %v98_v46 = vsel %vm31_vm1, %v78_v33, 0.0  ;;  %v51_v47 = vsel %vm31_vm1, %v24_v43, 0.0  ;;  %v81_v51 = vmul.f32 %v22_v31, %v22_v31 }
   0xa   :  { %v95_v42 = vadd.f32 %v94_v34, %v93_v36  ;;  %v100_v52 = vsel %vm31_vm1, %v79_v39, 0.0  ;;  %v53_v53 = vsel %vm31_vm1, %v25_v49, 0.0  ;;  %v82_v57 = vmul.f32 %v23_v37, %v23_v37  ;;  %v30_v36 = vld [vmem:[%s239_s1] sm:$0x1] }
   0xb   :  { %v42_v25 = vadd.f32 %v41_v18, %v40_v20  ;;  %v102_v58 = vsel %vm31_vm1, %v80_v45, 0.0  ;;  %v55_v59 = vsel %vm31_vm1, %v26_v55, 0.0  ;;  %v83_v63 = vmul.f32 %v24_v43, %v24_v43 }
   0xc   :  { %v97_v48 = vadd.f32 %v96_v40, %v95_v42  ;;  %v104_v0 = vsel %vm31_vm1, %v81_v51, 0.0  ;;  %v57_v1 = vsel %vm31_vm1, %v27_v61, 0.0  ;;  %v84_v5 = vmul.f32 %v25_v49, %v25_v49 }
   0xd   :  { %v44_v32 = vadd.f32 %v43_v22, %v42_v25  ;;  %v106_v6 = vsel %vm31_vm1, %v82_v57, 0.0  ;;  %v59_v7 = vsel %vm31_vm1, %v28_v3, 0.0  ;;  %v85_v11 = vmul.f32 %v26_v55, %v26_v55 }
   0xe   :  { %v99_v54 = vadd.f32 %v98_v46, %v97_v48  ;;  %v108_v12 = vsel %vm31_vm1, %v83_v63, 0.0  ;;  %v61_v13 = vsel %vm31_vm1, %v29_v9, 0.0  ;;  %v86_v16 = vmul.f32 %v27_v61, %v27_v61 }
   0xf   :  { %v46_v38 = vadd.f32 %v45_v29, %v44_v32  ;;  %v110_v17 = vsel %vm31_vm1, %v84_v5, 0.0  ;;  %v87_v20 = vmul.f32 %v28_v3, %v28_v3  ;;  %v112_v21 = vsel %vm31_vm1, %v85_v11, 0.0 }
  0x10   :  { %v101_v60 = vadd.f32 %v100_v52, %v99_v54  ;;  %v88_v24 = vmul.f32 %v29_v9, %v29_v9  ;;  %v114_v25 = vsel %vm31_vm1, %v86_v16, 0.0 }
  0x11   :  { %v48_v44 = vadd.f32 %v47_v35, %v46_v38  ;;  %v116_v28 = vsel %vm31_vm1, %v87_v20, 0.0 }
  0x12   :  { %v103_v2 = vadd.f32 %v102_v58, %v101_v60  ;;  %v118_v31 = vsel %vm31_vm1, %v88_v24, 0.0 }
  0x13   :  { %v50_v50 = vadd.f32 %v49_v41, %v48_v44  ;;  %v72_v44 = vld [vmem:[%s239_s1 + $0x1] sm:$0x1] }
  0x14   :  { %v105_v8 = vadd.f32 %v104_v0, %v103_v2 }
  0x15   :  { %v52_v56 = vadd.f32 %v51_v47, %v50_v50 }
  0x16   :  { %v107_v14 = vadd.f32 %v106_v6, %v105_v8 }
  0x17   :  { %v54_v62 = vadd.f32 %v53_v53, %v52_v56 }
  0x18   :  { %v109_v18 = vadd.f32 %v108_v12, %v107_v14 }
  0x19   :  { %v56_v4 = vadd.f32 %v55_v59, %v54_v62 }
  0x1a   :  { %v111_v22 = vadd.f32 %v110_v17, %v109_v18 }
  0x1b   :  { %v58_v10 = vadd.f32 %v57_v1, %v56_v4 }
  0x1c   :  { %v113_v26 = vadd.f32 %v112_v21, %v111_v22 }
  0x1d   :  { %v60_v15 = vadd.f32 %v59_v7, %v58_v10 }
  0x1e   :  { %v115_v29 = vadd.f32 %v114_v25, %v113_v26 }
  0x1f   :  { %v62_v19 = vadd.f32 %v61_v13, %v60_v15 }
  0x20   :  { %v117_v32 = vadd.f32 %v116_v28, %v115_v29 }
  0x21   :  { %v63_v23 = vrot.slane %v62_v19, 4 }
  0x22   :  { %v119_v34 = vadd.f32 %v118_v31, %v117_v32 }
  0x23   :  { %v64_v27 = vadd.f32 %v63_v23, %v62_v19 }
  0x24   :  { %v120_v37 = vrot.slane %v119_v34, 4 }
  0x25   :  { %v65_v30 = vrot.slane %v64_v27, 2 }
  0x26   :  { %v121_v39 = vadd.f32 %v120_v37, %v119_v34 }
  0x27   :  { %v66_v33 = vadd.f32 %v65_v30, %v64_v27 }
  0x28   :  { %v122_v41 = vrot.slane %v121_v39, 2 }
  0x29   :  { %v67_v35 = vrot.slane %v66_v33, 1 }
  0x2a   :  { %v123_v42 = vadd.f32 %v122_v41, %v121_v39 }
  0x2b   :  { %v68_v38 = vadd.f32 %v67_v35, %v66_v33 }
  0x2c   :  { %v124_v43 = vrot.slane %v123_v42, 1 }
  0x2d   :  { %v69_v40 = vadd.f32 %v68_v38, %v30_v36 }
  0x2e   :  { %v125_v45 = vadd.f32 %v124_v43, %v123_v42 }
  0x2f   :  { %71 = vst.msk [vmem:[%s239_s1] sm:$0x1] %vm70_vm2, %v69_v40 }
  0x30   :  { %v126_v46 = vadd.f32 %v125_v45, %v72_v44 }
  0x32   :  { %127 = vst.msk [vmem:[%s239_s1 + $0x1] sm:$0x1] %vm70_vm2, %v126_v46 }

// kernel: ftgan_encoder_forward.14
= control target key start
LH: loop header
LB: loop body
LE: loop exit
PB: predicated region body
PF: predicated region fallthrough
CT: control target
= control target key end

     0   :  { %vm156_vm0 = vcmask 125952   ;;  %s385_s0 = inlined_call_operand.vmem [shape: f32[128,16], index: 0, kind: input, shape index: {}]   ;;  %s386_s1 = inlined_call_operand.vmem [shape: f32[1,16], index: 1, kind: input, shape index: {}]   ;;  %s387_s2 = inlined_call_operand.vmem [shape: f32[1,16], index: 2, kind: input, shape index: {}]   ;;  %s388_s3 = inlined_call_operand.vmem [shape: bf16[128,16], index: 3, kind: output, shape index: {}]  }
   0x1   :  { %v14_v0 = vld [vmem:[%s385_s0] sm:$0xff]  ;;  %v15_v4 = vld [vmem:[%s385_s0 + $0x8] sm:$0xff]  ;;  %v16_v5 = vld [vmem:[%s385_s0 + $0x10] sm:$0xff] }
   0x2   :  { %v237_v1 = vld [vmem:[%s386_s1] ss:$0 sm:$0xff]  ;;  %v17_v6 = vld [vmem:[%s385_s0 + $0x18] sm:$0xff]  ;;  %v19_v11 = vld [vmem:[%s385_s0 + $0x28] sm:$0xff] }
   0x3   :  { %v242_v2 = vld [vmem:[%s387_s2] ss:$0 sm:$0xff]  ;;  %v37_v3 = vmul.f32 %v237_v1, %v14_v0  ;;  %v38_v7 = vmul.f32 %v237_v1, %v15_v4  ;;  %v39_v8 = vmul.f32 %v237_v1, %v16_v5  ;;  %v40_v9 = vmul.f32 %v237_v1, %v17_v6  ;;  %v20_v12 = vld [vmem:[%s385_s0 + $0x30] sm:$0xff]  ;;  %v21_v17 = vld [vmem:[%s385_s0 + $0x38] sm:$0xff] }
   0x4   :  { %v18_v10 = vld [vmem:[%s385_s0 + $0x20] sm:$0xff]  ;;  %v42_v15 = vmul.f32 %v237_v1, %v19_v11  ;;  %v43_v16 = vmul.f32 %v237_v1, %v20_v12  ;;  %v44_v21 = vmul.f32 %v237_v1, %v21_v17  ;;  %v23_v35 = vld [vmem:[%s385_s0 + $0x48] sm:$0xff]  ;;  %v24_v36 = vld [vmem:[%s385_s0 + $0x50] sm:$0xff] }
   0x5   :  { %v60_v13 = vadd.f32 %v242_v2, %v37_v3  ;;  %v41_v14 = vmul.f32 %v237_v1, %v18_v10  ;;  %v61_v18 = vadd.f32 %v242_v2, %v38_v7  ;;  %v62_v19 = vadd.f32 %v242_v2, %v39_v8  ;;  %v22_v30 = vld [vmem:[%s385_s0 + $0x40] sm:$0xff]  ;;  %v25_v37 = vld [vmem:[%s385_s0 + $0x58] sm:$0xff]  ;;  %v27_v43 = vld [vmem:[%s385_s0 + $0x68] sm:$0xff] }
   0x6   :  { %v63_v20 = vadd.f32 %v242_v2, %v40_v9  ;;  %v65_v24 = vadd.f32 %v242_v2, %v42_v15  ;;  %v66_v25 = vadd.f32 %v242_v2, %v43_v16  ;;  %v67_v29 = vadd.f32 %v242_v2, %v44_v21  ;;  %v26_v42 = vld [vmem:[%s385_s0 + $0x60] sm:$0xff]  ;;  %v28_v44 = vld [vmem:[%s385_s0 + $0x70] sm:$0xff]  ;;  %v29_v49 = vld [vmem:[%s385_s0 + $0x78] sm:$0xff] }
   0x7   :  { %v76_v22 = vmax.f32 %v60_v13, 0.0  ;;  %v64_v23 = vadd.f32 %v242_v2, %v41_v14  ;;  %v77_v26 = vmax.f32 %v61_v18, 0.0  ;;  %v78_v27 = vmax.f32 %v62_v19, 0.0 }
   0x8   :  { %v79_v28 = vmax.f32 %v63_v20, 0.0  ;;  %v81_v33 = vmax.f32 %v65_v24, 0.0  ;;  %v82_v34 = vmax.f32 %v66_v25, 0.0  ;;  %v83_v41 = vmax.f32 %v67_v29, 0.0 }
   0x9   :  { %v195_v31 = vpack.c.bf16 %v76_v22, %v76_v22  ;;  %v80_v32 = vmax.f32 %v64_v23, 0.0  ;;  %v196_v38 = vpack.c.bf16 %v77_v26, %v77_v26  ;;  %v197_v39 = vpack.c.bf16 %v78_v27, %v78_v27 }
   0xa   :  { %v198_v40 = vpack.c.bf16 %v79_v28, %v79_v28  ;;  %v200_v46 = vpack.c.bf16 %v81_v33, %v81_v33  ;;  %v201_v47 = vpack.c.bf16 %v82_v34, %v82_v34  ;;  %v45_v48 = vmul.f32 %v237_v1, %v22_v30 }
   0xb   :  { %157 = vst.msk [vmem:[%s388_s3] sm:$0xf] %vm156_vm0, %v195_v31  ;;  %v199_v45 = vpack.c.bf16 %v80_v32, %v80_v32  ;;  %158 = vst.msk [vmem:[%s388_s3 + $0x4] sm:$0xf] %vm156_vm0, %v196_v38  ;;  %v202_v50 = vpack.c.bf16 %v83_v41, %v83_v41  ;;  %v46_v51 = vmul.f32 %v237_v1, %v23_v35 }
   0xc   :  { %159 = vst.msk [vmem:[%s388_s3 + $0x8] sm:$0xf] %vm156_vm0, %v197_v39  ;;  %160 = vst.msk [vmem:[%s388_s3 + $0xc] sm:$0xf] %vm156_vm0, %v198_v40  ;;  %v47_v52 = vmul.f32 %v237_v1, %v24_v36  ;;  %v48_v53 = vmul.f32 %v237_v1, %v25_v37  ;;  %v68_v54 = vadd.f32 %v242_v2, %v45_v48 }
   0xd   :  { %161 = vst.msk [vmem:[%s388_s3 + $0x10] sm:$0xf] %vm156_vm0, %v199_v45  ;;  %162 = vst.msk [vmem:[%s388_s3 + $0x14] sm:$0xf] %vm156_vm0, %v200_v46  ;;  %v49_v55 = vmul.f32 %v237_v1, %v26_v42  ;;  %v50_v56 = vmul.f32 %v237_v1, %v27_v43  ;;  %v51_v57 = vmul.f32 %v237_v1, %v28_v44 }
   0xe   :  { %163 = vst.msk [vmem:[%s388_s3 + $0x18] sm:$0xf] %vm156_vm0, %v201_v47  ;;  %164 = vst.msk [vmem:[%s388_s3 + $0x1c] sm:$0xf] %vm156_vm0, %v202_v50  ;;  %v69_v58 = vadd.f32 %v242_v2, %v46_v51  ;;  %v70_v59 = vadd.f32 %v242_v2, %v47_v52  ;;  %v71_v60 = vadd.f32 %v242_v2, %v48_v53  ;;  %v84_v62 = vmax.f32 %v68_v54, 0.0 }
   0xf   :  { %v52_v61 = vmul.f32 %v237_v1, %v29_v49  ;;  %v72_v63 = vadd.f32 %v242_v2, %v49_v55  ;;  %v73_v0 = vadd.f32 %v242_v2, %v50_v56  ;;  %v74_v3 = vadd.f32 %v242_v2, %v51_v57 }
  0x10   :  { %v85_v4 = vmax.f32 %v69_v58, 0.0  ;;  %v86_v5 = vmax.f32 %v70_v59, 0.0  ;;  %v87_v6 = vmax.f32 %v71_v60, 0.0  ;;  %v203_v8 = vpack.c.bf16 %v84_v62, %v84_v62 }
  0x11   :  { %v75_v7 = vadd.f32 %v242_v2, %v52_v61  ;;  %v88_v9 = vmax.f32 %v72_v63, 0.0  ;;  %v89_v10 = vmax.f32 %v73_v0, 0.0  ;;  %v90_v11 = vmax.f32 %v74_v3, 0.0 }
  0x12   :  { %v204_v12 = vpack.c.bf16 %v85_v4, %v85_v4  ;;  %v205_v13 = vpack.c.bf16 %v86_v5, %v86_v5  ;;  %v206_v14 = vpack.c.bf16 %v87_v6, %v87_v6  ;;  %165 = vst.msk [vmem:[%s388_s3 + $0x20] sm:$0xf] %vm156_vm0, %v203_v8 }
  0x13   :  { %v91_v1 = vmax.f32 %v75_v7, 0.0  ;;  %v207_v15 = vpack.c.bf16 %v88_v9, %v88_v9  ;;  %v208_v16 = vpack.c.bf16 %v89_v10, %v89_v10  ;;  %v209_v17 = vpack.c.bf16 %v90_v11, %v90_v11 }
  0x14   :  { %166 = vst.msk [vmem:[%s388_s3 + $0x24] sm:$0xf] %vm156_vm0, %v204_v12  ;;  %167 = vst.msk [vmem:[%s388_s3 + $0x28] sm:$0xf] %vm156_vm0, %v205_v13 }
  0x15   :  { %168 = vst.msk [vmem:[%s388_s3 + $0x2c] sm:$0xf] %vm156_vm0, %v206_v14  ;;  %v210_v2 = vpack.c.bf16 %v91_v1, %v91_v1  ;;  %169 = vst.msk [vmem:[%s388_s3 + $0x30] sm:$0xf] %vm156_vm0, %v207_v15 }
  0x16   :  { %170 = vst.msk [vmem:[%s388_s3 + $0x34] sm:$0xf] %vm156_vm0, %v208_v16  ;;  %171 = vst.msk [vmem:[%s388_s3 + $0x38] sm:$0xf] %vm156_vm0, %v209_v17 }
  0x17   :  { %172 = vst.msk [vmem:[%s388_s3 + $0x3c] sm:$0xf] %vm156_vm0, %v210_v2 }

// kernel: ftgan_encoder_forward.15
= control target key start
LH: loop header
LB: loop body
LE: loop exit
PB: predicated region body
PF: predicated region fallthrough
CT: control target
= control target key end

     0   :  { %vm16_vm0 = vcmask 261120   ;;  %v249_v0 = vmov 0   ;;  %v250_v2 = vmov 0.0   ;;  %vm119_vm1 = vcmask 130048   ;;  %s329_s1 = inlined_call_operand.vmem [shape: bf16[144,32], index: 1, kind: input, shape index: {}]   ;;  %s330_s0 = inlined_call_operand.vmem [shape: bf16[32,144], index: 0, kind: input, shape index: {}]   ;;  %s331_s2 = inlined_call_operand.vmem [shape: f32[32,32], index: 2, kind: output, shape index: {}]  }
   0x1   :  { %126 = vmatprep.subr.bf16.mxu0 %v249_v0  ;;  %214 = vmatprep.subr.bf16.mxu1 %v249_v0  ;;  %v234_v1 = vld [vmem:[%s329_s1] sm:$0xff]   ;;  %17 = vst.msk [vmem:[#allocation2] sm:$0xff] %vm16_vm0, %v250_v2  ;;  %18 = vst.msk [vmem:[#allocation2 + $0x8] sm:$0xff] %vm16_vm0, %v250_v2  ;;  %v235_v3 = vld [vmem:[%s329_s1 + $0x8] sm:$0xff]  }
   0x2   :  { %19 = vst.msk [vmem:[#allocation2 + $0x10] sm:$0xff] %vm16_vm0, %v250_v2  ;;  %20 = vst.msk [vmem:[#allocation2 + $0x18] sm:$0xff] %vm16_vm0, %v250_v2  ;;  %127 = vmatpush1.bf16.msra.mxu0 %v234_v1  ;;  %223 = vmatpush1.bf16.msra.mxu1 %v234_v1  ;;  %v236_v4 = vld [vmem:[%s329_s1 + $0x10] sm:$0xff]   ;;  %v237_v5 = vld [vmem:[%s329_s1 + $0x18] sm:$0xff]  }
   0x3   :  { %128 = vmatprep.subr.bf16.mxu0 %v249_v0  ;;  %215 = vmatprep.subr.bf16.mxu1 %v249_v0  ;;  %v245_v6 = vld [vmem:[%s330_s0 + $0x4] ss:$8 sps:$4 sm:$0xff]   ;;  %v248_v7 = vld [vmem:[%s330_s0 + $0x14] ss:$8 sps:$4 sm:$0xff]   ;;  %v243_v13 = vld [vmem:[%s330_s0] ss:$8 sps:$4 sm:$0xff]  }
   0x4   :  { %212 = vmatprep.mubr.msk.bf16.mxu0 %vm119_vm1, %v245_v6  ;;  %213 = vmatprep.mubr.msk.bf16.mxu1 %vm119_vm1, %v248_v7  ;;  %v238_v8 = vld [vmem:[%s329_s1 + $0x20] sm:$0xff]   ;;  %v239_v9 = vld [vmem:[%s329_s1 + $0x28] sm:$0xff]   ;;  %v240_v10 = vld [vmem:[%s329_s1 + $0x30] sm:$0xff]  }
   0x5   :  { %v241_v11 = vld [vmem:[%s329_s1 + $0x38] sm:$0xff]   ;;  %v242_v12 = vld [vmem:[%s329_s1 + $0x40] sm:$0xff]  }
   0x6   :  { %129 = vmatpush1.bf16.msra.mxu0 %v235_v3  ;;  %224 = vmatpush1.bf16.msra.mxu1 %v235_v3  ;;  %v246_v14 = vld [vmem:[%s330_s0 + $0x10] ss:$8 sps:$4 sm:$0xff]  }
   0x7   :  { %130 = vmatprep.subr.bf16.mxu0 %v249_v0  ;;  %216 = vmatprep.subr.bf16.mxu1 %v249_v0 }
   0x8   :  { %v21_v15 = vld [vmem:[#allocation2] sm:$0xff]  ;;  %v22_v19 = vld [vmem:[#allocation2 + $0x8] sm:$0xff] }
   0x9   :  { %v23_v16 = vld [vmem:[#allocation2 + $0x10] sm:$0xff]  ;;  %v24_v20 = vld [vmem:[#allocation2 + $0x18] sm:$0xff] }
   0xa   :  { %131 = vmatpush1.bf16.msra.mxu0 %v236_v4  ;;  %225 = vmatpush1.bf16.msra.mxu1 %v236_v4 }
   0xb   :  { %132 = vmatprep.subr.bf16.mxu0 %v249_v0  ;;  %217 = vmatprep.subr.bf16.mxu1 %v249_v0 }
   0xe   :  { %133 = vmatpush1.bf16.msra.mxu0 %v237_v5  ;;  %226 = vmatpush1.bf16.msra.mxu1 %v237_v5 }
   0xf   :  { %134 = vmatprep.subr.bf16.mxu0 %v249_v0  ;;  %218 = vmatprep.subr.bf16.mxu1 %v249_v0 }
  0x12   :  { %135 = vmatpush1.bf16.msra.mxu0 %v238_v8  ;;  %227 = vmatpush1.bf16.msra.mxu1 %v238_v8 }
  0x13   :  { %136 = vmatprep.subr.bf16.mxu0 %v249_v0  ;;  %219 = vmatprep.subr.bf16.mxu1 %v249_v0 }
  0x16   :  { %137 = vmatpush1.bf16.msra.mxu0 %v239_v9  ;;  %228 = vmatpush1.bf16.msra.mxu1 %v239_v9 }
  0x17   :  { %138 = vmatprep.subr.bf16.mxu0 %v249_v0  ;;  %220 = vmatprep.subr.bf16.mxu1 %v249_v0 }
  0x1a   :  { %139 = vmatpush1.bf16.msra.mxu0 %v240_v10  ;;  %229 = vmatpush1.bf16.msra.mxu1 %v240_v10 }
  0x1b   :  { %140 = vmatprep.subr.bf16.mxu0 %v249_v0  ;;  %221 = vmatprep.subr.bf16.mxu1 %v249_v0 }
  0x1e   :  { %141 = vmatpush1.bf16.msra.mxu0 %v241_v11  ;;  %230 = vmatpush1.bf16.msra.mxu1 %v241_v11 }
  0x1f   :  { %142 = vmatprep.subr.bf16.mxu0 %v249_v0  ;;  %222 = vmatprep.subr.bf16.mxu1 %v249_v0 }
  0x22   :  { %143 = vmatpush1.bf16.msra.mxu0 %v242_v12  ;;  %231 = vmatpush1.bf16.msra.mxu1 %v242_v12 }
  0x25   :  { %159 = vmatmul.mubr.bf16.vlgmr.msra.gmra.mrb[0].mxu0 %v243_v13  ;;  %167 = vmatmul.mubr.bf16.vlgmr.msra.gmra.mrb[0].mxu1 %v246_v14 }
  0xf8   :  { %v160_v17 = vpop.f32.mrb[0].mxu0  ;;  %v168_v18 = vpop.f32.mrb[0].mxu1 }
  0xf9   :  { %v175_v21 = vadd.f32 %v160_v17, %v21_v15  ;;  %v177_v22 = vadd.f32 %v168_v18, %v23_v16  ;;  %v162_v23 = vpop.f32.mrb[1].mxu0  ;;  %v170_v24 = vpop.f32.mrb[1].mxu1 }
  0xfa   :  { %v163_v25 = vpop.f32.mrb[2].mxu0  ;;  %v171_v26 = vpop.f32.mrb[2].mxu1 }
  0xfb   :  { %180 = vst.msk [vmem:[#allocation2] sm:$0xff] %vm16_vm0, %v175_v21  ;;  %182 = vst.msk [vmem:[#allocation2 + $0x10] sm:$0xff] %vm16_vm0, %v177_v22  ;;  %v176_v27 = vadd.f32 %v163_v25, %v22_v19  ;;  %v178_v28 = vadd.f32 %v171_v26, %v24_v20  ;;  %v165_v29 = vpop.f32.mrb[3].mxu0  ;;  %v173_v30 = vpop.f32.mrb[3].mxu1 }
  0xfd   :  { %181 = vst.msk [vmem:[#allocation2 + $0x8] sm:$0xff] %vm16_vm0, %v176_v27  ;;  %183 = vst.msk [vmem:[#allocation2 + $0x18] sm:$0xff] %vm16_vm0, %v178_v28 }
 0x102   :  { %v187_v31 = vld [vmem:[#allocation2] sm:$0xff]  ;;  %v189_v32 = vld [vmem:[#allocation2 + $0x10] sm:$0xff] }
 0x103   :  { %191 = vst.msk [vmem:[%s331_s2] sm:$0xff] %vm16_vm0, %v187_v31  ;;  %193 = vst.msk [vmem:[%s331_s2 + $0x10] sm:$0xff] %vm16_vm0, %v189_v32 }
 0x104   :  { %v188_v33 = vld [vmem:[#allocation2 + $0x8] sm:$0xff]  ;;  %v190_v34 = vld [vmem:[#allocation2 + $0x18] sm:$0xff] }
 0x105   :  { %192 = vst.msk [vmem:[%s331_s2 + $0x8] sm:$0xff] %vm16_vm0, %v188_v33  ;;  %194 = vst.msk [vmem:[%s331_s2 + $0x18] sm:$0xff] %vm16_vm0, %v190_v34 }

// kernel: ftgan_encoder_forward.16
= control target key start
LH: loop header
LB: loop body
LE: loop exit
PB: predicated region body
PF: predicated region fallthrough
CT: control target
= control target key end

     0   :  { %vm12_vm0 = vcmask 254976   ;;  %vm19_vm1 = vcmask 261120   ;;  %v61_v0 = vmov 0.0   ;;  %vm34_vm2 = vcmask 253952   ;;  %s107_s1 = inlined_call_operand.vmem [shape: f32[2,32], index: 1, kind: output, shape index: {}]   ;;  %s108_s0 = inlined_call_operand.vmem [shape: f32[32,32], index: 0, kind: input, shape index: {}]  }
   0x1   :  { %13 = vst.msk [vmem:[%s107_s1] sm:$0x3] %vm12_vm0, %v61_v0  ;;  %v14_v1 = vld [vmem:[%s108_s0] sm:$0xff]  ;;  %v15_v2 = vld [vmem:[%s108_s0 + $0x8] sm:$0xff]  ;;  %v16_v3 = vld [vmem:[%s108_s0 + $0x10] sm:$0xff] }
   0x2   :  { %v17_v4 = vld [vmem:[%s108_s0 + $0x18] sm:$0xff]  ;;  %v20_v5 = vsel %vm19_vm1, %v14_v1, 0.0  ;;  %v21_v6 = vsel %vm19_vm1, %v15_v2, 0.0  ;;  %v23_v7 = vsel %vm19_vm1, %v16_v3, 0.0  ;;  %v37_v8 = vmul.f32 %v14_v1, %v14_v1 }
   0x3   :  { %v22_v9 = vadd.f32 %v21_v6, %v20_v5  ;;  %v38_v10 = vmul.f32 %v15_v2, %v15_v2  ;;  %v39_v11 = vmul.f32 %v16_v3, %v16_v3  ;;  %v25_v12 = vsel %vm19_vm1, %v17_v4, 0.0 }
   0x4   :  { %v40_v13 = vmul.f32 %v17_v4, %v17_v4  ;;  %v41_v14 = vsel %vm19_vm1, %v37_v8, 0.0 }
   0x5   :  { %v24_v15 = vadd.f32 %v23_v7, %v22_v9  ;;  %v42_v16 = vsel %vm19_vm1, %v38_v10, 0.0  ;;  %v44_v17 = vsel %vm19_vm1, %v39_v11, 0.0 }
   0x6   :  { %v43_v18 = vadd.f32 %v42_v16, %v41_v14  ;;  %v46_v20 = vsel %vm19_vm1, %v40_v13, 0.0 }
   0x7   :  { %v26_v19 = vadd.f32 %v25_v12, %v24_v15 }
   0x8   :  { %v45_v21 = vadd.f32 %v44_v17, %v43_v18  ;;  %v18_v31 = vld [vmem:[%s107_s1] sm:$0x1]  ;;  %v36_v36 = vld [vmem:[%s107_s1 + $0x1] sm:$0x1] }
   0x9   :  { %v27_v22 = vrot.slane %v26_v19, 4 }
   0xa   :  { %v47_v23 = vadd.f32 %v46_v20, %v45_v21 }
   0xb   :  { %v28_v24 = vadd.f32 %v27_v22, %v26_v19 }
   0xc   :  { %v48_v25 = vrot.slane %v47_v23, 4 }
   0xd   :  { %v29_v26 = vrot.slane %v28_v24, 2 }
   0xe   :  { %v49_v27 = vadd.f32 %v48_v25, %v47_v23 }
   0xf   :  { %v30_v28 = vadd.f32 %v29_v26, %v28_v24 }
  0x10   :  { %v50_v29 = vrot.slane %v49_v27, 2 }
  0x11   :  { %v31_v30 = vrot.slane %v30_v28, 1 }
  0x12   :  { %v51_v32 = vadd.f32 %v50_v29, %v49_v27 }
  0x13   :  { %v32_v33 = vadd.f32 %v31_v30, %v30_v28 }
  0x14   :  { %v52_v34 = vrot.slane %v51_v32, 1 }
  0x15   :  { %v33_v35 = vadd.f32 %v32_v33, %v18_v31 }
  0x16   :  { %v53_v37 = vadd.f32 %v52_v34, %v51_v32 }
  0x17   :  { %35 = vst.msk [vmem:[%s107_s1] sm:$0x1] %vm34_vm2, %v33_v35 }
  0x18   :  { %v54_v38 = vadd.f32 %v53_v37, %v36_v36 }
  0x1a   :  { %55 = vst.msk [vmem:[%s107_s1 + $0x1] sm:$0x1] %vm34_vm2, %v54_v38 }

// kernel: ftgan_encoder_forward.17
= control target key start
LH: loop header
LB: loop body
LE: loop exit
PB: predicated region body
PF: predicated region fallthrough
CT: control target
= control target key end

     0   :  { %s148_s0 = inlined_call_operand.vmem [shape: f32[32,32], index: 0, kind: input, shape index: {}]   ;;  %s149_s1 = inlined_call_operand.vmem [shape: f32[1,32], index: 1, kind: input, shape index: {}]   ;;  %s150_s2 = inlined_call_operand.vmem [shape: f32[1,32], index: 2, kind: input, shape index: {}]   ;;  %s151_s3 = inlined_call_operand.hbm [shape: f32[32,32], index: 3, kind: output, shape index: {}]  }
   0x1   :  { %v15_v0 = vld [vmem:[%s148_s0] sm:$0xff]  ;;  %v16_v4 = vld [vmem:[%s148_s0 + $0x8] sm:$0xff]  ;;  %v17_v5 = vld [vmem:[%s148_s0 + $0x10] sm:$0xff] }
   0x2   :  { %v66_v1 = vld [vmem:[%s149_s1] ss:$0 sm:$0xff]  ;;  %v18_v6 = vld [vmem:[%s148_s0 + $0x18] sm:$0xff] }
   0x3   :  { %v67_v2 = vld [vmem:[%s150_s2] ss:$0 sm:$0xff]  ;;  %v26_v3 = vmul.f32 %v66_v1, %v15_v0  ;;  %v27_v7 = vmul.f32 %v66_v1, %v16_v4  ;;  %v28_v8 = vmul.f32 %v66_v1, %v17_v5  ;;  %v29_v9 = vmul.f32 %v66_v1, %v18_v6 }
   0x4   :  { %8 = vsyncpa [#allocation3], 0  ;;  %s95_s1 = smov [#allocation2]   ;;  %vm45_vm0 = vcmask 261120  }
   0x5   :  { %v37_v10 = vadd.f32 %v67_v2, %v26_v3  ;;  %s55_s2 = sshll.u32 %s95_s1, 4  ;;  %v38_v11 = vadd.f32 %v67_v2, %v27_v7  ;;  %v39_v12 = vadd.f32 %v67_v2, %v28_v8  ;;  %v40_v13 = vadd.f32 %v67_v2, %v29_v9  ;;  %s56_s2 = int_to_ptr.vmem [resolvable:$true] %s55_s2 }
   0x6   :  { %s71_s0 = scalar_lea.vmem %s56_s2, 512  ;;  %p76_p1 = scmp.lt.s32.totalorder %s56_s2, %s56_s2 }
   0x7   :  { %v41_v14 = vmax.f32 %v37_v10, 0.0  ;;  %v42_v15 = vmax.f32 %v38_v11, 0.0  ;;  %v43_v16 = vmax.f32 %v39_v12, 0.0  ;;  %v44_v17 = vmax.f32 %v40_v13, 0.0  ;;  %p72_p0 = scmp.ne.s32.totalorder %s56_s2, %s71_s0  ;;  %p77_p2 = scmp.lt.s32.totalorder %s71_s0, %s71_s0 }
   0x9   :  { %46 = vst.msk [vmem:[#allocation2] sm:$0xff] %vm45_vm0, %v41_v14  ;;  %47 = vst.msk [vmem:[#allocation2 + $0x8] sm:$0xff] %vm45_vm0, %v42_v15  ;;  %p78_p3 = por %p77_p2, %p76_p1 }
   0xa   :  { %48 = vst.msk [vmem:[#allocation2 + $0x10] sm:$0xff] %vm45_vm0, %v43_v16  ;;  %49 = vst.msk [vmem:[#allocation2 + $0x18] sm:$0xff] %vm45_vm0, %v44_v17 }
   0xb   :  { %p79_p4 = pnand %p78_p3, %p72_p0 }
   0xd   :  { %82 = shalt.err (!%p79_p4)
}
   0xe   :  { %s83_s26 = scalar_lea.hbm %s151_s3, 512 }
   0xf   :  { %p84_p5 = scmp.ne.s32.totalorder %s151_s3, %s83_s26  ;;  %p87_p6 = scmp.lt.u32.totalorder %s83_s26, %s151_s3 }
  0x11   :  { %p89_p7 = pnand %p87_p6, %p84_p5 }
  0x13   :  { %92 = shalt.err (!%p89_p7)
}
  0x14   :  { %s96_s4 = smov 128   ;;  %s97_s5 = smov 8  }
  0x15   :  { %61 = dma.vmem_to_hbm [thread:$0]  %s56_s2, 512, %s151_s3, [#allocation3], %s96_s4, %s96_s4, %s97_s5  }
  0x16   :  { %93 = dma.done.wait [#allocation3], 512  }
  0x17   :  { %94 = vsyncadd [#allocation3], 4294966784 }
  0x18   :  { %65 = vsyncpa [#allocation3], 1 }

</bundles_post_ra>
